<compile_context>
chip_gen: v6e
topology: v6e:2x2x1
jax: 0.10.0
libtpu: 0.0.40
codegen_flags: <defaults>
</compile_context>

<pallas_src>
import functools

import jax
import jax.numpy as jnp
from jax import lax
from jax.experimental import pallas as pl
from jax.experimental.pallas import tpu as pltpu

LN_EPS = 1e-5            # torch.nn.LayerNorm default
_INV_SQRT2 = 0.7071067811865476


def _gelu_exact(x):
    # torch.nn.GELU() default: exact erf formulation (erf rides the EUP slot).
    return 0.5 * x * (1.0 + lax.erf(x * _INV_SQRT2))


# ---------------------------------------------------------------------------
# Fused backbone kernel: one grid step == `bt` batch elements, all blocks fused.
# Activation layout throughout: [P, bt*C]  (patches on sublanes, batch*channel
# on lanes, lane-dense when bt*C >= 128).
# ---------------------------------------------------------------------------
def _backbone_kernel(block_num, bt, chan,
                     x_ref, fcw_ref, fcb_ref, mavg_ref,
                     tg_ref, tb_ref, tw1_ref, tb1_ref, tw2_ref, tb2_ref,
                     cg_ref, cb_ref, cw1_ref, cb1_ref, cw2_ref, cb2_ref,
                     fg_ref, fb_ref,
                     o_ref):
    P = x_ref.shape[1]
    cin = x_ref.shape[2]
    C = chan

    # ---- first_conv (1x1 conv == per-pixel linear).  K = Cin is tiny, so do
    # it as Cin broadcast-FMAs on the VPU instead of a nearly-empty MXU pass.
    cols = []
    for b in range(bt):
        xb = x_ref[b]                                         # [P, Cin]
        acc = jnp.zeros((P, C), jnp.float32) + fcb_ref[...]   # [P, C]
        for ci in range(cin):
            acc = acc + xb[:, ci:ci + 1] * fcw_ref[ci:ci + 1, :]
        cols.append(acc)
    x = jnp.concatenate(cols, axis=1)                         # [P, bt*C]

    mavg = mavg_ref[...]           # [bt*C, bt*C] block-diag per-group averager

    # TODO(synk): at larger block_num switch this static unroll to
    # lax.fori_loop(unroll=True) (or a block grid axis) to bound vreg pressure.
    for blk in range(block_num):
        # ---- token mixing: LN over the patch (sublane) axis, transpose-free
        # left-contracting matmuls with host-pre-transposed weights.
        mu = jnp.mean(x, axis=0, keepdims=True)
        xc = x - mu
        var = jnp.mean(xc * xc, axis=0, keepdims=True)
        xn = xc * lax.rsqrt(var + LN_EPS) * tg_ref[blk] + tb_ref[blk]    # [P, btC]
        h = jnp.dot(tw1_ref[blk], xn,
                    preferred_element_type=jnp.float32) + tb1_ref[blk]   # [2P, btC]
        h = _gelu_exact(h)
        y = jnp.dot(tw2_ref[blk], h,
                    preferred_element_type=jnp.float32) + tb2_ref[blk]   # [P, btC]
        x = x + y                                                        # residual

        # ---- channel mixing: per-lane-group LN stats via the block-diagonal
        # averaging matmul (MXU is otherwise idle here), block-diagonal
        # kron(I_bt, W) weights so all bt batches share one full-lane matmul.
        mu = jnp.dot(x, mavg, preferred_element_type=jnp.float32)
        xc = x - mu
        var = jnp.dot(xc * xc, mavg, preferred_element_type=jnp.float32)
        xn = xc * lax.rsqrt(var + LN_EPS) * cg_ref[blk] + cb_ref[blk]    # [P, btC]
        h = jnp.dot(xn, cw1_ref[blk],
                    preferred_element_type=jnp.float32) + cb1_ref[blk]   # [P, 2btC]
        h = _gelu_exact(h)
        y = jnp.dot(h, cw2_ref[blk],
                    preferred_element_type=jnp.float32) + cb2_ref[blk]   # [P, btC]
        x = x + y                                                        # residual

    # ---- final LayerNorm over channels (same block-diag averaging trick)
    mu = jnp.dot(x, mavg, preferred_element_type=jnp.float32)
    xc = x - mu
    var = jnp.dot(xc * xc, mavg, preferred_element_type=jnp.float32)
    xf = xc * lax.rsqrt(var + LN_EPS) * fg_ref[...] + fb_ref[...]        # [P, btC]

    # ---- fold permute(0, 2, 1) into the kernel: one XLU transpose, then
    # per-batch [C, P] slabs into the [bt, C, P] output block.
    xf_t = xf.T                                                          # [btC, P]
    for b in range(bt):
        o_ref[b] = xf_t[b * C:(b + 1) * C, :]


def _full_spec(shape):
    nd = len(shape)
    return pl.BlockSpec(shape, lambda i: (0,) * nd)


# ---------------------------------------------------------------------------
# Host-side parameter packing (stack blocks, pre-transpose token weights,
# build bt-block-diagonal channel-mix weights / averaging matrix).
# ---------------------------------------------------------------------------
def _pack_params(params, num_patch, channel_num, bt):
    blocks = params["blocks"]
    P, C = num_patch, channel_num
    eye = jnp.eye(bt, dtype=jnp.float32)

    def stack(fn):
        return jnp.stack([fn(b) for b in blocks], axis=0)

    def tile_lanes(v):             # [1, D] -> [1, bt*D]
        return jnp.tile(v, (1, bt))

    def bdiag(w):                  # [K, N] -> [bt*K, bt*N] block-diagonal
        return jnp.kron(eye, w)

    mavg = jnp.kron(eye, jnp.full((C, C), 1.0 / C, jnp.float32))

    return {
        "fc_w": params["first_conv_w"],                        # [Cin, C]
        "fc_b": params["first_conv_b"],                        # [1, C]
        "mavg": mavg,                                          # [btC, btC]
        # token-mix FF (dim = P); weights pre-transposed so the kernel never
        # transposes the activation.
        "tok_g":   stack(lambda b: b["token"]["ln_g"].reshape(P, 1)),
        "tok_b":   stack(lambda b: b["token"]["ln_b"].reshape(P, 1)),
        "tok_w1t": stack(lambda b: b["token"]["w1"].T),        # [NB, 2P, P]
        "tok_b1":  stack(lambda b: b["token"]["b1"].reshape(2 * P, 1)),
        "tok_w2t": stack(lambda b: b["token"]["w2"].T),        # [NB, P, 2P]
        "tok_b2":  stack(lambda b: b["token"]["b2"].reshape(P, 1)),
        # channel-mix FF (dim = C), bt-block-diagonal / lane-tiled.
        "ch_g":  stack(lambda b: tile_lanes(b["channel"]["ln_g"])),   # [NB,1,btC]
        "ch_b":  stack(lambda b: tile_lanes(b["channel"]["ln_b"])),
        "ch_w1": stack(lambda b: bdiag(b["channel"]["w1"])),          # [NB,btC,2btC]
        "ch_b1": stack(lambda b: tile_lanes(b["channel"]["b1"])),     # [NB,1,2btC]
        "ch_w2": stack(lambda b: bdiag(b["channel"]["w2"])),          # [NB,2btC,btC]
        "ch_b2": stack(lambda b: tile_lanes(b["channel"]["b2"])),     # [NB,1,btC]
        "fin_g": tile_lanes(params["ln_g"]),                   # [1, btC]
        "fin_b": tile_lanes(params["ln_b"]),
    }


def _choose_batch_tile(B, C):
    # Fill >= 128 lanes per step if the batch allows it, but keep >= 2 grid
    # steps so v7x's two TensorCores both get work ("parallel" grid axis).
    bt = max(1, min(B, max(1, 128 // C)))
    while B % bt:
        bt -= 1
    if bt == B and B >= 2:
        bt = B // 2
        while B % bt:
            bt -= 1
    return bt


# ---------------------------------------------------------------------------
# Forward (mirrors the PyTorch forward exactly for the backbone)
# ---------------------------------------------------------------------------
def mlp_mixer_forward(x_nchw, params, board_size, batch_tile=None):
    B, Cin, H, W = x_nchw.shape
    C = params["first_conv_w"].shape[1]
    P = H * W
    NB = len(params["blocks"])
    bt = _choose_batch_tile(B, C) if batch_tile is None else batch_tile
    assert B % bt == 0, "batch must be divisible by the batch tile"
    steps = B // bt

    packed = _pack_params(params, P, C, bt)

    # NCHW -> token-major [B, P, Cin]  (tiny B*P*Cin host relayout; the kernel
    # then reads per-patch sublane columns with no in-kernel transpose).
    x = jnp.transpose(x_nchw, (0, 2, 3, 1)).reshape(B, P, Cin)

    weight_args = (
        packed["fc_w"], packed["fc_b"], packed["mavg"],
        packed["tok_g"], packed["tok_b"], packed["tok_w1t"], packed["tok_b1"],
        packed["tok_w2t"], packed["tok_b2"],
        packed["ch_g"], packed["ch_b"], packed["ch_w1"], packed["ch_b1"],
        packed["ch_w2"], packed["ch_b2"],
        packed["fin_g"], packed["fin_b"],
    )

    btC = bt * C
    flops_step = (2 * bt * P * Cin * C
                  + NB * (8 * P * P * btC + 12 * P * btC * btC)
                  + 4 * P * btC * btC)
    flops = int(steps * flops_step)
    transcendentals = int(B * NB * 4 * P * C)
    weight_elems = sum(int(w.size) for w in weight_args)
    bytes_accessed = int(4 * (x.size + B * P * C + steps * weight_elems))

    out = pl.pallas_call(
        functools.partial(_backbone_kernel, NB, bt, C),
        grid=(steps,),
        out_shape=jax.ShapeDtypeStruct((B, C, P), jnp.float32),
        in_specs=[pl.BlockSpec((bt, P, Cin), lambda i: (i, 0, 0))]
                 + [_full_spec(tuple(w.shape)) for w in weight_args],
        out_specs=pl.BlockSpec((bt, C, P), lambda i: (i, 0, 0)),
        compiler_params=pltpu.CompilerParams(
            dimension_semantics=("parallel",)),
        cost_estimate=pl.CostEstimate(
            flops=flops, transcendentals=transcendentals,
            bytes_accessed=bytes_accessed),
    )(x, *weight_args)

    # Kernel already wrote [B, C, P]; reshaping to the NCHW feature map is free.
    feat = out.reshape(B, C, board_size, board_size)
    # TODO(synk): PolicyHead / ValueHead are not defined in the reference
    # source; return the shared backbone feature map for both outputs.
    return feat, feat


# ---------------------------------------------------------------------------
# Plain-JAX reference (mirrors the PyTorch forward) for a correctness check
# ---------------------------------------------------------------------------
def _ff_ref(x, p):
    mu = jnp.mean(x, axis=-1, keepdims=True)
    xc = x - mu
    var = jnp.mean(xc * xc, axis=-1, keepdims=True)
    xn = xc * lax.rsqrt(var + LN_EPS) * p["ln_g"] + p["ln_b"]
    h = _gelu_exact(xn @ p["w1"] + p["b1"])
    return h @ p["w2"] + p["b2"]


def _reference_forward(x_nchw, params, board_size):
    B, Cin, H, W = x_nchw.shape
    C = params["first_conv_w"].shape[1]
    P = H * W
    x = jnp.transpose(x_nchw, (0, 2, 3, 1)).reshape(B, P, Cin)
    x = x @ params["first_conv_w"] + params["first_conv_b"]
    for bp in params["blocks"]:
        s = x
        t = _ff_ref(jnp.transpose(x, (0, 2, 1)), bp["token"])
        x = jnp.transpose(t, (0, 2, 1)) + s
        x = x + _ff_ref(x, bp["channel"])
    mu = jnp.mean(x, axis=-1, keepdims=True)
    xc = x - mu
    var = jnp.mean(xc * xc, axis=-1, keepdims=True)
    x = xc * lax.rsqrt(var + LN_EPS) * params["ln_g"] + params["ln_b"]
    return jnp.transpose(x, (0, 2, 1)).reshape(B, C, board_size, board_size)


# ---------------------------------------------------------------------------
# Deterministic parameter init (synthetic weights, [in, out] layout)
# ---------------------------------------------------------------------------
def _ff_params(key, dim):
    hidden = dim * 2
    k1, k2 = jax.random.split(key)
    return {
        "ln_g": jnp.ones((1, dim), jnp.float32),
        "ln_b": jnp.zeros((1, dim), jnp.float32),
        "w1": 0.02 * jax.random.normal(k1, (dim, hidden), jnp.float32),
        "b1": jnp.zeros((1, hidden), jnp.float32),
        "w2": 0.02 * jax.random.normal(k2, (hidden, dim), jnp.float32),
        "b2": jnp.zeros((1, dim), jnp.float32),
    }


def init_params(key, input_channel_num, block_num, channel_num, board_size):
    num_patch = board_size * board_size
    keys = jax.random.split(key, 1 + 2 * block_num)
    params = {
        "first_conv_w": 0.02 * jax.random.normal(
            keys[0], (input_channel_num, channel_num), jnp.float32),
        "first_conv_b": jnp.zeros((1, channel_num), jnp.float32),
        "blocks": [],
        "ln_g": jnp.ones((1, channel_num), jnp.float32),
        "ln_b": jnp.zeros((1, channel_num), jnp.float32),
    }
    for i in range(block_num):
        params["blocks"].append({
            "token": _ff_params(keys[1 + 2 * i], num_patch),
            "channel": _ff_params(keys[2 + 2 * i], channel_num),
        })
    return params


# ---------------------------------------------------------------------------
if __name__ == "__main__":
    input_channel_num = 4
    block_num = 2
    channel_num = 32
    policy_channel_num = 8   # heads undefined in reference; unused
    board_size = 8
    batch = 8                # -> batch tile 4 per step (bt*C = 128 lanes), 2 grid steps

    key = jax.random.PRNGKey(0)
    k_x, k_p = jax.random.split(key)
    x = jax.random.normal(
        k_x, (batch, input_channel_num, board_size, board_size), jnp.float32)
    params = init_params(k_p, input_channel_num, block_num, channel_num,
                         board_size)

    policy, value = mlp_mixer_forward(x, params, board_size)
    jax.block_until_ready((policy, value))

    assert policy.shape == (batch, channel_num, board_size, board_size)
    assert value.shape == (batch, channel_num, board_size, board_size)

    # numerical check against a plain-JAX reference of the PyTorch forward
    with jax.default_matmul_precision("highest"):
        ref = _reference_forward(x, params, board_size)
    ref = jax.block_until_ready(ref)
    err = float(jnp.max(jnp.abs(policy - ref)))
    assert err < 5e-3, f"mismatch vs reference: max abs err = {err}"

    print("KERNEL_OK")
</pallas_src>

<mosaic_0001>
module attributes {stable_mosaic.version = 11 : i64} {
  func.func @_backbone_kernel(%arg0: i32, %arg1: memref<4x64x4xf32, #tpu.memory_space<vmem>>, %arg2: memref<4x32xf32, #tpu.memory_space<vmem>>, %arg3: memref<1x32xf32, #tpu.memory_space<vmem>>, %arg4: memref<128x128xf32, #tpu.memory_space<vmem>>, %arg5: memref<2x64x1xf32, #tpu.memory_space<vmem>>, %arg6: memref<2x64x1xf32, #tpu.memory_space<vmem>>, %arg7: memref<2x128x64xf32, #tpu.memory_space<vmem>>, %arg8: memref<2x128x1xf32, #tpu.memory_space<vmem>>, %arg9: memref<2x64x128xf32, #tpu.memory_space<vmem>>, %arg10: memref<2x64x1xf32, #tpu.memory_space<vmem>>, %arg11: memref<2x1x128xf32, #tpu.memory_space<vmem>>, %arg12: memref<2x1x128xf32, #tpu.memory_space<vmem>>, %arg13: memref<2x128x256xf32, #tpu.memory_space<vmem>>, %arg14: memref<2x1x256xf32, #tpu.memory_space<vmem>>, %arg15: memref<2x256x128xf32, #tpu.memory_space<vmem>>, %arg16: memref<2x1x128xf32, #tpu.memory_space<vmem>>, %arg17: memref<1x128xf32, #tpu.memory_space<vmem>>, %arg18: memref<1x128xf32, #tpu.memory_space<vmem>>, %arg19: memref<4x32x64xf32, #tpu.memory_space<vmem>>) attributes {dimension_semantics = [#tpu.dimension_semantics<parallel>], iteration_bounds = array<i64: 2>, scalar_prefetch = 0 : i64, scratch_operands = 0 : i64, tpu.core_type = #tpu.core_type<tc>, window_params = [{transform_indices = @transform_0, window_bounds = array<i64: 4, 64, 4>}, {pipeline_mode = #tpu.pipeline_mode<synchronous>, transform_indices = @transform_1, window_bounds = array<i64: 4, 32>}, {pipeline_mode = #tpu.pipeline_mode<synchronous>, transform_indices = @transform_2, window_bounds = array<i64: 1, 32>}, {pipeline_mode = #tpu.pipeline_mode<synchronous>, transform_indices = @transform_3, window_bounds = array<i64: 128, 128>}, {pipeline_mode = #tpu.pipeline_mode<synchronous>, transform_indices = @transform_4, window_bounds = array<i64: 2, 64, 1>}, {pipeline_mode = #tpu.pipeline_mode<synchronous>, transform_indices = @transform_5, window_bounds = array<i64: 2, 64, 1>}, {pipeline_mode = #tpu.pipeline_mode<synchronous>, transform_indices = @transform_6, window_bounds = array<i64: 2, 128, 64>}, {pipeline_mode = #tpu.pipeline_mode<synchronous>, transform_indices = @transform_7, window_bounds = array<i64: 2, 128, 1>}, {pipeline_mode = #tpu.pipeline_mode<synchronous>, transform_indices = @transform_8, window_bounds = array<i64: 2, 64, 128>}, {pipeline_mode = #tpu.pipeline_mode<synchronous>, transform_indices = @transform_9, window_bounds = array<i64: 2, 64, 1>}, {pipeline_mode = #tpu.pipeline_mode<synchronous>, transform_indices = @transform_10, window_bounds = array<i64: 2, 1, 128>}, {pipeline_mode = #tpu.pipeline_mode<synchronous>, transform_indices = @transform_11, window_bounds = array<i64: 2, 1, 128>}, {pipeline_mode = #tpu.pipeline_mode<synchronous>, transform_indices = @transform_12, window_bounds = array<i64: 2, 128, 256>}, {pipeline_mode = #tpu.pipeline_mode<synchronous>, transform_indices = @transform_13, window_bounds = array<i64: 2, 1, 256>}, {pipeline_mode = #tpu.pipeline_mode<synchronous>, transform_indices = @transform_14, window_bounds = array<i64: 2, 256, 128>}, {pipeline_mode = #tpu.pipeline_mode<synchronous>, transform_indices = @transform_15, window_bounds = array<i64: 2, 1, 128>}, {pipeline_mode = #tpu.pipeline_mode<synchronous>, transform_indices = @transform_16, window_bounds = array<i64: 1, 128>}, {pipeline_mode = #tpu.pipeline_mode<synchronous>, transform_indices = @transform_17, window_bounds = array<i64: 1, 128>}, {transform_indices = @transform_18, window_bounds = array<i64: 4, 32, 64>}]} {
    %c0 = arith.constant 0 : index
    %c0_0 = arith.constant 0 : index
    %c0_1 = arith.constant 0 : index
    %0 = vector.load %arg1[%c0, %c0_0, %c0_1] : memref<4x64x4xf32, #tpu.memory_space<vmem>>, vector<1x64x4xf32>
    %1 = vector.shape_cast %0 : vector<1x64x4xf32> to vector<64x4xf32>
    %cst = arith.constant 0.000000e+00 : f32
    %2 = vector.broadcast %cst : f32 to vector<64x32xf32>
    %c0_2 = arith.constant 0 : index
    %c0_3 = arith.constant 0 : index
    %3 = vector.load %arg3[%c0_2, %c0_3] : memref<1x32xf32, #tpu.memory_space<vmem>>, vector<1x32xf32>
    %4 = vector.broadcast %3 : vector<1x32xf32> to vector<64x32xf32>
    %5 = arith.addf %2, %4 : vector<64x32xf32>
    %6 = vector.extract_strided_slice %1 {offsets = [0, 0], sizes = [64, 1], strides = [1, 1]} : vector<64x4xf32> to vector<64x1xf32>
    %c0_4 = arith.constant 0 : index
    %c0_5 = arith.constant 0 : index
    %7 = vector.load %arg2[%c0_4, %c0_5] : memref<4x32xf32, #tpu.memory_space<vmem>>, vector<1x32xf32>
    %8 = vector.broadcast %6 : vector<64x1xf32> to vector<64x32xf32>
    %9 = vector.broadcast %7 : vector<1x32xf32> to vector<64x32xf32>
    %10 = arith.mulf %8, %9 : vector<64x32xf32>
    %11 = arith.addf %5, %10 : vector<64x32xf32>
    %12 = vector.extract_strided_slice %1 {offsets = [0, 1], sizes = [64, 1], strides = [1, 1]} : vector<64x4xf32> to vector<64x1xf32>
    %c1 = arith.constant 1 : index
    %c0_6 = arith.constant 0 : index
    %13 = vector.load %arg2[%c1, %c0_6] : memref<4x32xf32, #tpu.memory_space<vmem>>, vector<1x32xf32>
    %14 = vector.broadcast %12 : vector<64x1xf32> to vector<64x32xf32>
    %15 = vector.broadcast %13 : vector<1x32xf32> to vector<64x32xf32>
    %16 = arith.mulf %14, %15 : vector<64x32xf32>
    %17 = arith.addf %11, %16 : vector<64x32xf32>
    %18 = vector.extract_strided_slice %1 {offsets = [0, 2], sizes = [64, 1], strides = [1, 1]} : vector<64x4xf32> to vector<64x1xf32>
    %c2 = arith.constant 2 : index
    %c0_7 = arith.constant 0 : index
    %19 = vector.load %arg2[%c2, %c0_7] : memref<4x32xf32, #tpu.memory_space<vmem>>, vector<1x32xf32>
    %20 = vector.broadcast %18 : vector<64x1xf32> to vector<64x32xf32>
    %21 = vector.broadcast %19 : vector<1x32xf32> to vector<64x32xf32>
    %22 = arith.mulf %20, %21 : vector<64x32xf32>
    %23 = arith.addf %17, %22 : vector<64x32xf32>
    %24 = vector.extract_strided_slice %1 {offsets = [0, 3], sizes = [64, 1], strides = [1, 1]} : vector<64x4xf32> to vector<64x1xf32>
    %c3 = arith.constant 3 : index
    %c0_8 = arith.constant 0 : index
    %25 = vector.load %arg2[%c3, %c0_8] : memref<4x32xf32, #tpu.memory_space<vmem>>, vector<1x32xf32>
    %26 = vector.broadcast %24 : vector<64x1xf32> to vector<64x32xf32>
    %27 = vector.broadcast %25 : vector<1x32xf32> to vector<64x32xf32>
    %28 = arith.mulf %26, %27 : vector<64x32xf32>
    %29 = arith.addf %23, %28 : vector<64x32xf32>
    %c1_9 = arith.constant 1 : index
    %c0_10 = arith.constant 0 : index
    %c0_11 = arith.constant 0 : index
    %30 = vector.load %arg1[%c1_9, %c0_10, %c0_11] : memref<4x64x4xf32, #tpu.memory_space<vmem>>, vector<1x64x4xf32>
    %31 = vector.shape_cast %30 : vector<1x64x4xf32> to vector<64x4xf32>
    %cst_12 = arith.constant 0.000000e+00 : f32
    %32 = vector.broadcast %cst_12 : f32 to vector<64x32xf32>
    %c0_13 = arith.constant 0 : index
    %c0_14 = arith.constant 0 : index
    %33 = vector.load %arg3[%c0_13, %c0_14] : memref<1x32xf32, #tpu.memory_space<vmem>>, vector<1x32xf32>
    %34 = vector.broadcast %33 : vector<1x32xf32> to vector<64x32xf32>
    %35 = arith.addf %32, %34 : vector<64x32xf32>
    %36 = vector.extract_strided_slice %31 {offsets = [0, 0], sizes = [64, 1], strides = [1, 1]} : vector<64x4xf32> to vector<64x1xf32>
    %c0_15 = arith.constant 0 : index
    %c0_16 = arith.constant 0 : index
    %37 = vector.load %arg2[%c0_15, %c0_16] : memref<4x32xf32, #tpu.memory_space<vmem>>, vector<1x32xf32>
    %38 = vector.broadcast %36 : vector<64x1xf32> to vector<64x32xf32>
    %39 = vector.broadcast %37 : vector<1x32xf32> to vector<64x32xf32>
    %40 = arith.mulf %38, %39 : vector<64x32xf32>
    %41 = arith.addf %35, %40 : vector<64x32xf32>
    %42 = vector.extract_strided_slice %31 {offsets = [0, 1], sizes = [64, 1], strides = [1, 1]} : vector<64x4xf32> to vector<64x1xf32>
    %c1_17 = arith.constant 1 : index
    %c0_18 = arith.constant 0 : index
    %43 = vector.load %arg2[%c1_17, %c0_18] : memref<4x32xf32, #tpu.memory_space<vmem>>, vector<1x32xf32>
    %44 = vector.broadcast %42 : vector<64x1xf32> to vector<64x32xf32>
    %45 = vector.broadcast %43 : vector<1x32xf32> to vector<64x32xf32>
    %46 = arith.mulf %44, %45 : vector<64x32xf32>
    %47 = arith.addf %41, %46 : vector<64x32xf32>
    %48 = vector.extract_strided_slice %31 {offsets = [0, 2], sizes = [64, 1], strides = [1, 1]} : vector<64x4xf32> to vector<64x1xf32>
    %c2_19 = arith.constant 2 : index
    %c0_20 = arith.constant 0 : index
    %49 = vector.load %arg2[%c2_19, %c0_20] : memref<4x32xf32, #tpu.memory_space<vmem>>, vector<1x32xf32>
    %50 = vector.broadcast %48 : vector<64x1xf32> to vector<64x32xf32>
    %51 = vector.broadcast %49 : vector<1x32xf32> to vector<64x32xf32>
    %52 = arith.mulf %50, %51 : vector<64x32xf32>
    %53 = arith.addf %47, %52 : vector<64x32xf32>
    %54 = vector.extract_strided_slice %31 {offsets = [0, 3], sizes = [64, 1], strides = [1, 1]} : vector<64x4xf32> to vector<64x1xf32>
    %c3_21 = arith.constant 3 : index
    %c0_22 = arith.constant 0 : index
    %55 = vector.load %arg2[%c3_21, %c0_22] : memref<4x32xf32, #tpu.memory_space<vmem>>, vector<1x32xf32>
    %56 = vector.broadcast %54 : vector<64x1xf32> to vector<64x32xf32>
    %57 = vector.broadcast %55 : vector<1x32xf32> to vector<64x32xf32>
    %58 = arith.mulf %56, %57 : vector<64x32xf32>
    %59 = arith.addf %53, %58 : vector<64x32xf32>
    %c2_23 = arith.constant 2 : index
    %c0_24 = arith.constant 0 : index
    %c0_25 = arith.constant 0 : index
    %60 = vector.load %arg1[%c2_23, %c0_24, %c0_25] : memref<4x64x4xf32, #tpu.memory_space<vmem>>, vector<1x64x4xf32>
    %61 = vector.shape_cast %60 : vector<1x64x4xf32> to vector<64x4xf32>
    %cst_26 = arith.constant 0.000000e+00 : f32
    %62 = vector.broadcast %cst_26 : f32 to vector<64x32xf32>
    %c0_27 = arith.constant 0 : index
    %c0_28 = arith.constant 0 : index
    %63 = vector.load %arg3[%c0_27, %c0_28] : memref<1x32xf32, #tpu.memory_space<vmem>>, vector<1x32xf32>
    %64 = vector.broadcast %63 : vector<1x32xf32> to vector<64x32xf32>
    %65 = arith.addf %62, %64 : vector<64x32xf32>
    %66 = vector.extract_strided_slice %61 {offsets = [0, 0], sizes = [64, 1], strides = [1, 1]} : vector<64x4xf32> to vector<64x1xf32>
    %c0_29 = arith.constant 0 : index
    %c0_30 = arith.constant 0 : index
    %67 = vector.load %arg2[%c0_29, %c0_30] : memref<4x32xf32, #tpu.memory_space<vmem>>, vector<1x32xf32>
    %68 = vector.broadcast %66 : vector<64x1xf32> to vector<64x32xf32>
    %69 = vector.broadcast %67 : vector<1x32xf32> to vector<64x32xf32>
    %70 = arith.mulf %68, %69 : vector<64x32xf32>
    %71 = arith.addf %65, %70 : vector<64x32xf32>
    %72 = vector.extract_strided_slice %61 {offsets = [0, 1], sizes = [64, 1], strides = [1, 1]} : vector<64x4xf32> to vector<64x1xf32>
    %c1_31 = arith.constant 1 : index
    %c0_32 = arith.constant 0 : index
    %73 = vector.load %arg2[%c1_31, %c0_32] : memref<4x32xf32, #tpu.memory_space<vmem>>, vector<1x32xf32>
    %74 = vector.broadcast %72 : vector<64x1xf32> to vector<64x32xf32>
    %75 = vector.broadcast %73 : vector<1x32xf32> to vector<64x32xf32>
    %76 = arith.mulf %74, %75 : vector<64x32xf32>
    %77 = arith.addf %71, %76 : vector<64x32xf32>
    %78 = vector.extract_strided_slice %61 {offsets = [0, 2], sizes = [64, 1], strides = [1, 1]} : vector<64x4xf32> to vector<64x1xf32>
    %c2_33 = arith.constant 2 : index
    %c0_34 = arith.constant 0 : index
    %79 = vector.load %arg2[%c2_33, %c0_34] : memref<4x32xf32, #tpu.memory_space<vmem>>, vector<1x32xf32>
    %80 = vector.broadcast %78 : vector<64x1xf32> to vector<64x32xf32>
    %81 = vector.broadcast %79 : vector<1x32xf32> to vector<64x32xf32>
    %82 = arith.mulf %80, %81 : vector<64x32xf32>
    %83 = arith.addf %77, %82 : vector<64x32xf32>
    %84 = vector.extract_strided_slice %61 {offsets = [0, 3], sizes = [64, 1], strides = [1, 1]} : vector<64x4xf32> to vector<64x1xf32>
    %c3_35 = arith.constant 3 : index
    %c0_36 = arith.constant 0 : index
    %85 = vector.load %arg2[%c3_35, %c0_36] : memref<4x32xf32, #tpu.memory_space<vmem>>, vector<1x32xf32>
    %86 = vector.broadcast %84 : vector<64x1xf32> to vector<64x32xf32>
    %87 = vector.broadcast %85 : vector<1x32xf32> to vector<64x32xf32>
    %88 = arith.mulf %86, %87 : vector<64x32xf32>
    %89 = arith.addf %83, %88 : vector<64x32xf32>
    %c3_37 = arith.constant 3 : index
    %c0_38 = arith.constant 0 : index
    %c0_39 = arith.constant 0 : index
    %90 = vector.load %arg1[%c3_37, %c0_38, %c0_39] : memref<4x64x4xf32, #tpu.memory_space<vmem>>, vector<1x64x4xf32>
    %91 = vector.shape_cast %90 : vector<1x64x4xf32> to vector<64x4xf32>
    %cst_40 = arith.constant 0.000000e+00 : f32
    %92 = vector.broadcast %cst_40 : f32 to vector<64x32xf32>
    %c0_41 = arith.constant 0 : index
    %c0_42 = arith.constant 0 : index
    %93 = vector.load %arg3[%c0_41, %c0_42] : memref<1x32xf32, #tpu.memory_space<vmem>>, vector<1x32xf32>
    %94 = vector.broadcast %93 : vector<1x32xf32> to vector<64x32xf32>
    %95 = arith.addf %92, %94 : vector<64x32xf32>
    %96 = vector.extract_strided_slice %91 {offsets = [0, 0], sizes = [64, 1], strides = [1, 1]} : vector<64x4xf32> to vector<64x1xf32>
    %c0_43 = arith.constant 0 : index
    %c0_44 = arith.constant 0 : index
    %97 = vector.load %arg2[%c0_43, %c0_44] : memref<4x32xf32, #tpu.memory_space<vmem>>, vector<1x32xf32>
    %98 = vector.broadcast %96 : vector<64x1xf32> to vector<64x32xf32>
    %99 = vector.broadcast %97 : vector<1x32xf32> to vector<64x32xf32>
    %100 = arith.mulf %98, %99 : vector<64x32xf32>
    %101 = arith.addf %95, %100 : vector<64x32xf32>
    %102 = vector.extract_strided_slice %91 {offsets = [0, 1], sizes = [64, 1], strides = [1, 1]} : vector<64x4xf32> to vector<64x1xf32>
    %c1_45 = arith.constant 1 : index
    %c0_46 = arith.constant 0 : index
    %103 = vector.load %arg2[%c1_45, %c0_46] : memref<4x32xf32, #tpu.memory_space<vmem>>, vector<1x32xf32>
    %104 = vector.broadcast %102 : vector<64x1xf32> to vector<64x32xf32>
    %105 = vector.broadcast %103 : vector<1x32xf32> to vector<64x32xf32>
    %106 = arith.mulf %104, %105 : vector<64x32xf32>
    %107 = arith.addf %101, %106 : vector<64x32xf32>
    %108 = vector.extract_strided_slice %91 {offsets = [0, 2], sizes = [64, 1], strides = [1, 1]} : vector<64x4xf32> to vector<64x1xf32>
    %c2_47 = arith.constant 2 : index
    %c0_48 = arith.constant 0 : index
    %109 = vector.load %arg2[%c2_47, %c0_48] : memref<4x32xf32, #tpu.memory_space<vmem>>, vector<1x32xf32>
    %110 = vector.broadcast %108 : vector<64x1xf32> to vector<64x32xf32>
    %111 = vector.broadcast %109 : vector<1x32xf32> to vector<64x32xf32>
    %112 = arith.mulf %110, %111 : vector<64x32xf32>
    %113 = arith.addf %107, %112 : vector<64x32xf32>
    %114 = vector.extract_strided_slice %91 {offsets = [0, 3], sizes = [64, 1], strides = [1, 1]} : vector<64x4xf32> to vector<64x1xf32>
    %c3_49 = arith.constant 3 : index
    %c0_50 = arith.constant 0 : index
    %115 = vector.load %arg2[%c3_49, %c0_50] : memref<4x32xf32, #tpu.memory_space<vmem>>, vector<1x32xf32>
    %116 = vector.broadcast %114 : vector<64x1xf32> to vector<64x32xf32>
    %117 = vector.broadcast %115 : vector<1x32xf32> to vector<64x32xf32>
    %118 = arith.mulf %116, %117 : vector<64x32xf32>
    %119 = arith.addf %113, %118 : vector<64x32xf32>
    %120 = tpu.concatenate %29, %59, %89, %119 in 1 : vector<64x32xf32>, vector<64x32xf32>, vector<64x32xf32>, vector<64x32xf32> -> vector<64x128xf32>
    %c0_51 = arith.constant 0 : index
    %c0_52 = arith.constant 0 : index
    %121 = vector.load %arg4[%c0_51, %c0_52] : memref<128x128xf32, #tpu.memory_space<vmem>>, vector<128x128xf32>
    %cst_53 = arith.constant dense<0.000000e+00> : vector<128xf32>
    %122 = vector.multi_reduction <add>, %120, %cst_53 [0] : vector<64x128xf32> to vector<128xf32>
    %123 = vector.shape_cast %122 : vector<128xf32> to vector<1x128xf32>
    %cst_54 = arith.constant 6.400000e+01 : f32
    %124 = vector.broadcast %cst_54 : f32 to vector<1x128xf32>
    %125 = arith.divf %123, %124 : vector<1x128xf32>
    %126 = vector.broadcast %125 : vector<1x128xf32> to vector<64x128xf32>
    %127 = arith.subf %120, %126 : vector<64x128xf32>
    %128 = arith.mulf %127, %127 : vector<64x128xf32>
    %cst_55 = arith.constant dense<0.000000e+00> : vector<128xf32>
    %129 = vector.multi_reduction <add>, %128, %cst_55 [0] : vector<64x128xf32> to vector<128xf32>
    %130 = vector.shape_cast %129 : vector<128xf32> to vector<1x128xf32>
    %cst_56 = arith.constant 6.400000e+01 : f32
    %131 = vector.broadcast %cst_56 : f32 to vector<1x128xf32>
    %132 = arith.divf %130, %131 : vector<1x128xf32>
    %cst_57 = arith.constant 9.99999974E-6 : f32
    %133 = vector.broadcast %cst_57 : f32 to vector<1x128xf32>
    %134 = arith.addf %132, %133 : vector<1x128xf32>
    %135 = math.rsqrt %134 : vector<1x128xf32>
    %136 = vector.broadcast %135 : vector<1x128xf32> to vector<64x128xf32>
    %137 = arith.mulf %127, %136 : vector<64x128xf32>
    %c0_58 = arith.constant 0 : index
    %c0_59 = arith.constant 0 : index
    %c0_60 = arith.constant 0 : index
    %138 = vector.load %arg5[%c0_58, %c0_59, %c0_60] : memref<2x64x1xf32, #tpu.memory_space<vmem>>, vector<1x64x1xf32>
    %139 = vector.shape_cast %138 : vector<1x64x1xf32> to vector<64x1xf32>
    %140 = vector.broadcast %139 : vector<64x1xf32> to vector<64x128xf32>
    %141 = arith.mulf %137, %140 : vector<64x128xf32>
    %c0_61 = arith.constant 0 : index
    %c0_62 = arith.constant 0 : index
    %c0_63 = arith.constant 0 : index
    %142 = vector.load %arg6[%c0_61, %c0_62, %c0_63] : memref<2x64x1xf32, #tpu.memory_space<vmem>>, vector<1x64x1xf32>
    %143 = vector.shape_cast %142 : vector<1x64x1xf32> to vector<64x1xf32>
    %144 = vector.broadcast %143 : vector<64x1xf32> to vector<64x128xf32>
    %145 = arith.addf %141, %144 : vector<64x128xf32>
    %c0_64 = arith.constant 0 : index
    %c0_65 = arith.constant 0 : index
    %c0_66 = arith.constant 0 : index
    %146 = vector.load %arg7[%c0_64, %c0_65, %c0_66] : memref<2x128x64xf32, #tpu.memory_space<vmem>>, vector<1x128x64xf32>
    %147 = vector.shape_cast %146 : vector<1x128x64xf32> to vector<128x64xf32>
    %cst_67 = arith.constant dense<0.000000e+00> : vector<128x128xf32>
    %148 = tpu.matmul %147, %145, %cst_67 {dimension_numbers = #tpu.dot_dimension_numbers<[1], [0], [0], [1], [0, 0, 1, 1], [], []>} : vector<128x64xf32>, vector<64x128xf32>, vector<128x128xf32> -> vector<128x128xf32>
    %c0_68 = arith.constant 0 : index
    %c0_69 = arith.constant 0 : index
    %c0_70 = arith.constant 0 : index
    %149 = vector.load %arg8[%c0_68, %c0_69, %c0_70] : memref<2x128x1xf32, #tpu.memory_space<vmem>>, vector<1x128x1xf32>
    %150 = vector.shape_cast %149 : vector<1x128x1xf32> to vector<128x1xf32>
    %151 = vector.broadcast %150 : vector<128x1xf32> to vector<128x128xf32>
    %152 = arith.addf %148, %151 : vector<128x128xf32>
    %cst_71 = arith.constant 5.000000e-01 : f32
    %153 = vector.broadcast %cst_71 : f32 to vector<128x128xf32>
    %154 = arith.mulf %153, %152 : vector<128x128xf32>
    %cst_72 = arith.constant 0.707106769 : f32
    %155 = vector.broadcast %cst_72 : f32 to vector<128x128xf32>
    %156 = arith.mulf %152, %155 : vector<128x128xf32>
    %157 = math.erf %156 : vector<128x128xf32>
    %cst_73 = arith.constant 1.000000e+00 : f32
    %158 = vector.broadcast %cst_73 : f32 to vector<128x128xf32>
    %159 = arith.addf %158, %157 : vector<128x128xf32>
    %160 = arith.mulf %154, %159 : vector<128x128xf32>
    %c0_74 = arith.constant 0 : index
    %c0_75 = arith.constant 0 : index
    %c0_76 = arith.constant 0 : index
    %161 = vector.load %arg9[%c0_74, %c0_75, %c0_76] : memref<2x64x128xf32, #tpu.memory_space<vmem>>, vector<1x64x128xf32>
    %162 = vector.shape_cast %161 : vector<1x64x128xf32> to vector<64x128xf32>
    %cst_77 = arith.constant dense<0.000000e+00> : vector<64x128xf32>
    %163 = tpu.matmul %162, %160, %cst_77 {dimension_numbers = #tpu.dot_dimension_numbers<[1], [0], [0], [1], [0, 0, 1, 1], [], []>} : vector<64x128xf32>, vector<128x128xf32>, vector<64x128xf32> -> vector<64x128xf32>
    %c0_78 = arith.constant 0 : index
    %c0_79 = arith.constant 0 : index
    %c0_80 = arith.constant 0 : index
    %164 = vector.load %arg10[%c0_78, %c0_79, %c0_80] : memref<2x64x1xf32, #tpu.memory_space<vmem>>, vector<1x64x1xf32>
    %165 = vector.shape_cast %164 : vector<1x64x1xf32> to vector<64x1xf32>
    %166 = vector.broadcast %165 : vector<64x1xf32> to vector<64x128xf32>
    %167 = arith.addf %163, %166 : vector<64x128xf32>
    %168 = arith.addf %120, %167 : vector<64x128xf32>
    %cst_81 = arith.constant dense<0.000000e+00> : vector<64x128xf32>
    %169 = tpu.matmul %168, %121, %cst_81 {dimension_numbers = #tpu.dot_dimension_numbers<[1], [0], [0], [1], [0, 0, 1, 1], [], []>} : vector<64x128xf32>, vector<128x128xf32>, vector<64x128xf32> -> vector<64x128xf32>
    %170 = arith.subf %168, %169 : vector<64x128xf32>
    %171 = arith.mulf %170, %170 : vector<64x128xf32>
    %cst_82 = arith.constant dense<0.000000e+00> : vector<64x128xf32>
    %172 = tpu.matmul %171, %121, %cst_82 {dimension_numbers = #tpu.dot_dimension_numbers<[1], [0], [0], [1], [0, 0, 1, 1], [], []>} : vector<64x128xf32>, vector<128x128xf32>, vector<64x128xf32> -> vector<64x128xf32>
    %cst_83 = arith.constant 9.99999974E-6 : f32
    %173 = vector.broadcast %cst_83 : f32 to vector<64x128xf32>
    %174 = arith.addf %172, %173 : vector<64x128xf32>
    %175 = math.rsqrt %174 : vector<64x128xf32>
    %176 = arith.mulf %170, %175 : vector<64x128xf32>
    %c0_84 = arith.constant 0 : index
    %c0_85 = arith.constant 0 : index
    %c0_86 = arith.constant 0 : index
    %177 = vector.load %arg11[%c0_84, %c0_85, %c0_86] : memref<2x1x128xf32, #tpu.memory_space<vmem>>, vector<1x1x128xf32>
    %178 = vector.shape_cast %177 : vector<1x1x128xf32> to vector<1x128xf32>
    %179 = vector.broadcast %178 : vector<1x128xf32> to vector<64x128xf32>
    %180 = arith.mulf %176, %179 : vector<64x128xf32>
    %c0_87 = arith.constant 0 : index
    %c0_88 = arith.constant 0 : index
    %c0_89 = arith.constant 0 : index
    %181 = vector.load %arg12[%c0_87, %c0_88, %c0_89] : memref<2x1x128xf32, #tpu.memory_space<vmem>>, vector<1x1x128xf32>
    %182 = vector.shape_cast %181 : vector<1x1x128xf32> to vector<1x128xf32>
    %183 = vector.broadcast %182 : vector<1x128xf32> to vector<64x128xf32>
    %184 = arith.addf %180, %183 : vector<64x128xf32>
    %c0_90 = arith.constant 0 : index
    %c0_91 = arith.constant 0 : index
    %c0_92 = arith.constant 0 : index
    %185 = vector.load %arg13[%c0_90, %c0_91, %c0_92] : memref<2x128x256xf32, #tpu.memory_space<vmem>>, vector<1x128x256xf32>
    %186 = vector.shape_cast %185 : vector<1x128x256xf32> to vector<128x256xf32>
    %cst_93 = arith.constant dense<0.000000e+00> : vector<64x256xf32>
    %187 = tpu.matmul %184, %186, %cst_93 {dimension_numbers = #tpu.dot_dimension_numbers<[1], [0], [0], [1], [0, 0, 1, 1], [], []>} : vector<64x128xf32>, vector<128x256xf32>, vector<64x256xf32> -> vector<64x256xf32>
    %c0_94 = arith.constant 0 : index
    %c0_95 = arith.constant 0 : index
    %c0_96 = arith.constant 0 : index
    %188 = vector.load %arg14[%c0_94, %c0_95, %c0_96] : memref<2x1x256xf32, #tpu.memory_space<vmem>>, vector<1x1x256xf32>
    %189 = vector.shape_cast %188 : vector<1x1x256xf32> to vector<1x256xf32>
    %190 = vector.broadcast %189 : vector<1x256xf32> to vector<64x256xf32>
    %191 = arith.addf %187, %190 : vector<64x256xf32>
    %cst_97 = arith.constant 5.000000e-01 : f32
    %192 = vector.broadcast %cst_97 : f32 to vector<64x256xf32>
    %193 = arith.mulf %192, %191 : vector<64x256xf32>
    %cst_98 = arith.constant 0.707106769 : f32
    %194 = vector.broadcast %cst_98 : f32 to vector<64x256xf32>
    %195 = arith.mulf %191, %194 : vector<64x256xf32>
    %196 = math.erf %195 : vector<64x256xf32>
    %cst_99 = arith.constant 1.000000e+00 : f32
    %197 = vector.broadcast %cst_99 : f32 to vector<64x256xf32>
    %198 = arith.addf %197, %196 : vector<64x256xf32>
    %199 = arith.mulf %193, %198 : vector<64x256xf32>
    %c0_100 = arith.constant 0 : index
    %c0_101 = arith.constant 0 : index
    %c0_102 = arith.constant 0 : index
    %200 = vector.load %arg15[%c0_100, %c0_101, %c0_102] : memref<2x256x128xf32, #tpu.memory_space<vmem>>, vector<1x256x128xf32>
    %201 = vector.shape_cast %200 : vector<1x256x128xf32> to vector<256x128xf32>
    %cst_103 = arith.constant dense<0.000000e+00> : vector<64x128xf32>
    %202 = tpu.matmul %199, %201, %cst_103 {dimension_numbers = #tpu.dot_dimension_numbers<[1], [0], [0], [1], [0, 0, 1, 1], [], []>} : vector<64x256xf32>, vector<256x128xf32>, vector<64x128xf32> -> vector<64x128xf32>
    %c0_104 = arith.constant 0 : index
    %c0_105 = arith.constant 0 : index
    %c0_106 = arith.constant 0 : index
    %203 = vector.load %arg16[%c0_104, %c0_105, %c0_106] : memref<2x1x128xf32, #tpu.memory_space<vmem>>, vector<1x1x128xf32>
    %204 = vector.shape_cast %203 : vector<1x1x128xf32> to vector<1x128xf32>
    %205 = vector.broadcast %204 : vector<1x128xf32> to vector<64x128xf32>
    %206 = arith.addf %202, %205 : vector<64x128xf32>
    %207 = arith.addf %168, %206 : vector<64x128xf32>
    %cst_107 = arith.constant dense<0.000000e+00> : vector<128xf32>
    %208 = vector.multi_reduction <add>, %207, %cst_107 [0] : vector<64x128xf32> to vector<128xf32>
    %209 = vector.shape_cast %208 : vector<128xf32> to vector<1x128xf32>
    %cst_108 = arith.constant 6.400000e+01 : f32
    %210 = vector.broadcast %cst_108 : f32 to vector<1x128xf32>
    %211 = arith.divf %209, %210 : vector<1x128xf32>
    %212 = vector.broadcast %211 : vector<1x128xf32> to vector<64x128xf32>
    %213 = arith.subf %207, %212 : vector<64x128xf32>
    %214 = arith.mulf %213, %213 : vector<64x128xf32>
    %cst_109 = arith.constant dense<0.000000e+00> : vector<128xf32>
    %215 = vector.multi_reduction <add>, %214, %cst_109 [0] : vector<64x128xf32> to vector<128xf32>
    %216 = vector.shape_cast %215 : vector<128xf32> to vector<1x128xf32>
    %cst_110 = arith.constant 6.400000e+01 : f32
    %217 = vector.broadcast %cst_110 : f32 to vector<1x128xf32>
    %218 = arith.divf %216, %217 : vector<1x128xf32>
    %cst_111 = arith.constant 9.99999974E-6 : f32
    %219 = vector.broadcast %cst_111 : f32 to vector<1x128xf32>
    %220 = arith.addf %218, %219 : vector<1x128xf32>
    %221 = math.rsqrt %220 : vector<1x128xf32>
    %222 = vector.broadcast %221 : vector<1x128xf32> to vector<64x128xf32>
    %223 = arith.mulf %213, %222 : vector<64x128xf32>
    %c1_112 = arith.constant 1 : index
    %c0_113 = arith.constant 0 : index
    %c0_114 = arith.constant 0 : index
    %224 = vector.load %arg5[%c1_112, %c0_113, %c0_114] : memref<2x64x1xf32, #tpu.memory_space<vmem>>, vector<1x64x1xf32>
    %225 = vector.shape_cast %224 : vector<1x64x1xf32> to vector<64x1xf32>
    %226 = vector.broadcast %225 : vector<64x1xf32> to vector<64x128xf32>
    %227 = arith.mulf %223, %226 : vector<64x128xf32>
    %c1_115 = arith.constant 1 : index
    %c0_116 = arith.constant 0 : index
    %c0_117 = arith.constant 0 : index
    %228 = vector.load %arg6[%c1_115, %c0_116, %c0_117] : memref<2x64x1xf32, #tpu.memory_space<vmem>>, vector<1x64x1xf32>
    %229 = vector.shape_cast %228 : vector<1x64x1xf32> to vector<64x1xf32>
    %230 = vector.broadcast %229 : vector<64x1xf32> to vector<64x128xf32>
    %231 = arith.addf %227, %230 : vector<64x128xf32>
    %c1_118 = arith.constant 1 : index
    %c0_119 = arith.constant 0 : index
    %c0_120 = arith.constant 0 : index
    %232 = vector.load %arg7[%c1_118, %c0_119, %c0_120] : memref<2x128x64xf32, #tpu.memory_space<vmem>>, vector<1x128x64xf32>
    %233 = vector.shape_cast %232 : vector<1x128x64xf32> to vector<128x64xf32>
    %cst_121 = arith.constant dense<0.000000e+00> : vector<128x128xf32>
    %234 = tpu.matmul %233, %231, %cst_121 {dimension_numbers = #tpu.dot_dimension_numbers<[1], [0], [0], [1], [0, 0, 1, 1], [], []>} : vector<128x64xf32>, vector<64x128xf32>, vector<128x128xf32> -> vector<128x128xf32>
    %c1_122 = arith.constant 1 : index
    %c0_123 = arith.constant 0 : index
    %c0_124 = arith.constant 0 : index
    %235 = vector.load %arg8[%c1_122, %c0_123, %c0_124] : memref<2x128x1xf32, #tpu.memory_space<vmem>>, vector<1x128x1xf32>
    %236 = vector.shape_cast %235 : vector<1x128x1xf32> to vector<128x1xf32>
    %237 = vector.broadcast %236 : vector<128x1xf32> to vector<128x128xf32>
    %238 = arith.addf %234, %237 : vector<128x128xf32>
    %cst_125 = arith.constant 5.000000e-01 : f32
    %239 = vector.broadcast %cst_125 : f32 to vector<128x128xf32>
    %240 = arith.mulf %239, %238 : vector<128x128xf32>
    %cst_126 = arith.constant 0.707106769 : f32
    %241 = vector.broadcast %cst_126 : f32 to vector<128x128xf32>
    %242 = arith.mulf %238, %241 : vector<128x128xf32>
    %243 = math.erf %242 : vector<128x128xf32>
    %cst_127 = arith.constant 1.000000e+00 : f32
    %244 = vector.broadcast %cst_127 : f32 to vector<128x128xf32>
    %245 = arith.addf %244, %243 : vector<128x128xf32>
    %246 = arith.mulf %240, %245 : vector<128x128xf32>
    %c1_128 = arith.constant 1 : index
    %c0_129 = arith.constant 0 : index
    %c0_130 = arith.constant 0 : index
    %247 = vector.load %arg9[%c1_128, %c0_129, %c0_130] : memref<2x64x128xf32, #tpu.memory_space<vmem>>, vector<1x64x128xf32>
    %248 = vector.shape_cast %247 : vector<1x64x128xf32> to vector<64x128xf32>
    %cst_131 = arith.constant dense<0.000000e+00> : vector<64x128xf32>
    %249 = tpu.matmul %248, %246, %cst_131 {dimension_numbers = #tpu.dot_dimension_numbers<[1], [0], [0], [1], [0, 0, 1, 1], [], []>} : vector<64x128xf32>, vector<128x128xf32>, vector<64x128xf32> -> vector<64x128xf32>
    %c1_132 = arith.constant 1 : index
    %c0_133 = arith.constant 0 : index
    %c0_134 = arith.constant 0 : index
    %250 = vector.load %arg10[%c1_132, %c0_133, %c0_134] : memref<2x64x1xf32, #tpu.memory_space<vmem>>, vector<1x64x1xf32>
    %251 = vector.shape_cast %250 : vector<1x64x1xf32> to vector<64x1xf32>
    %252 = vector.broadcast %251 : vector<64x1xf32> to vector<64x128xf32>
    %253 = arith.addf %249, %252 : vector<64x128xf32>
    %254 = arith.addf %207, %253 : vector<64x128xf32>
    %cst_135 = arith.constant dense<0.000000e+00> : vector<64x128xf32>
    %255 = tpu.matmul %254, %121, %cst_135 {dimension_numbers = #tpu.dot_dimension_numbers<[1], [0], [0], [1], [0, 0, 1, 1], [], []>} : vector<64x128xf32>, vector<128x128xf32>, vector<64x128xf32> -> vector<64x128xf32>
    %256 = arith.subf %254, %255 : vector<64x128xf32>
    %257 = arith.mulf %256, %256 : vector<64x128xf32>
    %cst_136 = arith.constant dense<0.000000e+00> : vector<64x128xf32>
    %258 = tpu.matmul %257, %121, %cst_136 {dimension_numbers = #tpu.dot_dimension_numbers<[1], [0], [0], [1], [0, 0, 1, 1], [], []>} : vector<64x128xf32>, vector<128x128xf32>, vector<64x128xf32> -> vector<64x128xf32>
    %cst_137 = arith.constant 9.99999974E-6 : f32
    %259 = vector.broadcast %cst_137 : f32 to vector<64x128xf32>
    %260 = arith.addf %258, %259 : vector<64x128xf32>
    %261 = math.rsqrt %260 : vector<64x128xf32>
    %262 = arith.mulf %256, %261 : vector<64x128xf32>
    %c1_138 = arith.constant 1 : index
    %c0_139 = arith.constant 0 : index
    %c0_140 = arith.constant 0 : index
    %263 = vector.load %arg11[%c1_138, %c0_139, %c0_140] : memref<2x1x128xf32, #tpu.memory_space<vmem>>, vector<1x1x128xf32>
    %264 = vector.shape_cast %263 : vector<1x1x128xf32> to vector<1x128xf32>
    %265 = vector.broadcast %264 : vector<1x128xf32> to vector<64x128xf32>
    %266 = arith.mulf %262, %265 : vector<64x128xf32>
    %c1_141 = arith.constant 1 : index
    %c0_142 = arith.constant 0 : index
    %c0_143 = arith.constant 0 : index
    %267 = vector.load %arg12[%c1_141, %c0_142, %c0_143] : memref<2x1x128xf32, #tpu.memory_space<vmem>>, vector<1x1x128xf32>
    %268 = vector.shape_cast %267 : vector<1x1x128xf32> to vector<1x128xf32>
    %269 = vector.broadcast %268 : vector<1x128xf32> to vector<64x128xf32>
    %270 = arith.addf %266, %269 : vector<64x128xf32>
    %c1_144 = arith.constant 1 : index
    %c0_145 = arith.constant 0 : index
    %c0_146 = arith.constant 0 : index
    %271 = vector.load %arg13[%c1_144, %c0_145, %c0_146] : memref<2x128x256xf32, #tpu.memory_space<vmem>>, vector<1x128x256xf32>
    %272 = vector.shape_cast %271 : vector<1x128x256xf32> to vector<128x256xf32>
    %cst_147 = arith.constant dense<0.000000e+00> : vector<64x256xf32>
    %273 = tpu.matmul %270, %272, %cst_147 {dimension_numbers = #tpu.dot_dimension_numbers<[1], [0], [0], [1], [0, 0, 1, 1], [], []>} : vector<64x128xf32>, vector<128x256xf32>, vector<64x256xf32> -> vector<64x256xf32>
    %c1_148 = arith.constant 1 : index
    %c0_149 = arith.constant 0 : index
    %c0_150 = arith.constant 0 : index
    %274 = vector.load %arg14[%c1_148, %c0_149, %c0_150] : memref<2x1x256xf32, #tpu.memory_space<vmem>>, vector<1x1x256xf32>
    %275 = vector.shape_cast %274 : vector<1x1x256xf32> to vector<1x256xf32>
    %276 = vector.broadcast %275 : vector<1x256xf32> to vector<64x256xf32>
    %277 = arith.addf %273, %276 : vector<64x256xf32>
    %cst_151 = arith.constant 5.000000e-01 : f32
    %278 = vector.broadcast %cst_151 : f32 to vector<64x256xf32>
    %279 = arith.mulf %278, %277 : vector<64x256xf32>
    %cst_152 = arith.constant 0.707106769 : f32
    %280 = vector.broadcast %cst_152 : f32 to vector<64x256xf32>
    %281 = arith.mulf %277, %280 : vector<64x256xf32>
    %282 = math.erf %281 : vector<64x256xf32>
    %cst_153 = arith.constant 1.000000e+00 : f32
    %283 = vector.broadcast %cst_153 : f32 to vector<64x256xf32>
    %284 = arith.addf %283, %282 : vector<64x256xf32>
    %285 = arith.mulf %279, %284 : vector<64x256xf32>
    %c1_154 = arith.constant 1 : index
    %c0_155 = arith.constant 0 : index
    %c0_156 = arith.constant 0 : index
    %286 = vector.load %arg15[%c1_154, %c0_155, %c0_156] : memref<2x256x128xf32, #tpu.memory_space<vmem>>, vector<1x256x128xf32>
    %287 = vector.shape_cast %286 : vector<1x256x128xf32> to vector<256x128xf32>
    %cst_157 = arith.constant dense<0.000000e+00> : vector<64x128xf32>
    %288 = tpu.matmul %285, %287, %cst_157 {dimension_numbers = #tpu.dot_dimension_numbers<[1], [0], [0], [1], [0, 0, 1, 1], [], []>} : vector<64x256xf32>, vector<256x128xf32>, vector<64x128xf32> -> vector<64x128xf32>
    %c1_158 = arith.constant 1 : index
    %c0_159 = arith.constant 0 : index
    %c0_160 = arith.constant 0 : index
    %289 = vector.load %arg16[%c1_158, %c0_159, %c0_160] : memref<2x1x128xf32, #tpu.memory_space<vmem>>, vector<1x1x128xf32>
    %290 = vector.shape_cast %289 : vector<1x1x128xf32> to vector<1x128xf32>
    %291 = vector.broadcast %290 : vector<1x128xf32> to vector<64x128xf32>
    %292 = arith.addf %288, %291 : vector<64x128xf32>
    %293 = arith.addf %254, %292 : vector<64x128xf32>
    %cst_161 = arith.constant dense<0.000000e+00> : vector<64x128xf32>
    %294 = tpu.matmul %293, %121, %cst_161 {dimension_numbers = #tpu.dot_dimension_numbers<[1], [0], [0], [1], [0, 0, 1, 1], [], []>} : vector<64x128xf32>, vector<128x128xf32>, vector<64x128xf32> -> vector<64x128xf32>
    %295 = arith.subf %293, %294 : vector<64x128xf32>
    %296 = arith.mulf %295, %295 : vector<64x128xf32>
    %cst_162 = arith.constant dense<0.000000e+00> : vector<64x128xf32>
    %297 = tpu.matmul %296, %121, %cst_162 {dimension_numbers = #tpu.dot_dimension_numbers<[1], [0], [0], [1], [0, 0, 1, 1], [], []>} : vector<64x128xf32>, vector<128x128xf32>, vector<64x128xf32> -> vector<64x128xf32>
    %cst_163 = arith.constant 9.99999974E-6 : f32
    %298 = vector.broadcast %cst_163 : f32 to vector<64x128xf32>
    %299 = arith.addf %297, %298 : vector<64x128xf32>
    %300 = math.rsqrt %299 : vector<64x128xf32>
    %301 = arith.mulf %295, %300 : vector<64x128xf32>
    %c0_164 = arith.constant 0 : index
    %c0_165 = arith.constant 0 : index
    %302 = vector.load %arg17[%c0_164, %c0_165] : memref<1x128xf32, #tpu.memory_space<vmem>>, vector<1x128xf32>
    %303 = vector.broadcast %302 : vector<1x128xf32> to vector<64x128xf32>
    %304 = arith.mulf %301, %303 : vector<64x128xf32>
    %c0_166 = arith.constant 0 : index
    %c0_167 = arith.constant 0 : index
    %305 = vector.load %arg18[%c0_166, %c0_167] : memref<1x128xf32, #tpu.memory_space<vmem>>, vector<1x128xf32>
    %306 = vector.broadcast %305 : vector<1x128xf32> to vector<64x128xf32>
    %307 = arith.addf %304, %306 : vector<64x128xf32>
    %308 = tpu.transpose %307, [1, 0] : vector<64x128xf32> -> vector<128x64xf32>
    %309 = vector.extract_strided_slice %308 {offsets = [0, 0], sizes = [32, 64], strides = [1, 1]} : vector<128x64xf32> to vector<32x64xf32>
    %c0_168 = arith.constant 0 : index
    %c0_169 = arith.constant 0 : index
    %c0_170 = arith.constant 0 : index
    %310 = vector.load %arg19[%c0_168, %c0_169, %c0_170] : memref<4x32x64xf32, #tpu.memory_space<vmem>>, vector<1x32x64xf32>
    %311 = vector.shape_cast %310 : vector<1x32x64xf32> to vector<32x64xf32>
    %312 = vector.shape_cast %309 : vector<32x64xf32> to vector<1x32x64xf32>
    tpu.vector_store %arg19[%c0_168, %c0_169, %c0_170], %312 {strides = array<i32>} : memref<4x32x64xf32, #tpu.memory_space<vmem>>, vector<1x32x64xf32>,
    %313 = vector.extract_strided_slice %308 {offsets = [32, 0], sizes = [32, 64], strides = [1, 1]} : vector<128x64xf32> to vector<32x64xf32>
    %c1_171 = arith.constant 1 : index
    %c0_172 = arith.constant 0 : index
    %c0_173 = arith.constant 0 : index
    %314 = vector.load %arg19[%c1_171, %c0_172, %c0_173] : memref<4x32x64xf32, #tpu.memory_space<vmem>>, vector<1x32x64xf32>
    %315 = vector.shape_cast %314 : vector<1x32x64xf32> to vector<32x64xf32>
    %316 = vector.shape_cast %313 : vector<32x64xf32> to vector<1x32x64xf32>
    tpu.vector_store %arg19[%c1_171, %c0_172, %c0_173], %316 {strides = array<i32>} : memref<4x32x64xf32, #tpu.memory_space<vmem>>, vector<1x32x64xf32>,
    %317 = vector.extract_strided_slice %308 {offsets = [64, 0], sizes = [32, 64], strides = [1, 1]} : vector<128x64xf32> to vector<32x64xf32>
    %c2_174 = arith.constant 2 : index
    %c0_175 = arith.constant 0 : index
    %c0_176 = arith.constant 0 : index
    %318 = vector.load %arg19[%c2_174, %c0_175, %c0_176] : memref<4x32x64xf32, #tpu.memory_space<vmem>>, vector<1x32x64xf32>
    %319 = vector.shape_cast %318 : vector<1x32x64xf32> to vector<32x64xf32>
    %320 = vector.shape_cast %317 : vector<32x64xf32> to vector<1x32x64xf32>
    tpu.vector_store %arg19[%c2_174, %c0_175, %c0_176], %320 {strides = array<i32>} : memref<4x32x64xf32, #tpu.memory_space<vmem>>, vector<1x32x64xf32>,
    %321 = vector.extract_strided_slice %308 {offsets = [96, 0], sizes = [32, 64], strides = [1, 1]} : vector<128x64xf32> to vector<32x64xf32>
    %c3_177 = arith.constant 3 : index
    %c0_178 = arith.constant 0 : index
    %c0_179 = arith.constant 0 : index
    %322 = vector.load %arg19[%c3_177, %c0_178, %c0_179] : memref<4x32x64xf32, #tpu.memory_space<vmem>>, vector<1x32x64xf32>
    %323 = vector.shape_cast %322 : vector<1x32x64xf32> to vector<32x64xf32>
    %324 = vector.shape_cast %321 : vector<32x64xf32> to vector<1x32x64xf32>
    tpu.vector_store %arg19[%c3_177, %c0_178, %c0_179], %324 {strides = array<i32>} : memref<4x32x64xf32, #tpu.memory_space<vmem>>, vector<1x32x64xf32>,
    return
  }
  func.func @transform_0(%arg0: i32) -> (i32, i32, i32) {
    %c0_i32 = arith.constant 0 : i32
    %c0_i32_0 = arith.constant 0 : i32
    %c0_i32_1 = arith.constant 0 : i32
    return %arg0, %c0_i32, %c0_i32_0 : i32, i32, i32
  }
  func.func @transform_1(%arg0: i32) -> (i32, i32) {
    %c0_i32 = arith.constant 0 : i32
    %c0_i32_0 = arith.constant 0 : i32
    %c0_i32_1 = arith.constant 0 : i32
    return %c0_i32, %c0_i32_0 : i32, i32
  }
  func.func @transform_2(%arg0: i32) -> (i32, i32) {
    %c0_i32 = arith.constant 0 : i32
    %c0_i32_0 = arith.constant 0 : i32
    %c0_i32_1 = arith.constant 0 : i32
    return %c0_i32, %c0_i32_0 : i32, i32
  }
  func.func @transform_3(%arg0: i32) -> (i32, i32) {
    %c0_i32 = arith.constant 0 : i32
    %c0_i32_0 = arith.constant 0 : i32
    %c0_i32_1 = arith.constant 0 : i32
    return %c0_i32, %c0_i32_0 : i32, i32
  }
  func.func @transform_4(%arg0: i32) -> (i32, i32, i32) {
    %c0_i32 = arith.constant 0 : i32
    %c0_i32_0 = arith.constant 0 : i32
    %c0_i32_1 = arith.constant 0 : i32
    %c0_i32_2 = arith.constant 0 : i32
    return %c0_i32, %c0_i32_0, %c0_i32_1 : i32, i32, i32
  }
  func.func @transform_5(%arg0: i32) -> (i32, i32, i32) {
    %c0_i32 = arith.constant 0 : i32
    %c0_i32_0 = arith.constant 0 : i32
    %c0_i32_1 = arith.constant 0 : i32
    %c0_i32_2 = arith.constant 0 : i32
    return %c0_i32, %c0_i32_0, %c0_i32_1 : i32, i32, i32
  }
  func.func @transform_6(%arg0: i32) -> (i32, i32, i32) {
    %c0_i32 = arith.constant 0 : i32
    %c0_i32_0 = arith.constant 0 : i32
    %c0_i32_1 = arith.constant 0 : i32
    %c0_i32_2 = arith.constant 0 : i32
    return %c0_i32, %c0_i32_0, %c0_i32_1 : i32, i32, i32
  }
  func.func @transform_7(%arg0: i32) -> (i32, i32, i32) {
    %c0_i32 = arith.constant 0 : i32
    %c0_i32_0 = arith.constant 0 : i32
    %c0_i32_1 = arith.constant 0 : i32
    %c0_i32_2 = arith.constant 0 : i32
    return %c0_i32, %c0_i32_0, %c0_i32_1 : i32, i32, i32
  }
  func.func @transform_8(%arg0: i32) -> (i32, i32, i32) {
    %c0_i32 = arith.constant 0 : i32
    %c0_i32_0 = arith.constant 0 : i32
    %c0_i32_1 = arith.constant 0 : i32
    %c0_i32_2 = arith.constant 0 : i32
    return %c0_i32, %c0_i32_0, %c0_i32_1 : i32, i32, i32
  }
  func.func @transform_9(%arg0: i32) -> (i32, i32, i32) {
    %c0_i32 = arith.constant 0 : i32
    %c0_i32_0 = arith.constant 0 : i32
    %c0_i32_1 = arith.constant 0 : i32
    %c0_i32_2 = arith.constant 0 : i32
    return %c0_i32, %c0_i32_0, %c0_i32_1 : i32, i32, i32
  }
  func.func @transform_10(%arg0: i32) -> (i32, i32, i32) {
    %c0_i32 = arith.constant 0 : i32
    %c0_i32_0 = arith.constant 0 : i32
    %c0_i32_1 = arith.constant 0 : i32
    %c0_i32_2 = arith.constant 0 : i32
    return %c0_i32, %c0_i32_0, %c0_i32_1 : i32, i32, i32
  }
  func.func @transform_11(%arg0: i32) -> (i32, i32, i32) {
    %c0_i32 = arith.constant 0 : i32
    %c0_i32_0 = arith.constant 0 : i32
    %c0_i32_1 = arith.constant 0 : i32
    %c0_i32_2 = arith.constant 0 : i32
    return %c0_i32, %c0_i32_0, %c0_i32_1 : i32, i32, i32
  }
  func.func @transform_12(%arg0: i32) -> (i32, i32, i32) {
    %c0_i32 = arith.constant 0 : i32
    %c0_i32_0 = arith.constant 0 : i32
    %c0_i32_1 = arith.constant 0 : i32
    %c0_i32_2 = arith.constant 0 : i32
    return %c0_i32, %c0_i32_0, %c0_i32_1 : i32, i32, i32
  }
  func.func @transform_13(%arg0: i32) -> (i32, i32, i32) {
    %c0_i32 = arith.constant 0 : i32
    %c0_i32_0 = arith.constant 0 : i32
    %c0_i32_1 = arith.constant 0 : i32
    %c0_i32_2 = arith.constant 0 : i32
    return %c0_i32, %c0_i32_0, %c0_i32_1 : i32, i32, i32
  }
  func.func @transform_14(%arg0: i32) -> (i32, i32, i32) {
    %c0_i32 = arith.constant 0 : i32
    %c0_i32_0 = arith.constant 0 : i32
    %c0_i32_1 = arith.constant 0 : i32
    %c0_i32_2 = arith.constant 0 : i32
    return %c0_i32, %c0_i32_0, %c0_i32_1 : i32, i32, i32
  }
  func.func @transform_15(%arg0: i32) -> (i32, i32, i32) {
    %c0_i32 = arith.constant 0 : i32
    %c0_i32_0 = arith.constant 0 : i32
    %c0_i32_1 = arith.constant 0 : i32
    %c0_i32_2 = arith.constant 0 : i32
    return %c0_i32, %c0_i32_0, %c0_i32_1 : i32, i32, i32
  }
  func.func @transform_16(%arg0: i32) -> (i32, i32) {
    %c0_i32 = arith.constant 0 : i32
    %c0_i32_0 = arith.constant 0 : i32
    %c0_i32_1 = arith.constant 0 : i32
    return %c0_i32, %c0_i32_0 : i32, i32
  }
  func.func @transform_17(%arg0: i32) -> (i32, i32) {
    %c0_i32 = arith.constant 0 : i32
    %c0_i32_0 = arith.constant 0 : i32
    %c0_i32_1 = arith.constant 0 : i32
    return %c0_i32, %c0_i32_0 : i32, i32
  }
  func.func @transform_18(%arg0: i32) -> (i32, i32, i32) {
    %c0_i32 = arith.constant 0 : i32
    %c0_i32_0 = arith.constant 0 : i32
    %c0_i32_1 = arith.constant 0 : i32
    return %arg0, %c0_i32, %c0_i32_0 : i32, i32, i32
  }
}

</mosaic_0001>

<bundles_post_ra>
// kernel: tpu_custom_call.1
= control target key start
LH: loop header
LB: loop body
LE: loop exit
PB: predicated region body
PF: predicated region fallthrough
CT: control target
= control target key end

     0   :  { %s9038_s0 = inlined_call_operand.vmem [shape: f32[8,64,4], index: 0, kind: input, shape index: {}]   ;;  %s9039_s1 = inlined_call_operand.vmem [shape: f32[4,32], index: 1, kind: input, shape index: {}]   ;;  %s9040_s2 = inlined_call_operand.vmem [shape: f32[1,32], index: 2, kind: input, shape index: {}]   ;;  %s9041_s3 = inlined_call_operand.vmem [shape: f32[128,128], index: 3, kind: input, shape index: {}]   ;;  %s9042_s4 = inlined_call_operand.vmem [shape: f32[2,64,1], index: 4, kind: input, shape index: {}]   ;;  %s9043_s5 = inlined_call_operand.vmem [shape: f32[2,64,1], index: 5, kind: input, shape index: {}]   ;;  %s9044_s6 = inlined_call_operand.vmem [shape: f32[2,128,64], index: 6, kind: input, shape index: {}]   ;;  %s9045_s7 = inlined_call_operand.vmem [shape: f32[2,128,1], index: 7, kind: input, shape index: {}]   ;;  %s9046_s8 = inlined_call_operand.vmem [shape: f32[2,64,128], index: 8, kind: input, shape index: {}]   ;;  %s9047_s9 = inlined_call_operand.vmem [shape: f32[2,64,1], index: 9, kind: input, shape index: {}]   ;;  %s9048_s10 = inlined_call_operand.vmem [shape: f32[2,1,128], index: 10, kind: input, shape index: {}]   ;;  %s9049_s11 = inlined_call_operand.vmem [shape: f32[2,1,128], index: 11, kind: input, shape index: {}]   ;;  %s9050_s12 = inlined_call_operand.vmem [shape: f32[2,128,256], index: 12, kind: input, shape index: {}]   ;;  %s9051_s13 = inlined_call_operand.vmem [shape: f32[2,1,256], index: 13, kind: input, shape index: {}]   ;;  %s9052_s14 = inlined_call_operand.vmem [shape: f32[2,256,128], index: 14, kind: input, shape index: {}]   ;;  %s9053_s15 = inlined_call_operand.vmem [shape: f32[2,1,128], index: 15, kind: input, shape index: {}]   ;;  %s9054_s16 = inlined_call_operand.vmem [shape: f32[1,128], index: 16, kind: input, shape index: {}]   ;;  %s9055_s17 = inlined_call_operand.vmem [shape: f32[1,128], index: 17, kind: input, shape index: {}]   ;;  %s9056_s18 = inlined_call_operand.hbm [shape: f32[8,32,64], index: 18, kind: output, shape index: {}]  }
   0x1   :  { %9073 = sst [smem:[#allocation31_spill]] %s9038_s0 }
   0x2   :  { %9074 = sst [smem:[#allocation32_spill]] %s9039_s1 }
   0x3   :  { %9075 = sst [smem:[#allocation33_spill]] %s9040_s2 }
   0x4   :  { %9076 = sst [smem:[#allocation34_spill]] %s9041_s3 }
   0x5   :  { %9077 = sst [smem:[#allocation35_spill]] %s9042_s4 }
   0x6   :  { %23 = vsyncpa [#allocation3], 0 }
   0x7   :  { %25 = vsyncpa [#allocation3 + $0x1], 0  ;;  %s6284_s27 = smov 0   ;;  %s6286_s28 = smov 0  }
   0x8   :  { %s6288_s29 = smov 0   ;;  %s6290_s30 = smov 0  }
   0x9 LB: > { %9078 = sst [smem:[#allocation5_spill]] %s6164_s27  ;;  %s6305_s0 = sadd.s32 4294967295, %s6176_s30   ;;  %s6176_s30 = sphi %s6290_s30, %s9139_s30   ;;  %s6172_s29 = sphi %s6288_s29, %s9141_s29   ;;  %s6168_s28 = sphi %s6286_s28, %s9143_s28   ;;  %s6164_s27 = sphi %s6284_s27, %s9142_s27  }
   0xa   : > { %9079 = sst [smem:[#allocation6_spill]] %s6172_s29  ;;  %s4757_s19 = sadd.s32 4294967294, %s6176_s30  }
   0xb   : > { %s6309_s1 = sadd.s32 1, %s6176_s30   ;;  %s421_s20 = sadd.s32 1, %s6172_s29 }
   0xc   : > { %9080 = sst [smem:[#allocation7_spill]] %s6309_s1  ;;  %s418_s21 = ssub.s32 %s6176_s30, %s6309_s1 }
   0xd   : > { %p431_p0 = scmp.ne.s32.totalorder %s6172_s29, %s6168_s28  ;;  %p419_p1 = scmp.eq.s32.totalorder %s418_s21, 0 }
   0xe   : > { %p432_p2 = scmp.eq.s32.totalorder %s6305_s0, 1  ;;  %p437_p3 = scmp.ne.s32.totalorder %s6168_s28, %s6164_s27 }
   0xf   : > { %p438_p4 = scmp.eq.s32.totalorder %s4757_s19, 1  ;;  %p4760_p7 = scmp.ge.s32.totalorder %s6176_s30, 1 }
  0x10   : > { %s6320_s22 = scalar_select %p419_p1, %s6172_s29, %s421_s20  }
  0x11   : > { %p6322_p5 = por %p432_p2, %p431_p0  ;;  %p6326_p6 = por %p438_p4, %p437_p3 }
  0x12   : > { %9081 = sst [smem:[#allocation8_spill]] %s6320_s22  ;;  %p517_p8 = scmp.lt.s32.totalorder %s6176_s30, 3 }
  0x13   : > { %s9083_s23 = scalar_select %p6326_p6, 1, 0 }
  0x14   : > { %p518_p9 = pnand %p4760_p7, %p517_p8 }
  0x15   : > { %9084 = sst [smem:[#allocation9_spill]] %s9083_s23 }
  0x16   : > { %521 = sbr.rel (%p518_p9) target bundleno = 4042 (0xfca), region = 92 }
  0x1b   : > { %s4762_s24 = sshll.u32 %s6305_s0, 2  ;;  %v9061_v0 = vmov 0   ;;  %s9085_s20 = sld [smem:[#allocation31_spill]]  ;;  %v9065_v6 = vmov 1   ;;  %v9059_v14 = vmov 2   ;;  %v9063_v21 = vmov 3  }
  0x1c   : > { %5821 = vset.pattern.permute.xlu1 %v9061_v0  ;;  %5820 = vset.pattern.permute.xlu0 %v9061_v0  ;;  %p573_p10 = scmp.lt.s32.totalorder %s4762_s24, 7  ;;  %s9101_s26 = sld [smem:[#allocation32_spill]]  ;;  %vm1548_vm0 = vcmask 523264   ;;  %vm1539_vm1 = vcmask 261120   ;;  %vm1557_vm2 = vcmask 785408  }
  0x1d   : > { %s9105_s22 = sld [smem:[#allocation33_spill]]  ;;  %s6184_s19 = smov 96  }
  0x1e   : > { %s9145_s24 = smov (!%p573_p10, %s4762_s24), 7  ;;  %s9125_s4 = sld [smem:[#allocation35_spill]] }
  0x1f   : > { %s4984_s25 = sshll.u32 %s9145_s24, 6  ;;  %s6182_s24 = smov 32  }
  0x20   : > { %s9136_s3 = sld [smem:[#allocation34_spill]]  ;;  %s4986_s29 = sshll.u32 %s6305_s0, 11 }
  0x21   : > { %s6338_s21 = scalar_lea.vmem %s9085_s20, %s4984_s25  ;;  %s9068_s25 = smov 64  }
  0x22   : > { %v6341_v1 = vld [vmem:[%s6338_s21 + $0x80] sm:$0xff]  ;;  %v6349_v3 = vld [vmem:[%s6338_s21 + $0x88] sm:$0xff]  ;;  %v6357_v5 = vld [vmem:[%s6338_s21 + $0x50] sm:$0xff]  ;;  %s8990_s1 = scalar_lea.hbm %s9056_s18, %s4986_s29 }
  0x23   : > { %v6344_v2 = vld [vmem:[%s6338_s21 + $0x40] sm:$0xff]  ;;  %1036 = vperm.xlu1 %5821, %v6341_v1   ;;  %v6352_v4 = vld [vmem:[%s6338_s21 + $0x48] sm:$0xff]  ;;  %v6363_v7 = vld [vmem:[%s6338_s21 + $0x90] sm:$0xff] }
  0x24   : > { %827 = vperm.xlu0 %5820, %v6344_v2   ;;  %v6366_v8 = vld [vmem:[%s6338_s21 + $0xc0] sm:$0xff]  ;;  %v6371_v9 = vld [vmem:[%s6338_s21 + $0x58] sm:$0xff]  ;;  %v6375_v10 = vld [vmem:[%s6338_s21 + $0xc8] sm:$0xff] }
  0x25   : > { %v6379_v11 = vld [vmem:[%s6338_s21 + $0xe8] sm:$0xff]  ;;  %v6384_v12 = vld [vmem:[%s6338_s21 + $0xf0] sm:$0xff]  ;;  %v6390_v13 = vld [vmem:[%s6338_s21 + $0xf8] sm:$0xff] }
  0x26   : > { %v6401_v15 = vld [vmem:[%s6338_s21 + $0xd0] sm:$0xff]  ;;  %v6410_v16 = vld [vmem:[%s6338_s21 + $0x98] sm:$0xff]  ;;  %v6417_v17 = vld [vmem:[%s6338_s21 + $0xa0] sm:$0xff] }
  0x27   : > { %1041 = vperm.xlu1 %5821, %v6349_v3   ;;  %v6423_v18 = vld [vmem:[%s6338_s21 + $0x60] sm:$0xff]  ;;  %v6426_v19 = vld [vmem:[%s6338_s21 + $0xa8] sm:$0xff]  ;;  %v6432_v20 = vld [vmem:[%s6338_s21 + $0x70] sm:$0xff] }
  0x28   : > { %832 = vperm.xlu0 %5820, %v6352_v4   ;;  %v6440_v22 = vld [vmem:[%s6338_s21] sm:$0xff]  ;;  %v6445_v23 = vld [vmem:[%s6338_s21 + $0xd8] sm:$0xff]  ;;  %v6468_v25 = vld [vmem:[%s6338_s21 + $0x68] sm:$0xff] }
  0x29   : > { %v6448_v24 = vld [vmem:[%s6338_s21 + $0x18] sm:$0xff]  ;;  %v6477_v26 = vld [vmem:[%s6338_s21 + $0x8] sm:$0xff]  ;;  %v6490_v28 = vld [vmem:[%s6338_s21 + $0xe0] sm:$0xff] }
  0x2a   : > { %v6485_v27 = vld [vmem:[%s6338_s21 + $0x28] sm:$0xff]  ;;  %v6548_v45 = vld [vmem:[%s6338_s21 + $0xb0] sm:$0xff]  ;;  %v6573_v52 = vld [vmem:[%s6338_s21 + $0x20] sm:$0xff] }
  0x2b   : > { %5822 = vset.pattern.permute.xlu1 %v9065_v6  ;;  %v6604_v62 = vld [vmem:[%s6338_s21 + $0x78] sm:$0xff] }
  0x2c   : > { %837 = vperm.xlu0 %5820, %v6357_v5   ;;  %882 = vperm.xlu1 %5822, %v6344_v2  }
  0x30   : > { %1046 = vperm.xlu0 %5820, %v6363_v7   ;;  %5823 = vset.pattern.permute.xlu1 %v9061_v0 }
  0x31   : > { %1245 = vperm.xlu1 %5823, %v6366_v8  }
  0x34   : > { %842 = vperm.xlu0 %5820, %v6371_v9  }
  0x35   : > { %1250 = vperm.xlu1 %5823, %v6375_v10  }
  0x38   : > { %1270 = vperm.xlu0 %5820, %v6379_v11  }
  0x39   : > { %5824 = vset.pattern.permute.xlu1 %v9065_v6 }
  0x3a   : > { %1091 = vperm.xlu1 %5824, %v6341_v1  }
  0x3c   : > { %1275 = vperm.xlu0 %5820, %v6384_v12  }
  0x3e   : > { %1095 = vperm.xlu1 %5824, %v6349_v3  }
  0x40   : > { %1280 = vperm.xlu0 %5820, %v6390_v13  }
  0x42   : > { %890 = vperm.xlu1 %5824, %v6357_v5  }
  0x44   : > { %5866 = vset.pattern.permute.xlu0 %v9059_v14 }
  0x45   : > { %930 = vperm.xlu0 %5866, %v6344_v2  }
  0x46   : > { %5825 = vset.pattern.permute.xlu1 %v9059_v14 }
  0x47   : > { %934 = vperm.xlu1 %5825, %v6352_v4  }
  0x49   : > { %1143 = vperm.xlu0 %5866, %v6349_v3  }
  0x4b   : > { %5826 = vset.pattern.permute.xlu1 %v9061_v0 }
  0x4c   : > { %1255 = vperm.xlu1 %5826, %v6401_v15  }
  0x4d   : > { %938 = vperm.xlu0 %5866, %v6357_v5  }
  0x50   : > { %5827 = vset.pattern.permute.xlu1 %v9065_v6 }
  0x51   : > { %1348 = vperm.xlu0 %5866, %v6366_v8   ;;  %1304 = vperm.xlu1 %5827, %v6375_v10  }
  0x55   : > { %942 = vperm.xlu0 %5866, %v6371_v9   ;;  %5828 = vset.pattern.permute.xlu1 %v9061_v0 }
  0x56   : > { %1051 = vperm.xlu1 %5828, %v6410_v16  }
  0x59   : > { %1151 = vperm.xlu0 %5866, %v6410_v16  }
  0x5a   : > { %5829 = vset.pattern.permute.xlu1 %v9059_v14 }
  0x5b   : > { %1139 = vperm.xlu1 %5829, %v6341_v1  }
  0x5d   : > { %1155 = vperm.xlu0 %5866, %v6417_v17  }
  0x5f   : > { %5830 = vset.pattern.permute.xlu1 %v9061_v0 }
  0x60   : > { %847 = vperm.xlu1 %5830, %v6423_v18  }
  0x61   : > { %1159 = vperm.xlu0 %5866, %v6426_v19  }
  0x64   : > { %5831 = vset.pattern.permute.xlu1 %v9065_v6 }
  0x65   : > { %954 = vperm.xlu0 %5866, %v6432_v20   ;;  %894 = vperm.xlu1 %5831, %v6371_v9  }
  0x69   : > { %1372 = vperm.xlu0 %5866, %v6384_v12   ;;  %5832 = vset.pattern.permute.xlu1 %v9063_v21 }
  0x6a   : > { %978 = vperm.xlu1 %5832, %v6344_v2  }
  0x6d   : > { %712 = vperm.xlu0 %5866, %v6440_v22  }
  0x6e   : > { %5833 = vset.pattern.permute.xlu1 %v9061_v0 }
  0x6f   : > { %1260 = vperm.xlu1 %5833, %v6445_v23  }
  0x71   : > { %724 = vperm.xlu0 %5866, %v6448_v24  }
  0x73   : > { %5834 = vset.pattern.permute.xlu1 %v9065_v6 }
  0x74   : > { %1308 = vperm.xlu1 %5834, %v6401_v15  }
  0x75   : > { %5887 = vset.pattern.permute.xlu0 %v9065_v6 }
  0x76   : > { %886 = vperm.xlu0 %5887, %v6352_v4  }
  0x78   : > { %5835 = vset.pattern.permute.xlu1 %v9059_v14 }
  0x79   : > { %1352 = vperm.xlu1 %5835, %v6375_v10  }
  0x7a   : > { %1300 = vperm.xlu0 %5887, %v6366_v8  }
  0x7d   : > { %5836 = vset.pattern.permute.xlu1 %v9061_v0 }
  0x7e   : > { %1099 = vperm.xlu0 %5887, %v6363_v7   ;;  %1056 = vperm.xlu1 %5836, %v6417_v17  }
  0x82   : > { %1103 = vperm.xlu0 %5887, %v6410_v16   ;;  %5837 = vset.pattern.permute.xlu1 %v9059_v14 }
  0x83   : > { %1147 = vperm.xlu1 %5837, %v6363_v7  }
  0x86   : > { %1312 = vperm.xlu0 %5887, %v6445_v23  }
  0x87   : > { %5838 = vset.pattern.permute.xlu1 %v9063_v21 }
  0x88   : > { %1187 = vperm.xlu1 %5838, %v6341_v1  }
  0x8a   : > { %902 = vperm.xlu0 %5887, %v6468_v25  }
  0x8c   : > { %5839 = vset.pattern.permute.xlu1 %v9061_v0 }
  0x8d   : > { %852 = vperm.xlu1 %5839, %v6468_v25  }
  0x8e   : > { %906 = vperm.xlu0 %5887, %v6432_v20  }
  0x91   : > { %5840 = vset.pattern.permute.xlu1 %v9065_v6 }
  0x92   : > { %663 = vperm.xlu0 %5887, %v6477_v26   ;;  %898 = vperm.xlu1 %5840, %v6423_v18  }
  0x96   : > { %671 = vperm.xlu0 %5887, %v6448_v24   ;;  %5841 = vset.pattern.permute.xlu1 %v9063_v21 }
  0x97   : > { %986 = vperm.xlu1 %5841, %v6357_v5  }
  0x9a   : > { %679 = vperm.xlu0 %5887, %v6485_v27  }
  0x9b   : > { %5842 = vset.pattern.permute.xlu1 %v9061_v0 }
  0x9c   : > { %1265 = vperm.xlu1 %5842, %v6490_v28  }
  0x9e   : > { %5890 = vset.pattern.permute.xlu0 %v9063_v21  ;;  %v6495_v29 = vpop.permute.xlu1 %1036 }
  0x9f   : > { %982 = vperm.xlu0 %5890, %v6352_v4   ;;  %v6498_v30 = vpop.permute.xlu0 %827 }
  0xa0   : > { %5843 = vset.pattern.permute.xlu1 %v9059_v14 }
  0xa1   : > { %1356 = vperm.xlu1 %5843, %v6401_v15  }
  0xa2   : > { %v6502_v31 = vpop.permute.xlu1 %1041 }
  0xa3   : > { %1191 = vperm.xlu0 %5890, %v6349_v3   ;;  %v6505_v32 = vpop.permute.xlu0 %832 }
  0xa5   : > { %5844 = vset.pattern.permute.xlu1 %v9063_v21 }
  0xa6   : > { %1396 = vperm.xlu1 %5844, %v6366_v8  }
  0xa7   : > { %1400 = vperm.xlu0 %5890, %v6375_v10   ;;  %v6510_v33 = vpop.permute.xlu0 %837  ;;  %v6512_v34 = vpop.permute.xlu1 %882 }
  0xaa   : > { %5845 = vset.pattern.permute.xlu1 %v9061_v0 }
  0xab   : > { %1404 = vperm.xlu0 %5890, %v6401_v15   ;;  %v6516_v35 = vpop.permute.xlu0 %1046  ;;  %1061 = vperm.xlu1 %5845, %v6426_v19  }
  0xac   : > { %v6519_v36 = vpop.permute.xlu1 %1245 }
  0xaf   : > { %v6521_v37 = vpop.permute.xlu0 %842  ;;  %1408 = vperm.xlu0 %5890, %v6445_v23   ;;  %5846 = vset.pattern.permute.xlu1 %v9065_v6 }
  0xb0   : > { %1107 = vperm.xlu1 %5846, %v6417_v17   ;;  %v6526_v38 = vpop.permute.xlu1 %1250 }
  0xb3   : > { %v6528_v39 = vpop.permute.xlu0 %1270  ;;  %1412 = vperm.xlu0 %5890, %v6490_v28  }
  0xb4   : > { %5847 = vset.pattern.permute.xlu1 %v9063_v21 }
  0xb5   : > { %1195 = vperm.xlu1 %5847, %v6363_v7   ;;  %v6533_v40 = vpop.permute.xlu1 %1091 }
  0xb7   : > { %v6535_v41 = vpop.permute.xlu0 %1275  ;;  %1207 = vperm.xlu0 %5890, %v6426_v19  }
  0xb8   : > { %9086 = vst [vmem:[#allocation10_spill] sm:$0xff] %v6535_v41 }
  0xb9   : > { %5848 = vset.pattern.permute.xlu1 %v9061_v0  ;;  %v6539_v42 = vpop.permute.xlu1 %1095 }
  0xba   : > { %857 = vperm.xlu1 %5848, %v6432_v20  }
  0xbb   : > { %v6542_v43 = vpop.permute.xlu0 %1280  ;;  %1002 = vperm.xlu0 %5890, %v6432_v20  }
  0xbc   : > { %9087 = vst [vmem:[#allocation11_spill] sm:$0xff] %v6542_v43  ;;  %v9103_v43 = vmov 3  }
  0xbd   : > { %v6545_v44 = vpop.permute.xlu1 %890 }
  0xbe   : > { %5849 = vset.pattern.permute.xlu1 %v9059_v14 }
  0xbf   : > { %1211 = vperm.xlu0 %5890, %v6548_v45   ;;  %946 = vperm.xlu1 %5849, %v6423_v18  }
  0xc0   : > { %v6553_v46 = vpop.permute.xlu0 %930 }
  0xc2   : > { %v6555_v47 = vpop.permute.xlu1 %934 }
  0xc3   : > { %1420 = vperm.xlu0 %5890, %v6384_v12   ;;  %5850 = vset.pattern.permute.xlu1 %v9063_v21 }
  0xc4   : > { %v6559_v48 = vpop.permute.xlu0 %1143  ;;  %990 = vperm.xlu1 %5850, %v6371_v9  }
  0xc7   : > { %1424 = vperm.xlu0 %5890, %v6390_v13   ;;  %v6563_v49 = vpop.permute.xlu1 %1255 }
  0xc8   : > { %9088 = vst [vmem:[#allocation12_spill] sm:$0xff] %v6563_v49  ;;  %v6565_v50 = vpop.permute.xlu0 %938  ;;  %5851 = vset.pattern.permute.xlu1 %v9065_v6 }
  0xc9   : > { %1316 = vperm.xlu1 %5851, %v6490_v28  }
  0xcb   : > { %769 = vperm.xlu0 %5890, %v6477_v26  }
  0xcc   : > { %v6570_v51 = vpop.permute.xlu0 %1348  ;;  %v6575_v53 = vpop.permute.xlu1 %1304 }
  0xcd   : > { %5852 = vset.pattern.permute.xlu1 %v9059_v14 }
  0xce   : > { %1360 = vperm.xlu1 %5852, %v6445_v23  }
  0xcf   : > { %781 = vperm.xlu0 %5890, %v6573_v52  }
  0xd0   : > { %v6580_v54 = vpop.permute.xlu0 %942 }
  0xd1   : > { %v6582_v55 = vpop.permute.xlu1 %1051 }
  0xd2   : > { %5853 = vset.pattern.permute.xlu1 %v9061_v0 }
  0xd3   : > { %785 = vperm.xlu0 %5890, %v6485_v27   ;;  %1066 = vperm.xlu1 %5853, %v6548_v45  }
  0xd4   : > { %v6587_v56 = vpop.permute.xlu0 %1151 }
  0xd6   : > { %v6589_v57 = vpop.permute.xlu1 %1139 }
  0xd7   : > { %5854 = vset.pattern.permute.xlu1 %v9065_v6 }
  0xd8   : > { %v6592_v58 = vpop.permute.xlu0 %1155  ;;  %1111 = vperm.xlu1 %5854, %v6426_v19  }
  0xd9   : > { %9089 = vst [vmem:[#allocation13_spill] sm:$0xff] %v6592_v58  ;;  %v9106_v58 = vmov 1  }
  0xdb   : > { %v6595_v59 = vpop.permute.xlu1 %847 }
  0xdc   : > { %9090 = vst [vmem:[#allocation14_spill] sm:$0xff] %v6595_v59  ;;  %v6597_v60 = vpop.permute.xlu0 %1159  ;;  %5855 = vset.pattern.permute.xlu1 %v9063_v21  ;;  %v6707_v59 = vld [vmem:[%s9101_s26 + $0x3] ss:$0 sm:$0xff] }
  0xdd   : > { %1199 = vperm.xlu1 %5855, %v6410_v16   ;;  %v6635_v16 = vld [vmem:[%s6338_s21 + $0xb8] sm:$0xff] }
  0xe0   : > { %v6601_v61 = vpop.permute.xlu0 %954  ;;  %v6606_v63 = vpop.permute.xlu1 %894 }
  0xe1   : > { %9091 = vst [vmem:[#allocation15_spill] sm:$0xff] %v6601_v61  ;;  %5856 = vset.pattern.permute.xlu1 %v9061_v0 }
  0xe2   : > { %862 = vperm.xlu1 %5856, %v6604_v62  }
  0xe4   : > { %v6610_v1 = vpop.permute.xlu0 %1372 }
  0xe5   : > { %9092 = vst [vmem:[#allocation16_spill] sm:$0xff] %v6610_v1  ;;  %v6612_v2 = vpop.permute.xlu1 %978  ;;  %v6666_v1 = vld [vmem:[%s9101_s26] ss:$0 sm:$0xff] }
  0xe6   : > { %5857 = vset.pattern.permute.xlu1 %v9059_v14 }
  0xe7   : > { %950 = vperm.xlu1 %5857, %v6468_v25  }
  0xe8   : > { %v6616_v3 = vpop.permute.xlu0 %712 }
  0xe9   : > { %9093 = vst [vmem:[#allocation17_spill] sm:$0xff] %v6616_v3 }
  0xea   : > { %v6618_v4 = vpop.permute.xlu1 %1260 }
  0xeb   : > { %5858 = vset.pattern.permute.xlu1 %v9063_v21 }
  0xec   : > { %v6621_v5 = vpop.permute.xlu0 %724  ;;  %994 = vperm.xlu1 %5858, %v6423_v18  }
  0xed   : > { %9094 = vst [vmem:[#allocation18_spill] sm:$0xff] %v6621_v5 }
  0xef   : > { %v6624_v7 = vpop.permute.xlu1 %1308 }
  0xf0   : > { %9095 = vst [vmem:[#allocation19_spill] sm:$0xff] %v6624_v7  ;;  %5859 = vset.pattern.permute.xlu1 %v9065_v6 }
  0xf1   : > { %v887_v8 = vpop.permute.xlu0 %886  ;;  %1320 = vperm.xlu1 %5859, %v6379_v11  }
  0xf4   : > { %v6628_v9 = vpop.permute.xlu1 %1352 }
  0xf5   : > { %v1301_v10 = vpop.permute.xlu0 %1300  ;;  %5860 = vset.pattern.permute.xlu1 %v9059_v14 }
  0xf6   : > { %1364 = vperm.xlu1 %5860, %v6490_v28  }
  0xf9   : > { %v6632_v15 = vpop.permute.xlu0 %1099  ;;  %v6637_v19 = vpop.permute.xlu1 %1056 }
  0xfa   : > { %9096 = vst [vmem:[#allocation20_spill] sm:$0xff] %v6632_v15  ;;  %9097 = vst [vmem:[#allocation21_spill] sm:$0xff] %v6637_v19  ;;  %5861 = vset.pattern.permute.xlu1 %v9061_v0 }
  0xfb   : > { %1071 = vperm.xlu1 %5861, %v6635_v16  }
  0xfd   : > { %v6641_v18 = vpop.permute.xlu0 %1103 }
  0xfe   : > { %v6643_v20 = vpop.permute.xlu1 %1147 }
  0xff   : > { %9098 = vst [vmem:[#allocation22_spill] sm:$0xff] %v6643_v20  ;;  %5862 = vset.pattern.permute.xlu1 %v9065_v6 }
 0x100   : > { %1115 = vperm.xlu1 %5862, %v6548_v45  }
 0x101   : > { %v6647_v23 = vpop.permute.xlu0 %1312 }
 0x103   : > { %v6649_v28 = vpop.permute.xlu1 %1187 }
 0x104   : > { %5863 = vset.pattern.permute.xlu1 %v9063_v21 }
 0x105   : > { %v6652_v14 = vpop.permute.xlu0 %902  ;;  %1203 = vperm.xlu1 %5863, %v6417_v17   ;;  %v866_v17 = vmul.f32 %v6666_v1, %v6505_v32 }
 0x108   : > { %v6655_v0 = vpop.permute.xlu1 %852 }
 0x109   : > { %v6657_v5 = vpop.permute.xlu0 %906  ;;  %5864 = vset.pattern.permute.xlu1 %v9065_v6  ;;  %v6679_v6 = vld [vmem:[%s9105_s22] ss:$0 sm:$0xff] }
 0x10a   : > { %9099 = vst [vmem:[#allocation23_spill] sm:$0xff] %v6657_v5  ;;  %910 = vperm.xlu1 %5864, %v6604_v62   ;;  %v874_v61 = vadd.f32 %v6679_v6, %v866_v17 }
 0x10d   : > { %v6661_v3 = vpop.permute.xlu0 %663  ;;  %v6668_v21 = vpop.permute.xlu1 %898 }
 0x10e   : > { %9100 = vst [vmem:[#allocation24_spill] sm:$0xff] %v6661_v3  ;;  %9102 = vst [vmem:[#allocation25_spill] sm:$0xff] %v6668_v21  ;;  %5865 = vset.pattern.permute.xlu1 %v9103_v43  ;;  %v6684_v3 = vld [vmem:[%s9101_s26 + $0x1] ss:$0 sm:$0xff]  ;;  %v6697_v21 = vld [vmem:[%s9101_s26 + $0x2] ss:$0 sm:$0xff] }
 0x10f   : > { %998 = vperm.xlu1 %5865, %v6468_v25   ;;  %v914_v32 = vmul.f32 %v6684_v3, %v887_v8  ;;  %v962_v17 = vmul.f32 %v6697_v21, %v6555_v47  ;;  %v9109_v8 = vmov 2   ;;  %v1283_v47 = vmul.f32 %v6666_v1, %v6519_v36  ;;  %v6727_v36 = vld [vmem:[%s6338_s21 + $0x30] sm:$0xff] }
 0x111   : > { %v6674_v41 = vpop.permute.xlu0 %671 }
 0x112   : > { %9104 = vst [vmem:[#allocation26_spill] sm:$0xff] %v6674_v41  ;;  %v6688_v5 = vpop.permute.xlu1 %986  ;;  %v922_v41 = vadd.f32 %v914_v32, %v874_v61  ;;  %v1075_v61 = vmul.f32 %v6666_v1, %v6502_v31  ;;  %v1171_v31 = vmul.f32 %v6697_v21, %v6559_v48 }
 0x113   : > { %5867 = vset.pattern.permute.xlu1 %v9106_v58 }
 0x114   : > { %1324 = vperm.xlu1 %5867, %v6384_v12   ;;  %v970_v32 = vadd.f32 %v962_v17, %v922_v41  ;;  %v1083_v15 = vadd.f32 %v6679_v6, %v1075_v61  ;;  %v1331_v41 = vmul.f32 %v6684_v3, %v1301_v10  ;;  %v1379_v61 = vmul.f32 %v6697_v21, %v6570_v51 }
 0x115   : > { %v6692_v25 = vpop.permute.xlu0 %679 }
 0x116   : > { %9107 = vst [vmem:[#allocation27_spill] sm:$0xff] %v6692_v25 }
 0x117   : > { %v6699_v19 = vpop.permute.xlu1 %1265 }
 0x118   : > { %9108 = vst [vmem:[#allocation28_spill] sm:$0xff] %v6699_v19  ;;  %5868 = vset.pattern.permute.xlu1 %v9109_v8  ;;  %v1123_v19 = vmul.f32 %v6684_v3, %v6539_v42  ;;  %v1291_v42 = vadd.f32 %v6679_v6, %v1283_v47 }
 0x119   : > { %1368 = vperm.xlu1 %5868, %v6379_v11  }
 0x11a   : > { %v983_v12 = vpop.permute.xlu0 %982  ;;  %v1339_v48 = vadd.f32 %v1331_v41, %v1291_v42  ;;  %v868_v41 = vmul.f32 %v6666_v1, %v6521_v37  ;;  %v964_v37 = vmul.f32 %v6697_v21, %v6580_v54 }
 0x11b   : > { %v1010_v25 = vmul.f32 %v6707_v59, %v983_v12 }
 0x11c   : > { %v6717_v20 = vpop.permute.xlu1 %1356  ;;  %v1387_v47 = vadd.f32 %v1379_v61, %v1339_v48 }
 0x11d   : > { %v1018_v7 = vadd.f32 %v1010_v25, %v970_v32  ;;  %5869 = vset.pattern.permute.xlu1 %v9106_v58  ;;  %v1131_v25 = vadd.f32 %v1123_v19, %v1083_v15 }
 0x11e   : > { %v1192_v49 = vpop.permute.xlu0 %1191  ;;  %1119 = vperm.xlu1 %5869, %v6635_v16  }
 0x11f   : > { %1453 = vrot.lane.b32.xlu0 %v1018_v7, %s6182_s24  ;;  %v1219_v17 = vmul.f32 %v6707_v59, %v1192_v49  ;;  %v1179_v32 = vadd.f32 %v1171_v31, %v1131_v25  ;;  %v9110_v31 = vmov 0   ;;  %v876_v25 = vadd.f32 %v6679_v6, %v868_v41 }
 0x120   : > { %v1286_v41 = vmul.f32 %v6666_v1, %v6618_v4 }
 0x121   : > { %v1397_v12 = vpop.permute.xlu1 %1396  ;;  %v1227_v7 = vadd.f32 %v1219_v17, %v1179_v32 }
 0x122   : > { %5870 = vset.pattern.permute.xlu1 %v9109_v8  ;;  %v1427_v10 = vmul.f32 %v6707_v59, %v1397_v12 }
 0x123   : > { %789 = vperm.xlu0 %5890, %v6727_v36   ;;  %1163 = vperm.xlu1 %5870, %v6548_v45   ;;  %v6746_v45 = vld [vmem:[%s6338_s21 + $0x38] sm:$0xff] }
 0x124   : > { %v1435_v49 = vadd.f32 %v1427_v10, %v1387_v47  ;;  %v6787_v47 = vpop.permute.xlu0 %1400 }
 0x126   : > { %v6737_v15 = vpop.permute.xlu1 %1061 }
 0x127   : > { %1485 = vrot.lane.b32.xlu0 %v1227_v7, %s9068_s25  ;;  %958 = vperm.xlu1 %5870, %v6604_v62  }
 0x12b   : > { %1515 = vrot.lane.b32.xlu0 %v1435_v49, %s6184_s19  ;;  %5871 = vset.pattern.permute.xlu1 %v9106_v58  ;;  %v6743_v51 = vpop.permute.xlu1 %1107  ;;  %v1125_v49 = vmul.f32 %v6684_v3, %v6641_v18  ;;  %v1294_v18 = vadd.f32 %v6679_v6, %v1286_v41 }
 0x12c   : > { %1328 = vperm.xlu1 %5871, %v6390_v13  }
 0x12f   : > { %793 = vperm.xlu0 %5890, %v6746_v45  }
 0x130   : > { %5872 = vset.pattern.permute.xlu1 %v9103_v43  ;;  %v6751_v19 = vpop.permute.xlu1 %1195 }
 0x131   : > { %1416 = vperm.xlu1 %5872, %v6379_v11   ;;  %v916_v11 = vmul.f32 %v6684_v3, %v6606_v63 }
 0x133   : > { %5897 = vset.pattern.permute.xlu0 %v9110_v31  ;;  %v924_v12 = vadd.f32 %v916_v11, %v876_v25  ;;  %v1173_v11 = vmul.f32 %v6697_v21, %v6587_v56 }
 0x134   : > { %604 = vperm.xlu0 %5897, %v6477_v26  }
 0x135   : > { %5873 = vset.pattern.permute.xlu1 %v9109_v8  ;;  %v6759_v42 = vpop.permute.xlu1 %857  ;;  %v972_v61 = vadd.f32 %v964_v37, %v924_v12  ;;  %v6800_v12 = vpop.permute.xlu0 %1404 }
 0x136   : > { %1167 = vperm.xlu1 %5873, %v6635_v16  }
 0x138   : > { %634 = vperm.xlu0 %5897, %v6746_v45  }
 0x139   : > { %v1409_v56 = vpop.permute.xlu0 %1408 }
 0x13a   : > { %5874 = vset.pattern.permute.xlu1 %v9103_v43  ;;  %v6767_v17 = vpop.permute.xlu1 %946 }
 0x13b   : > { %1006 = vperm.xlu1 %5874, %v6604_v62   ;;  %v582_v62 = vld [vmem:[%s6338_s21 + $0x10] sm:$0xff]  ;;  %s9130_s21 = smov 64  }
 0x13f   : > { %5875 = vset.pattern.permute.xlu1 %v9109_v8  ;;  %v991_v32 = vpop.permute.xlu1 %990 }
 0x140   : > { %v1012_v48 = vmul.f32 %v6707_v59, %v991_v32  ;;  %1376 = vperm.xlu1 %5875, %v6390_v13   ;;  %v1077_v13 = vmul.f32 %v6666_v1, %v6582_v55  ;;  %v1334_v55 = vmul.f32 %v6684_v3, %v6647_v23 }
 0x142   : > { %v1020_v63 = vadd.f32 %v1012_v48, %v972_v61  ;;  %v1342_v4 = vadd.f32 %v1334_v55, %v1294_v18 }
 0x144   : > { %5876 = vset.pattern.permute.xlu1 %v9103_v43  ;;  %v6776_v7 = vpop.permute.xlu1 %1316  ;;  %1457 = vrot.lane.b32.xlu0 %v1020_v63, %s6182_s24 }
 0x145   : > { %1215 = vperm.xlu1 %5876, %v6635_v16   ;;  %v1085_v16 = vadd.f32 %v6679_v6, %v1077_v13  ;;  %v1430_v13 = vmul.f32 %v6707_v59, %v1409_v56 }
 0x147   : > { %v1133_v37 = vadd.f32 %v1125_v49, %v1085_v16 }
 0x149   : > { %5877 = vset.pattern.permute.xlu1 %v9110_v31  ;;  %v1361_v54 = vpop.permute.xlu1 %1360  ;;  %v1181_v48 = vadd.f32 %v1173_v11, %v1133_v37 }
 0x14a   : > { %599 = vperm.xlu1 %5877, %v6440_v22   ;;  %v1382_v32 = vmul.f32 %v6697_v21, %v1361_v54 }
 0x14c   : > { %v1390_v49 = vadd.f32 %v1382_v32, %v1342_v4  ;;  %v918_v4 = vmul.f32 %v6684_v3, %v6652_v14  ;;  %v1175_v14 = vmul.f32 %v6697_v21, %v6597_v60 }
 0x14e   : > { %v6783_v10 = vpop.permute.xlu1 %1066  ;;  %609 = vperm.xlu1 %5877, %v582_v62   ;;  %v1438_v54 = vadd.f32 %v1430_v13, %v1390_v49 }
 0x14f   : > { %9111 = vst [vmem:[#allocation29_spill] sm:$0xff] %v6783_v10 }
 0x152   : > { %5878 = vset.pattern.permute.xlu1 %v9106_v58 }
 0x153   : > { %v1112_v25 = vpop.permute.xlu1 %1111  ;;  %659 = vperm.xlu1 %5878, %v6440_v22  }
 0x157   : > { %5879 = vset.pattern.permute.xlu1 %v9110_v31 }
 0x158   : > { %v1200_v61 = vpop.permute.xlu1 %1199  ;;  %614 = vperm.xlu1 %5879, %v6448_v24  }
 0x159   : > { %v1221_v63 = vmul.f32 %v6707_v59, %v1200_v61  ;;  %v1079_v61 = vmul.f32 %v6666_v1, %v6737_v15 }
 0x15b   : > { %v1229_v23 = vadd.f32 %v1221_v63, %v1181_v48  ;;  %v1127_v63 = vmul.f32 %v6684_v3, %v1112_v25 }
 0x15c   : > { %5880 = vset.pattern.permute.xlu1 %v9106_v58 }
 0x15d   : > { %v6809_v16 = vpop.permute.xlu1 %862  ;;  %1489 = vrot.lane.b32.xlu0 %v1229_v23, %s9068_s25  ;;  %667 = vperm.xlu1 %5880, %v582_v62  }
 0x161   : > { %1521 = vrot.lane.b32.xlu0 %v1438_v54, %s6184_s19  ;;  %5881 = vset.pattern.permute.xlu1 %v9109_v8 }
 0x162   : > { %v951_v41 = vpop.permute.xlu1 %950  ;;  %716 = vperm.xlu1 %5881, %v6477_v26  }
 0x163   : > { %v966_v13 = vmul.f32 %v6697_v21, %v951_v41 }
 0x166   : > { %5882 = vset.pattern.permute.xlu1 %v9110_v31 }
 0x167   : > { %v6816_v11 = vpop.permute.xlu1 %994  ;;  %619 = vperm.xlu1 %5882, %v6573_v52  }
 0x16b   : > { %5883 = vset.pattern.permute.xlu1 %v9109_v8 }
 0x16c   : > { %v6820_v37 = vpop.permute.xlu1 %1320  ;;  %720 = vperm.xlu1 %5883, %v582_v62  }
 0x170   : > { %5884 = vset.pattern.permute.xlu1 %v9103_v43 }
 0x171   : > { %v6823_v55 = vpop.permute.xlu1 %1364  ;;  %765 = vperm.xlu1 %5884, %v6440_v22   ;;  %v870_v22 = vmul.f32 %v6666_v1, %v6655_v0  ;;  %v1087_v0 = vadd.f32 %v6679_v6, %v1079_v61 }
 0x173   : > { %v878_v48 = vadd.f32 %v6679_v6, %v870_v22  ;;  %v1135_v15 = vadd.f32 %v1127_v63, %v1087_v0 }
 0x175   : > { %5885 = vset.pattern.permute.xlu1 %v9110_v31  ;;  %v926_v49 = vadd.f32 %v918_v4, %v878_v48  ;;  %v1183_v10 = vadd.f32 %v1175_v14, %v1135_v15  ;;  %v865_v4 = vmul.f32 %v6666_v1, %v6498_v30  ;;  %v1009_v30 = vmul.f32 %v6707_v59, %v6612_v2 }
 0x176   : > { %v6827_v26 = vpop.permute.xlu1 %1071  ;;  %624 = vperm.xlu1 %5885, %v6485_v27   ;;  %v1284_v14 = vmul.f32 %v6666_v1, %v6526_v38 }
 0x177   : > { %v974_v25 = vadd.f32 %v966_v13, %v926_v49  ;;  %v873_v48 = vadd.f32 %v6679_v6, %v865_v4  ;;  %v1288_v13 = vmul.f32 %v6666_v1, %v6528_v39  ;;  %v915_v39 = vmul.f32 %v6684_v3, %v6545_v44 }
 0x17a   : > { %5886 = vset.pattern.permute.xlu1 %v9106_v58 }
 0x17b   : > { %v6831_v18 = vpop.permute.xlu1 %1115  ;;  %675 = vperm.xlu1 %5886, %v6573_v52  }
 0x17c   : > { %9112 = vst [vmem:[#allocation30_spill] sm:$0xff] %v6831_v18 }
 0x17f   : > { %5888 = vset.pattern.permute.xlu1 %v9103_v43 }
 0x180   : > { %v6835_v32 = vpop.permute.xlu1 %1203  ;;  %773 = vperm.xlu1 %5888, %v582_v62   ;;  %v6849_v62 = vpop.permute.xlu0 %1412 }
 0x184   : > { %5889 = vset.pattern.permute.xlu1 %v9110_v31  ;;  %v1208_v22 = vpop.permute.xlu0 %1207 }
 0x185   : > { %v6846_v56 = vpop.permute.xlu1 %910  ;;  %629 = vperm.xlu1 %5889, %v6727_v36   ;;  %v1223_v18 = vmul.f32 %v6707_v59, %v1208_v22 }
 0x189   : > { %5891 = vset.pattern.permute.xlu1 %v9109_v8 }
 0x18a   : > { %v999_v23 = vpop.permute.xlu1 %998  ;;  %728 = vperm.xlu1 %5891, %v6573_v52   ;;  %v1231_v52 = vadd.f32 %v1223_v18, %v1183_v10  ;;  %v961_v18 = vmul.f32 %v6697_v21, %v6553_v46  ;;  %v1122_v46 = vmul.f32 %v6684_v3, %v6533_v40  ;;  %v1296_v40 = vadd.f32 %v6679_v6, %v1288_v13 }
 0x18b   : > { %v1014_v54 = vmul.f32 %v6707_v59, %v999_v23  ;;  %v1218_v23 = vmul.f32 %v6707_v59, %v6649_v28 }
 0x18d   : > { %v1022_v61 = vadd.f32 %v1014_v54, %v974_v25  ;;  %v963_v25 = vmul.f32 %v6697_v21, %v6565_v50  ;;  %v1292_v50 = vadd.f32 %v6679_v6, %v1284_v14 }
 0x18e   : > { %5892 = vset.pattern.permute.xlu1 %v9103_v43 }
 0x18f   : > { %v6860_v41 = vpop.permute.xlu1 %1324  ;;  %1461 = vrot.lane.b32.xlu0 %v1022_v61, %s6182_s24  ;;  %777 = vperm.xlu1 %5892, %v6448_v24   ;;  %v913_v24 = vmul.f32 %v6684_v3, %v6512_v34  ;;  %v1332_v61 = vmul.f32 %v6684_v3, %v6575_v53  ;;  %v872_v53 = vmul.f32 %v6666_v1, %v6809_v16 }
 0x191   : > { %v921_v63 = vadd.f32 %v913_v24, %v873_v48  ;;  %v1380_v48 = vmul.f32 %v6697_v21, %v6628_v9  ;;  %v9113_v24 = vld [vmem:[#allocation20_spill] sm:$0xff]  ;;  %v920_v9 = vmul.f32 %v6684_v3, %v6846_v56 }
 0x193   : > { %1493 = vrot.lane.b32.xlu0 %v1231_v52, %s9068_s25  ;;  %5893 = vset.pattern.permute.xlu1 %v9106_v58  ;;  %v969_v34 = vadd.f32 %v961_v18, %v921_v63  ;;  %v1124_v18 = vmul.f32 %v6684_v3, %v9113_v24 }
 0x194   : > { %v1369_v60 = vpop.permute.xlu1 %1368  ;;  %683 = vperm.xlu1 %5893, %v6727_v36  }
 0x195   : > { %v1017_v15 = vadd.f32 %v1009_v30, %v969_v34 }
 0x198   : > { %5894 = vset.pattern.permute.xlu1 %v9109_v8 }
 0x199   : > { %v6870_v43 = vpop.permute.xlu1 %1119  ;;  %732 = vperm.xlu1 %5894, %v6485_v27   ;;  %v1074_v27 = vmul.f32 %v6666_v1, %v6495_v29  ;;  %v1336_v29 = vmul.f32 %v6684_v3, %v6820_v37  ;;  %v1076_v37 = vmul.f32 %v6666_v1, %v6516_v35 }
 0x19b   : > { %v1082_v2 = vadd.f32 %v6679_v6, %v1074_v27  ;;  %v1344_v22 = vadd.f32 %v1336_v29, %v1296_v40  ;;  %v1084_v38 = vadd.f32 %v6679_v6, %v1076_v37  ;;  %v1428_v27 = vmul.f32 %v6707_v59, %v6787_v47  ;;  %v9116_v47 = vld [vmem:[#allocation19_spill] sm:$0xff] }
 0x19c   : > { %v1333_v56 = vmul.f32 %v6684_v3, %v9116_v47 }
 0x19d   : > { %5895 = vset.pattern.permute.xlu1 %v9106_v58  ;;  %v867_v58 = vmul.f32 %v6666_v1, %v6510_v33 }
 0x19e   : > { %v6877_v10 = vpop.permute.xlu1 %1163  ;;  %687 = vperm.xlu1 %5895, %v6746_v45  }
 0x19f   : > { %v875_v33 = vadd.f32 %v6679_v6, %v867_v58  ;;  %v9114_v58 = vld [vmem:[#allocation12_spill] sm:$0xff] }
 0x1a0   : > { %v1285_v13 = vmul.f32 %v6666_v1, %v9114_v58  ;;  %v1335_v58 = vmul.f32 %v6684_v3, %v6776_v7 }
 0x1a1   : > { %v923_v44 = vadd.f32 %v915_v39, %v875_v33  ;;  %v1220_v33 = vmul.f32 %v6707_v59, %v6751_v19 }
 0x1a2   : > { %v959_v0 = vpop.permute.xlu1 %958  ;;  %5896 = vset.pattern.permute.xlu1 %v9109_v8  ;;  %v1170_v8 = vmul.f32 %v6697_v21, %v6589_v57  ;;  %v1384_v57 = vmul.f32 %v6697_v21, %v1369_v60  ;;  %v1011_v60 = vmul.f32 %v6707_v59, %v6688_v5  ;;  %v1340_v5 = vadd.f32 %v1332_v61, %v1292_v50 }
 0x1a3   : > { %736 = vperm.xlu1 %5896, %v6727_v36   ;;  %v1130_v36 = vadd.f32 %v1122_v46, %v1082_v2  ;;  %v1132_v46 = vadd.f32 %v1124_v18, %v1084_v38  ;;  %v1293_v40 = vadd.f32 %v6679_v6, %v1285_v13  ;;  %v1126_v50 = vmul.f32 %v6684_v3, %v6743_v51 }
 0x1a4   : > { %v1392_v35 = vadd.f32 %v1384_v57, %v1344_v22  ;;  %v1388_v16 = vadd.f32 %v1380_v48, %v1340_v5  ;;  %v9118_v22 = vld [vmem:[#allocation21_spill] sm:$0xff]  ;;  %v1129_v48 = vmul.f32 %v6684_v3, %v6870_v43  ;;  %v1013_v18 = vmul.f32 %v6707_v59, %v6816_v11 }
 0x1a5   : > { %v1178_v54 = vadd.f32 %v1170_v8, %v1130_v36  ;;  %v968_v8 = vmul.f32 %v6697_v21, %v959_v0  ;;  %v9117_v36 = vld [vmem:[#allocation14_spill] sm:$0xff]  ;;  %v1381_v0 = vmul.f32 %v6697_v21, %v6717_v20  ;;  %v1078_v19 = vmul.f32 %v6666_v1, %v9118_v22 }
 0x1a6   : > { %v1436_v29 = vadd.f32 %v1428_v27, %v1388_v16  ;;  %v9127_v22 = vld [vmem:[#allocation30_spill] sm:$0xff] }
 0x1a7   : > { %v6899_v49 = vpop.permute.xlu1 %1328  ;;  %1451 = vrot.lane.b32.xlu1 %v1017_v15, %s6182_s24  ;;  %v1226_v52 = vadd.f32 %v1218_v23, %v1178_v54  ;;  %v9115_v15 = vld [vmem:[#allocation22_spill] sm:$0xff]  ;;  %v869_v23 = vmul.f32 %v6666_v1, %v9117_v36  ;;  %v1341_v54 = vadd.f32 %v1333_v56, %v1293_v40  ;;  %v1086_v51 = vadd.f32 %v6679_v6, %v1078_v19 }
 0x1a8   : > { %v1172_v2 = vmul.f32 %v6697_v21, %v9115_v15  ;;  %v1431_v36 = vmul.f32 %v6707_v59, %v6849_v62  ;;  %v1128_v62 = vmul.f32 %v6684_v3, %v9127_v22  ;;  %v1695_v22 = vld [vmem:[%s9043_s5 + $0x10] sm:$0xff] }
 0x1a9   : > { %v1389_v38 = vadd.f32 %v1381_v0, %v1341_v54 }
 0x1aa   : > { %v1180_v37 = vadd.f32 %v1172_v2, %v1132_v46  ;;  %v1383_v2 = vmul.f32 %v6697_v21, %v6823_v55  ;;  %v9124_v55 = vld [vmem:[#allocation29_spill] sm:$0xff] }
 0x1ab   : > { %740 = vperm.xlu1 %5896, %v6746_v45   ;;  %v971_v45 = vadd.f32 %v963_v25, %v923_v44  ;;  %v9119_v44 = vld [vmem:[#allocation25_spill] sm:$0xff] }
 0x1ac   : > { %v1417_v28 = vpop.permute.xlu1 %1416  ;;  %v917_v61 = vmul.f32 %v6684_v3, %v9119_v44 }
 0x1ad   : > { %v1432_v4 = vmul.f32 %v6707_v59, %v1417_v28  ;;  %v1019_v30 = vadd.f32 %v1011_v60, %v971_v45  ;;  %v1429_v28 = vmul.f32 %v6707_v59, %v6800_v12  ;;  %v1081_v60 = vmul.f32 %v6666_v1, %v6827_v26  ;;  %v9120_v26 = vld [vmem:[#allocation28_spill] sm:$0xff] }
 0x1ae   : > { %v1287_v24 = vmul.f32 %v6666_v1, %v9120_v26 }
 0x1af   : > { %v1440_v63 = vadd.f32 %v1432_v4, %v1392_v35  ;;  %1483 = vrot.lane.b32.xlu1 %v1226_v52, %s9068_s25  ;;  %v1228_v52 = vadd.f32 %v1220_v33, %v1180_v37  ;;  %v877_v35 = vadd.f32 %v6679_v6, %v869_v23  ;;  %v965_v4 = vmul.f32 %v6697_v21, %v6767_v17  ;;  %v9123_v33 = vld [vmem:[#allocation15_spill] sm:$0xff]  ;;  %v1003_v23 = vpop.permute.xlu0 %1002 }
 0x1b0   : > { %5898 = vset.pattern.permute.xlu1 %v9110_v31  ;;  %v880_v31 = vadd.f32 %v6679_v6, %v872_v53  ;;  %v871_v17 = vmul.f32 %v6666_v1, %v6759_v42  ;;  %v1437_v53 = vadd.f32 %v1429_v28, %v1389_v38  ;;  %v1089_v43 = vadd.f32 %v6679_v6, %v1081_v60  ;;  %v9122_v42 = vld [vmem:[#allocation23_spill] sm:$0xff] }
 0x1b1   : > { %v1168_v34 = vpop.permute.xlu1 %1167  ;;  %1525 = vrot.lane.b32.xlu0 %v1440_v63, %s6184_s19  ;;  %v925_v12 = vadd.f32 %v917_v61, %v877_v35  ;;  %v919_v11 = vmul.f32 %v6684_v3, %v9122_v42  ;;  %v1295_v16 = vadd.f32 %v6679_v6, %v1287_v24  ;;  %v1015_v44 = vmul.f32 %v6707_v59, %v1003_v23  ;;  %v1698_v23 = vld [vmem:[%s9043_s5 + $0x28] sm:$0xff] }
 0x1b2   : > { %v928_v39 = vadd.f32 %v920_v9, %v880_v31  ;;  %v1177_v63 = vmul.f32 %v6697_v21, %v1168_v34  ;;  %v1134_v9 = vadd.f32 %v1126_v50, %v1086_v51  ;;  %v1137_v13 = vadd.f32 %v1129_v48, %v1089_v43  ;;  %v9128_v48 = vld [vmem:[#allocation11_spill] sm:$0xff] }
 0x1b3   : > { %1455 = vrot.lane.b32.xlu1 %v1019_v30, %s6182_s24  ;;  %v973_v5 = vadd.f32 %v965_v4, %v925_v12  ;;  %v9121_v30 = vld [vmem:[#allocation13_spill] sm:$0xff]  ;;  %v879_v46 = vadd.f32 %v6679_v6, %v871_v17  ;;  %v1222_v31 = vmul.f32 %v6707_v59, %v6835_v32  ;;  %v1343_v47 = vadd.f32 %v1335_v58, %v1295_v16  ;;  %v1212_v35 = vpop.permute.xlu0 %1211  ;;  %v1642_v4 = vld [vmem:[%s9125_s4 + $0x28] sm:$0xff]  ;;  %v1641_v17 = vld [vmem:[%s9125_s4 + $0x20] sm:$0xff] }
 0x1b4   : > { %v976_v14 = vadd.f32 %v968_v8, %v928_v39  ;;  %v1174_v27 = vmul.f32 %v6697_v21, %v9121_v30  ;;  %v1185_v8 = vadd.f32 %v1177_v63, %v1137_v13  ;;  %v967_v39 = vmul.f32 %v6697_v21, %v9123_v33  ;;  %v1640_v13 = vld [vmem:[%s9125_s4 + $0x18] sm:$0xff]  ;;  %v1693_v33 = vld [vmem:[%s9043_s5] sm:$0xff] }
 0x1b5   : > { %v1021_v15 = vadd.f32 %v1013_v18, %v973_v5  ;;  %v927_v40 = vadd.f32 %v919_v11, %v879_v46  ;;  %v1391_v32 = vadd.f32 %v1383_v2, %v1343_v47  ;;  %v1176_v60 = vmul.f32 %v6697_v21, %v6877_v10  ;;  %v9129_v18 = vld [vmem:[#allocation16_spill] sm:$0xff]  ;;  %v1637_v47 = vld [vmem:[%s9125_s4] sm:$0xff] }
 0x1b6   : > { %v1007_v57 = vpop.permute.xlu1 %1006  ;;  %v1182_v56 = vadd.f32 %v1174_v27, %v1134_v9  ;;  %v1290_v12 = vmul.f32 %v6666_v1, %v9128_v48  ;;  %v1385_v51 = vmul.f32 %v6697_v21, %v9129_v18  ;;  %v1338_v43 = vmul.f32 %v6684_v3, %v6899_v49  ;;  %v1765_v48 = vld [vmem:[%s9045_s7] sm:$0xff] }
 0x1b7   : > { %v1016_v25 = vmul.f32 %v6707_v59, %v1007_v57  ;;  %1517 = vrot.lane.b32.xlu1 %v1436_v29, %s6184_s19  ;;  %v1080_v57 = vmul.f32 %v6666_v1, %v9124_v55  ;;  %v975_v19 = vadd.f32 %v967_v39, %v927_v40  ;;  %v1439_v28 = vadd.f32 %v1431_v36, %v1391_v32  ;;  %v1421_v5 = vpop.permute.xlu0 %1420  ;;  %v1699_v39 = vld [vmem:[%s9043_s5 + $0x30] sm:$0xff]  ;;  %v1777_v55 = vld [vmem:[%s9045_s7 + $0x60] sm:$0xff] }
 0x1b8   : > { %v1230_v37 = vadd.f32 %v1222_v31, %v1182_v56  ;;  %v1298_v63 = vadd.f32 %v6679_v6, %v1290_v12  ;;  %v1433_v30 = vmul.f32 %v6707_v59, %v1421_v5  ;;  %v1638_v31 = vld [vmem:[%s9125_s4 + $0x8] sm:$0xff]  ;;  %v1700_v56 = vld [vmem:[%s9043_s5 + $0x38] sm:$0xff]  ;;  %v1779_v40 = vld [vmem:[%s9045_s7 + $0x70] sm:$0xff] }
 0x1b9   : > { %v1024_v20 = vadd.f32 %v1016_v25, %v976_v14  ;;  %v1644_v14 = vld [vmem:[%s9125_s4 + $0x38] sm:$0xff]  ;;  %v9126_v25 = vld [vmem:[#allocation10_spill] sm:$0xff]  ;;  %v1088_v61 = vadd.f32 %v6679_v6, %v1080_v57 }
 0x1ba   : > { %v1289_v54 = vmul.f32 %v6666_v1, %v9126_v25  ;;  %v1346_v42 = vadd.f32 %v1338_v43, %v1298_v63  ;;  %v1697_v32 = vld [vmem:[%s9043_s5 + $0x20] sm:$0xff]  ;;  %v1776_v12 = vld [vmem:[%s9045_s7 + $0x58] sm:$0xff]  ;;  %v2147_v63 = vld [vmem:[%s9047_s9 + $0x28] sm:$0xff] }
 0x1bb   : > { %v6969_v45 = vpop.permute.xlu1 %1376  ;;  %1465 = vrot.lane.b32.xlu0 %v1024_v20, %s6182_s24  ;;  %1487 = vrot.lane.b32.xlu1 %v1228_v52, %s9068_s25  ;;  %v1337_v52 = vmul.f32 %v6684_v3, %v6860_v41  ;;  %v1136_v50 = vadd.f32 %v1128_v62, %v1088_v61  ;;  %v1023_v41 = vadd.f32 %v1015_v44, %v975_v19  ;;  %v1425_v46 = vpop.permute.xlu0 %1424  ;;  %v1771_v19 = vld [vmem:[%s9045_s7 + $0x30] sm:$0xff]  ;;  %v1694_v44 = vld [vmem:[%s9043_s5 + $0x8] sm:$0xff] }
 0x1bc   : > { %v1297_v38 = vadd.f32 %v6679_v6, %v1289_v54  ;;  %v1386_v58 = vmul.f32 %v6697_v21, %v6969_v45  ;;  %v1434_v45 = vmul.f32 %v6707_v59, %v1425_v46  ;;  %v1773_v54 = vld [vmem:[%s9045_s7 + $0x40] sm:$0xff]  ;;  %v1772_v43 = vld [vmem:[%s9045_s7 + $0x38] sm:$0xff] }
 0x1bd   : > { %v1184_v24 = vadd.f32 %v1176_v60, %v1136_v50  ;;  %v1780_v60 = vld [vmem:[%s9045_s7 + $0x78] sm:$0xff]  ;;  %v1778_v50 = vld [vmem:[%s9045_s7 + $0x68] sm:$0xff] }
 0x1be   : > { %v1345_v26 = vadd.f32 %v1337_v52, %v1297_v38  ;;  %v1394_v11 = vadd.f32 %v1386_v58, %v1346_v42 }
 0x1bf   : > { %1519 = vrot.lane.b32.xlu1 %v1437_v53, %s6184_s19  ;;  %v1224_v53 = vmul.f32 %v6707_v59, %v1212_v35  ;;  %v7118_v61 = vpop.permute.xlu0 %769  ;;  %v1767_v35 = vld [vmem:[%s9045_s7 + $0x10] sm:$0xff] }
 0x1c0   : > { %v1216_v34 = vpop.permute.xlu1 %1215  ;;  %v1393_v27 = vadd.f32 %v1385_v51, %v1345_v26  ;;  %v1442_v2 = vadd.f32 %v1434_v45, %v1394_v11  ;;  %v2145_v51 = vld [vmem:[%s9047_s9 + $0x18] sm:$0xff]  ;;  %v4819_v11 = vld [vmem:[%s9125_s4 + $0x70] sm:$0xff] }
 0x1c1   : > { %v1225_v7 = vmul.f32 %v6707_v59, %v1216_v34  ;;  %v1232_v9 = vadd.f32 %v1224_v53, %v1184_v24  ;;  %v2143_v24 = vld [vmem:[%s9047_s9 + $0x8] sm:$0xff] }
 0x1c2   : > { %v1441_v16 = vadd.f32 %v1433_v30, %v1393_v27  ;;  %v1770_v27 = vld [vmem:[%s9045_s7 + $0x28] sm:$0xff] }
 0x1c3   : > { %v1233_v29 = vadd.f32 %v1225_v7, %v1185_v8  ;;  %1459 = vrot.lane.b32.xlu1 %v1021_v15, %s6182_s24  ;;  %v1639_v15 = vld [vmem:[%s9125_s4 + $0x10] sm:$0xff] }
 0x1c4   : > { %v1643_v8 = vld [vmem:[%s9125_s4 + $0x30] sm:$0xff] }
 0x1c5   : > { %1497 = vrot.lane.b32.xlu0 %v1233_v29, %s9068_s25  ;;  %v7004_v0 = vpop.permute.xlu1 %599 }
 0x1c7   : > { %1491 = vrot.lane.b32.xlu1 %v1230_v37, %s9068_s25  ;;  %v1775_v37 = vld [vmem:[%s9045_s7 + $0x50] sm:$0xff] }
 0x1c9   : > { %1682 = vperm.xlu0 %5897, %v1644_v14   ;;  %v7020_v20 = vpop.permute.xlu1 %609  ;;  %v1696_v14 = vld [vmem:[%s9043_s5 + $0x18] sm:$0xff] }
 0x1cb   : > { %1523 = vrot.lane.b32.xlu1 %v1439_v28, %s6184_s19  ;;  %v1769_v28 = vld [vmem:[%s9045_s7 + $0x20] sm:$0xff] }
 0x1cd   : > { %1672 = vperm.xlu0 %5897, %v1642_v4   ;;  %v7131_v4 = vpop.permute.xlu0 %781 }
 0x1ce   : > { %v7029_v10 = vpop.permute.xlu1 %659 }
 0x1cf   : > { %1463 = vrot.lane.b32.xlu1 %v1023_v41, %s6182_s24  ;;  %s569_s24 = sand.u32 1, %s6168_s28  }
 0x1d0   : > { %s4761_s27 = sshll.u32 %s569_s24, 7  ;;  %s8998_s20 = scalar_lea.sflag [#allocation3], %s569_s24 }
 0x1d1   : > { %1667 = vperm.xlu0 %5897, %v1641_v17   ;;  %v7144_v41 = vpop.permute.xlu0 %785  ;;  %v1774_v17 = vld [vmem:[%s9045_s7 + $0x48] sm:$0xff]  ;;  %s8953_s23 = scalar_lea.vmem [#allocation2], %s4761_s27 }
 0x1d3   : > { %1495 = vrot.lane.b32.xlu1 %v1232_v9, %s9130_s21  ;;  %v7048_v49 = vpop.permute.xlu1 %614  ;;  %v2149_v9 = vld [vmem:[%s9047_s9 + $0x38] sm:$0xff]  ;;  %s6186_s21 = smov [#allocation2]  }
 0x1d4   : > { %s6120_s27 = sshll.u32 %s6186_s21, 4  ;;  %s6121_s27 = int_to_ptr.vmem [resolvable:$false] %s6120_s27 }
 0x1d5   : > { %1662 = vperm.xlu0 %5897, %v1640_v13   ;;  %v7159_v53 = vpop.permute.xlu0 %1453  ;;  %v1768_v13 = vld [vmem:[%s9045_s7 + $0x18] sm:$0xff]  ;;  %s6122_s29 = scalar_lea.vmem %s6121_s27, 4096 }
 0x1d7   : > { %1527 = vrot.lane.b32.xlu1 %v1441_v16, %s6184_s19  ;;  %v1766_v16 = vld [vmem:[%s9045_s7 + $0x8] sm:$0xff] }
 0x1d8   : > { %v7055_v34 = vpop.permute.xlu1 %667 }
 0x1d9   : > { %1657 = vperm.xlu0 %5897, %v1639_v15   ;;  %v7167_v5 = vpop.permute.xlu0 %789  ;;  %v4818_v15 = vld [vmem:[%s9125_s4 + $0x68] sm:$0xff] }
 0x1db   : > { %1529 = vrot.lane.b32.xlu1 %v1442_v2, %s6184_s19  ;;  %v2142_v2 = vld [vmem:[%s9047_s9] sm:$0xff]  ;;  %s4695_s19 = sshll.u32 %s8953_s23, 4  ;;  %s8992_s19 = int_to_ptr.vmem [resolvable:$true] %s4695_s19 }
 0x1dc   : > { %s6116_s0 = scalar_lea.vmem %s8992_s19, 2048  ;;  %p6123_p0 = scmp.lt.s32.totalorder %s8992_s19, %s6121_s27 }
 0x1dd   : > { %1652 = vperm.xlu0 %5897, %v1638_v31   ;;  %v7064_v7 = vpop.permute.xlu1 %716  ;;  %v7182_v42 = vpop.permute.xlu0 %1485  ;;  %p6117_p11 = scmp.ne.s32.totalorder %s8992_s19, %s6116_s0  ;;  %p6124_p1 = scmp.lt.s32.totalorder %s6122_s29, %s6116_s0 }
 0x1df   : > { %1677 = vperm.xlu1 %5898, %v1643_v8   ;;  %v4817_v8 = vld [vmem:[%s9125_s4 + $0x60] sm:$0xff]  ;;  %p6118_p12 = pnand %p6117_p11, %p6322_p5  ;;  %p6125_p2 = por %p6124_p1, %p6123_p0 }
 0x1e1   : > { %1647 = vperm.xlu0 %5897, %v1637_v47   ;;  %v7195_v45 = vpop.permute.xlu0 %1515  ;;  %v2144_v47 = vld [vmem:[%s9047_s9 + $0x10] sm:$0xff]  ;;  %p6119_p13 = pneg %p6118_p12 }
 0x1e2   : > { %v7072_v29 = vpop.permute.xlu1 %619 }
 0x1e3   : > { %1738 = vperm.xlu1 %5898, %v1700_v56   ;;  %p6126_p3 = pnand %p6125_p2, %p6119_p13 }
 0x1e5   : > { %1703 = vperm.xlu0 %5897, %v1693_v33   ;;  %v7208_v56 = vpop.permute.xlu0 %793 }
 0x1e7   : > { %1733 = vperm.xlu1 %5898, %v1699_v39   ;;  %v7083_v36 = vpop.permute.xlu1 %720  ;;  %v4816_v39 = vld [vmem:[%s9125_s4 + $0x58] sm:$0xff] }
 0x1e9   : > { %1853 = vperm.xlu0 %5897, %v1779_v40   ;;  %v2146_v40 = vld [vmem:[%s9047_s9 + $0x20] sm:$0xff] }
 0x1eb   : > { %1728 = vperm.xlu1 %5898, %v1698_v23  }
 0x1ec   : > { %v7091_v57 = vpop.permute.xlu1 %765 }
 0x1ed   : > { %1843 = vperm.xlu0 %5897, %v1777_v55   ;;  %v4815_v55 = vld [vmem:[%s9125_s4 + $0x50] sm:$0xff] }
 0x1ef   : > { %1723 = vperm.xlu1 %5898, %v1697_v32   ;;  %v605_v32 = vpop.permute.xlu0 %604 }
 0x1f1   : > { %1833 = vperm.xlu0 %5897, %v1775_v37   ;;  %v7102_v25 = vpop.permute.xlu1 %624  ;;  %v2148_v37 = vld [vmem:[%s9047_s9 + $0x30] sm:$0xff] }
 0x1f3   : > { %1718 = vperm.xlu1 %5898, %v1696_v14  }
 0x1f5   : > { %1823 = vperm.xlu0 %5897, %v1773_v54   ;;  %v4814_v54 = vld [vmem:[%s9125_s4 + $0x48] sm:$0xff] }
 0x1f6   : > { %v7110_v62 = vpop.permute.xlu1 %675 }
 0x1f7   : > { %1713 = vperm.xlu1 %5898, %v1695_v22   ;;  %v4820_v22 = vld [vmem:[%s9125_s4 + $0x78] sm:$0xff] }
 0x1f9   : > { %1813 = vperm.xlu0 %5897, %v1771_v19   ;;  %v7234_v19 = vpop.permute.xlu0 %634 }
 0x1fb   : > { %1708 = vperm.xlu1 %5898, %v1694_v44   ;;  %v7123_v52 = vpop.permute.xlu1 %773  ;;  %v1749_v44 = vld [vmem:[%s9044_s6] sm:$0xff] }
 0x1fc   : > { %5355 = vmatprep.mubr.msk.f32.mxu0 %vm1548_vm0, %v1749_v44 }
 0x1fd   : > { %1803 = vperm.xlu0 %5897, %v1769_v28   ;;  %v642_v28 = vmul.f32 %v6666_v1, %v605_v32 }
 0x1ff   : > { %1858 = vperm.xlu1 %5898, %v1780_v60  }
 0x200   : > { %v7133_v38 = vpop.permute.xlu1 %629 }
 0x201   : > { %1793 = vperm.xlu0 %5897, %v1767_v35   ;;  %v4813_v35 = vld [vmem:[%s9125_s4 + $0x40] sm:$0xff] }
 0x203   : > { %1848 = vperm.xlu1 %5898, %v1778_v50   ;;  %v4828_v50 = vld [vmem:[%s9043_s5 + $0x78] sm:$0xff] }
 0x205   : > { %1783 = vperm.xlu0 %5897, %v1765_v48   ;;  %v7146_v26 = vpop.permute.xlu1 %728  ;;  %v650_v48 = vadd.f32 %v6679_v6, %v642_v28 }
 0x207   : > { %1838 = vperm.xlu1 %5898, %v1776_v12  }
 0x209   : > { %2157 = vperm.xlu0 %5897, %v2143_v24   ;;  %v4821_v24 = vld [vmem:[%s9043_s5 + $0x40] sm:$0xff] }
 0x20a   : > { %v7154_v18 = vpop.permute.xlu1 %777 }
 0x20b   : > { %1828 = vperm.xlu1 %5898, %v1774_v17   ;;  %v7255_v17 = vpop.permute.xlu0 %1457 }
 0x20d   : > { %2167 = vperm.xlu0 %5897, %v2145_v51   ;;  %v9131_v51 = vld [vmem:[#allocation24_spill] sm:$0xff] }
 0x20f   : > { %1818 = vperm.xlu1 %5898, %v1772_v43   ;;  %v7169_v30 = vpop.permute.xlu1 %683  ;;  %v695_v43 = vmul.f32 %v6684_v3, %v9131_v51  ;;  %v6079_v51 = vld [vmem:[%s9101_s26] ss:$0 sm:$0xff] }
 0x211   : > { %2177 = vperm.xlu0 %5897, %v2147_v63   ;;  %v644_v63 = vmul.f32 %v6666_v1, %v7048_v49  ;;  %v694_v49 = vmul.f32 %v6684_v3, %v7029_v10  ;;  %v801_v10 = vmul.f32 %v6707_v59, %v7118_v61  ;;  %v4825_v61 = vld [vmem:[%s9043_s5 + $0x60] sm:$0xff] }
 0x213   : > { %1808 = vperm.xlu1 %5898, %v1770_v27   ;;  %v748_v27 = vmul.f32 %v6697_v21, %v7064_v7  ;;  %v652_v7 = vadd.f32 %v6679_v6, %v644_v63  ;;  %v9135_v63 = vld [vmem:[#allocation27_spill] sm:$0xff] }
 0x214   : > { %v7177_v58 = vpop.permute.xlu1 %732 }
 0x215   : > { %2187 = vperm.xlu0 %5897, %v2149_v9   ;;  %v4827_v9 = vld [vmem:[%s9043_s5 + $0x70] sm:$0xff] }
 0x217   : > { %1798 = vperm.xlu1 %5898, %v1768_v13   ;;  %v641_v13 = vmul.f32 %v6666_v1, %v7004_v0  ;;  %v4826_v0 = vld [vmem:[%s9043_s5 + $0x68] sm:$0xff] }
 0x219   : > { %3059 = vperm.xlu0 %5897, %v4819_v11   ;;  %v7190_v46 = vpop.permute.xlu1 %687  ;;  %v703_v11 = vadd.f32 %v695_v43, %v650_v48 }
 0x21b   : > { %1788 = vperm.xlu1 %5898, %v1766_v16  }
 0x21d   : > { %3054 = vperm.xlu0 %5897, %v4818_v15   ;;  %v4859_v15 = vld [vmem:[%s9045_s7 + $0xf0] sm:$0xff] }
 0x21e   : > { %v7200_v31 = vpop.permute.xlu1 %736 }
 0x21f   : > { %2152 = vperm.xlu1 %5898, %v2142_v2   ;;  %v7275_v2 = vpop.permute.xlu0 %1489 }
 0x221   : > { %3049 = vperm.xlu0 %5897, %v4817_v8   ;;  %v756_v8 = vadd.f32 %v748_v27, %v703_v11 }
 0x222   : > { %v7210_v33 = vpop.permute.xlu1 %1451 }
 0x223   : > { %2162 = vperm.xlu1 %5898, %v2144_v47   ;;  %v649_v47 = vadd.f32 %v6679_v6, %v641_v13 }
 0x225   : > { %3044 = vperm.xlu0 %5897, %v4816_v39   ;;  %v643_v39 = vmul.f32 %v6666_v1, %v7020_v20  ;;  %v702_v44 = vadd.f32 %v694_v49, %v649_v47  ;;  %v696_v20 = vmul.f32 %v6684_v3, %v7055_v34  ;;  %v749_v34 = vmul.f32 %v6697_v21, %v7083_v36  ;;  %v4855_v36 = vld [vmem:[%s9045_s7 + $0xd0] sm:$0xff] }
 0x226   : > { %v7218_v23 = vpop.permute.xlu1 %740 }
 0x227   : > { %2172 = vperm.xlu1 %5898, %v2146_v40   ;;  %v9132_v40 = vld [vmem:[#allocation26_spill] sm:$0xff]  ;;  %v651_v48 = vadd.f32 %v6679_v6, %v643_v39 }
 0x228   : > { %v6080_v6 = vld [vmem:[%s9101_s26 + $0x1] ss:$0 sm:$0xff] }
 0x229   : > { %3039 = vperm.xlu0 %5897, %v4815_v55   ;;  %v697_v55 = vmul.f32 %v6684_v3, %v9132_v40  ;;  %v645_v3 = vmul.f32 %v6079_v51, %v7072_v29  ;;  %v699_v27 = vmul.f32 %v6080_v6, %v9135_v63  ;;  %v698_v11 = vmul.f32 %v6080_v6, %v7110_v62 }
 0x22a   : > { %v7226_v14 = vpop.permute.xlu1 %1483 }
 0x22b   : > { %2182 = vperm.xlu1 %5898, %v2148_v37   ;;  %v4857_v37 = vld [vmem:[%s9045_s7 + $0xe0] sm:$0xff]  ;;  %v705_v28 = vadd.f32 %v697_v55, %v652_v7  ;;  %v647_v55 = vmul.f32 %v6079_v51, %v7133_v38 }
 0x22d   : > { %3034 = vperm.xlu0 %5897, %v4814_v54   ;;  %v9133_v54 = vld [vmem:[#allocation17_spill] sm:$0xff] }
 0x22e   : > { %v7240_v60 = vpop.permute.xlu1 %1455 }
 0x22f   : > { %3064 = vperm.xlu1 %5898, %v4820_v22   ;;  %v747_v22 = vmul.f32 %v6697_v21, %v9133_v54 }
 0x231   : > { %3029 = vperm.xlu0 %5897, %v4813_v35   ;;  %v809_v35 = vadd.f32 %v801_v10, %v756_v8  ;;  %v755_v13 = vadd.f32 %v747_v22, %v702_v44  ;;  %v4853_v22 = vld [vmem:[%s9045_s7 + $0xc0] sm:$0xff] }
 0x232   : > { %v7250_v12 = vpop.permute.xlu1 %1517 }
 0x233   : > { %3121 = vperm.xlu1 %5898, %v4828_v50   ;;  %v646_v50 = vmul.f32 %v6666_v1, %v7102_v25  ;;  %v800_v1 = vmul.f32 %v6707_v59, %v7091_v57  ;;  %v9134_v25 = vld [vmem:[#allocation18_spill] sm:$0xff]  ;;  %v704_v57 = vadd.f32 %v696_v20, %v651_v48  ;;  %v1541_v8 = vsel %vm1539_vm1, %v809_v35, %v7159_v53 }
 0x234   : > { %v750_v43 = vmul.f32 %v6697_v21, %v9134_v25  ;;  %v802_v21 = vmul.f32 %v6707_v59, %v7123_v52  ;;  %v6082_v52 = vld [vmem:[%s9101_s26 + $0x2] ss:$0 sm:$0xff]  ;;  %v6083_v53 = vld [vmem:[%s9101_s26 + $0x3] ss:$0 sm:$0xff]  ;;  %v1550_v38 = vsel %vm1548_vm0, %v1541_v8, %v7182_v42  ;;  %v4847_v8 = vld [vmem:[%s9045_s7 + $0x90] sm:$0xff] }
 0x235   : > { %3086 = vperm.xlu0 %5897, %v4821_v24   ;;  %v7303_v24 = vpop.permute.xlu0 %1521  ;;  %v757_v47 = vadd.f32 %v749_v34, %v704_v57  ;;  %v808_v39 = vadd.f32 %v800_v1, %v755_v13  ;;  %v804_v40 = vmul.f32 %v6083_v53, %v7131_v4  ;;  %v7367_v48 = vsel %vm1557_vm2, %v1550_v38, %v7250_v12 }
 0x236   : > { %v7268_v16 = vpop.permute.xlu1 %1487  ;;  %v758_v7 = vadd.f32 %v750_v43, %v705_v28  ;;  %v753_v12 = vmul.f32 %v6082_v52, %v7200_v31  ;;  %v4822_v43 = vld [vmem:[%s9043_s5 + $0x48] sm:$0xff]  ;;  %v754_v63 = vmul.f32 %v6082_v52, %v7218_v23 }
 0x237   : > { %3116 = vperm.xlu1 %5898, %v4827_v9   ;;  %v803_v9 = vmul.f32 %v6707_v59, %v7154_v18  ;;  %v6081_v18 = vld [vmem:[%s9105_s22] ss:$0 sm:$0xff]  ;;  %v810_v20 = vadd.f32 %v802_v21, %v757_v47  ;;  %v4860_v21 = vld [vmem:[%s9045_s7 + $0xf8] sm:$0xff] }
 0x238   : > { %v654_v49 = vadd.f32 %v6081_v18, %v646_v50  ;;  %v653_v62 = vadd.f32 %v6081_v18, %v645_v3 }
 0x239   : > { %3238 = vperm.xlu0 %5897, %v4859_v15   ;;  %v648_v15 = vmul.f32 %v6079_v51, %v7234_v19  ;;  %v7338_v59 = vpop.permute.xlu0 %1461  ;;  %v751_v19 = vmul.f32 %v6082_v52, %v7146_v26  ;;  %v811_v10 = vadd.f32 %v803_v9, %v758_v7  ;;  %v1540_v26 = vsel %vm1539_vm1, %v808_v39, %v7210_v33  ;;  %v4849_v9 = vld [vmem:[%s9045_s7 + $0xa0] sm:$0xff]  ;;  %v4858_v39 = vld [vmem:[%s9045_s7 + $0xe8] sm:$0xff] }
 0x23a   : > { %v7288_v32 = vpop.permute.xlu1 %1519  ;;  %v706_v44 = vadd.f32 %v698_v11, %v653_v62  ;;  %v707_v35 = vadd.f32 %v699_v27, %v654_v49  ;;  %v1549_v4 = vsel %vm1548_vm0, %v1540_v26, %v7226_v14  ;;  %v1542_v33 = vsel %vm1539_vm1, %v810_v20, %v7240_v60 }
 0x23b   : > { %3111 = vperm.xlu1 %5898, %v4826_v0   ;;  %v4824_v0 = vld [vmem:[%s9043_s5 + $0x58] sm:$0xff]  ;;  %v656_v28 = vadd.f32 %v6081_v18, %v648_v15  ;;  %v655_v51 = vadd.f32 %v6081_v18, %v647_v55  ;;  %v1543_v14 = vsel %vm1539_vm1, %v811_v10, %v7255_v17  ;;  %v1551_v3 = vsel %vm1548_vm0, %v1542_v33, %v7268_v16 }
 0x23c   : > { %v759_v50 = vadd.f32 %v751_v19, %v706_v44  ;;  %v701_v60 = vmul.f32 %v6080_v6, %v7190_v46  ;;  %v7380_v25 = vsel %vm1557_vm2, %v1549_v4, %v7195_v45  ;;  %v7384_v17 = vsel %vm1557_vm2, %v1551_v3, %v7288_v32 }
 0x23d   : > { %3228 = vperm.xlu0 %5897, %v4857_v37   ;;  %v752_v37 = vmul.f32 %v6082_v52, %v7177_v58  ;;  %v4823_v58 = vld [vmem:[%s9043_s5 + $0x50] sm:$0xff]  ;;  %v1494_v1 = vpop.permute.xlu0 %1493  ;;  %v1582_v16 = vadd.f32 %v7367_v48, %v7380_v25  ;;  %v805_v46 = vmul.f32 %v6083_v53, %v7144_v41  ;;  %v1552_v32 = vsel %vm1548_vm0, %v1543_v14, %v7275_v2 }
 0x23e   : > { %v7321_v29 = vpop.permute.xlu1 %1459  ;;  %v709_v57 = vadd.f32 %v701_v60, %v656_v28  ;;  %v806_v2 = vmul.f32 %v6083_v53, %v7167_v5  ;;  %v7408_v18 = vsel %vm1557_vm2, %v1552_v32, %v7303_v24 }
 0x23f   : > { %3106 = vperm.xlu1 %5898, %v4825_v61   ;;  %v700_v61 = vmul.f32 %v6080_v6, %v7169_v30  ;;  %v760_v42 = vadd.f32 %v752_v37, %v707_v35  ;;  %v4851_v30 = vld [vmem:[%s9045_s7 + $0xb0] sm:$0xff]  ;;  %v812_v6 = vadd.f32 %v804_v40, %v759_v50  ;;  %v1583_v45 = vadd.f32 %v1582_v16, %v7384_v17  ;;  %v4886_v35 = vld [vmem:[%s9047_s9 + $0x48] sm:$0xff] }
 0x240   : > { %v762_v15 = vadd.f32 %v754_v63, %v709_v57  ;;  %v4885_v57 = vld [vmem:[%s9047_s9 + $0x40] sm:$0xff] }
 0x241   : > { %3218 = vperm.xlu0 %5897, %v4855_v36   ;;  %v708_v31 = vadd.f32 %v700_v61, %v655_v51  ;;  %v813_v36 = vadd.f32 %v805_v46, %v760_v42  ;;  %v1526_v11 = vpop.permute.xlu0 %1525  ;;  %v1544_v41 = vsel %vm1539_vm1, %v812_v6, %v7321_v29  ;;  %v1584_v29 = vadd.f32 %v1583_v45, %v7408_v18  ;;  %v4888_v61 = vld [vmem:[%s9047_s9 + $0x58] sm:$0xff]  ;;  %v4890_v42 = vld [vmem:[%s9047_s9 + $0x68] sm:$0xff] }
 0x242   : > { %v1492_v54 = vpop.permute.xlu1 %1491  ;;  %v4852_v51 = vld [vmem:[%s9045_s7 + $0xb8] sm:$0xff]  ;;  %v4846_v6 = vld [vmem:[%s9045_s7 + $0x88] sm:$0xff] }
 0x243   : > { %3101 = vperm.xlu1 %5898, %v4824_v0   ;;  %v761_v13 = vadd.f32 %v753_v12, %v708_v31  ;;  %v1553_v23 = vsel %vm1548_vm0, %v1544_v41, %v1492_v54  ;;  %v807_v0 = vmul.f32 %v6083_v53, %v7208_v56  ;;  %v1545_v5 = vsel %vm1539_vm1, %v813_v36, %v7338_v59  ;;  %v4845_v59 = vld [vmem:[%s9045_s7 + $0x80] sm:$0xff]  ;;  %v4848_v12 = vld [vmem:[%s9045_s7 + $0x98] sm:$0xff] }
 0x244   : > { %v1554_v40 = vsel %vm1548_vm0, %v1545_v5, %v1494_v1  ;;  %v4892_v1 = vld [vmem:[%s9047_s9 + $0x78] sm:$0xff]  ;;  %v4889_v5 = vld [vmem:[%s9047_s9 + $0x60] sm:$0xff] }
 0x245   : > { %3208 = vperm.xlu0 %5897, %v4853_v22   ;;  %v814_v62 = vadd.f32 %v806_v2, %v761_v13  ;;  %v1466_v47 = vpop.permute.xlu0 %1465  ;;  %v815_v52 = vadd.f32 %v807_v0, %v762_v15  ;;  %v7431_v55 = vsel %vm1557_vm2, %v1554_v40, %v1526_v11  ;;  %v4856_v22 = vld [vmem:[%s9045_s7 + $0xd8] sm:$0xff]  ;;  %v4887_v15 = vld [vmem:[%s9047_s9 + $0x50] sm:$0xff] }
 0x246   : > { %v1524_v34 = vpop.permute.xlu1 %1523 }
 0x247   : > { %3096 = vperm.xlu1 %5898, %v4823_v58   ;;  %v7411_v49 = vsel %vm1557_vm2, %v1553_v23, %v1524_v34  ;;  %v1547_v44 = vsel %vm1539_vm1, %v815_v52, %v1466_v47  ;;  %v4854_v58 = vld [vmem:[%s9045_s7 + $0xc8] sm:$0xff]  ;;  %v4891_v52 = vld [vmem:[%s9047_s9 + $0x70] sm:$0xff] }
 0x248   : > { %v1585_v24 = vadd.f32 %v1584_v29, %v7411_v49  ;;  %v4850_v34 = vld [vmem:[%s9045_s7 + $0xa8] sm:$0xff] }
 0x249   : > { %3198 = vperm.xlu0 %5897, %v4851_v30   ;;  %v1498_v10 = vpop.permute.xlu0 %1497 }
 0x24a   : > { %v1464_v27 = vpop.permute.xlu1 %1463  ;;  %v1586_v54 = vadd.f32 %v1585_v24, %v7431_v55  ;;  %v1556_v20 = vsel %vm1548_vm0, %v1547_v44, %v1498_v10 }
 0x24b   : > { %3091 = vperm.xlu1 %5898, %v4822_v43   ;;  %v1546_v19 = vsel %vm1539_vm1, %v814_v62, %v1464_v27 }
 0x24d   : > { %3188 = vperm.xlu0 %5897, %v4849_v9  }
 0x24e   : > { %v1496_v7 = vpop.permute.xlu1 %1495 }
 0x24f   : > { %3243 = vperm.xlu1 %5898, %v4860_v21   ;;  %v1555_v56 = vsel %vm1548_vm0, %v1546_v19, %v1496_v7 }
 0x251   : > { %3178 = vperm.xlu0 %5897, %v4847_v8  }
 0x252   : > { %v1528_v53 = vpop.permute.xlu1 %1527 }
 0x253   : > { %v7434_v37 = vsel %vm1557_vm2, %v1555_v56, %v1528_v53  ;;  %3233 = vperm.xlu1 %5898, %v4858_v39  }
 0x254   : > { %v1587_v26 = vadd.f32 %v1586_v54, %v7434_v37 }
 0x255   : > { %3168 = vperm.xlu0 %5897, %v4845_v59   ;;  %v1683_v59 = vpop.permute.xlu0 %1682 }
 0x256   : > { %v1530_v28 = vpop.permute.xlu1 %1529 }
 0x257   : > { %v7447_v4 = vsel %vm1557_vm2, %v1556_v20, %v1530_v28  ;;  %3223 = vperm.xlu1 %5898, %v4856_v22  }
 0x258   : > { %v1588_v38 = vadd.f32 %v1587_v26, %v7447_v4 }
 0x259   : > { %3544 = vperm.xlu0 %5897, %v4886_v35   ;;  %v1673_v20 = vpop.permute.xlu0 %1672 }
 0x25a   : > { %v1589_v50 = vrot.slane %v1588_v38, 4  ;;  %v1678_v56 = vpop.permute.xlu1 %1677 }
 0x25b   : > { %3213 = vperm.xlu1 %5898, %v4854_v58  }
 0x25c   : > { %v1590_v33 = vadd.f32 %v1589_v50, %v1588_v38 }
 0x25d   : > { %3554 = vperm.xlu0 %5897, %v4888_v61   ;;  %v1668_v38 = vpop.permute.xlu0 %1667 }
 0x25e   : > { %v1591_v14 = vrot.slane %v1590_v33, 2  ;;  %v1739_v22 = vpop.permute.xlu1 %1738 }
 0x25f   : > { %3203 = vperm.xlu1 %5898, %v4852_v51  }
 0x260   : > { %v1592_v3 = vadd.f32 %v1591_v14, %v1590_v33 }
 0x261   : > { %3564 = vperm.xlu0 %5897, %v4890_v42   ;;  %v1663_v50 = vpop.permute.xlu0 %1662 }
 0x262   : > { %v1593_v30 = vrot.slane %v1592_v3, 1  ;;  %v1734_v35 = vpop.permute.xlu1 %1733 }
 0x263   : > { %3193 = vperm.xlu1 %5898, %v4850_v34  }
 0x264   : > { %v1594_v60 = vadd.f32 %v1593_v30, %v1592_v3 }
 0x265   : > { %3574 = vperm.xlu0 %5897, %v4892_v1   ;;  %v1658_v51 = vpop.permute.xlu0 %1657 }
 0x266   : > { %v1596_v16 = vmul.f32 0.015625, %v1594_v60  ;;  %v1729_v58 = vpop.permute.xlu1 %1728 }
 0x267   : > { %3183 = vperm.xlu1 %5898, %v4848_v12  }
 0x268   : > { %v7472_v43 = vsub.f32 %v7380_v25, %v1596_v16  ;;  %v7475_v46 = vsub.f32 %v7367_v48, %v1596_v16  ;;  %v7481_v31 = vsub.f32 %v7384_v17, %v1596_v16  ;;  %v1600_v63 = vsub.f32 %v7408_v18, %v1596_v16 }
 0x269   : > { %v1601_v27 = vsub.f32 %v7411_v49, %v1596_v16  ;;  %v1602_v13 = vsub.f32 %v7431_v55, %v1596_v16  ;;  %v1603_v23 = vsub.f32 %v7434_v37, %v1596_v16  ;;  %v1604_v29 = vsub.f32 %v7447_v4, %v1596_v16 }
 0x26a   : > { %v1605_v45 = vmul.f32 %v7472_v43, %v7472_v43  ;;  %v1606_v32 = vmul.f32 %v7475_v46, %v7475_v46  ;;  %v1607_v9 = vmul.f32 %v7481_v31, %v7481_v31  ;;  %v1608_v11 = vmul.f32 %v1600_v63, %v1600_v63  ;;  %v1724_v61 = vpop.permute.xlu1 %1723 }
 0x26b   : > { %3173 = vperm.xlu1 %5898, %v4846_v6   ;;  %v1609_v21 = vmul.f32 %v1601_v27, %v1601_v27  ;;  %v1610_v7 = vmul.f32 %v1602_v13, %v1602_v13  ;;  %v1611_v0 = vmul.f32 %v1603_v23, %v1603_v23  ;;  %v1612_v47 = vmul.f32 %v1604_v29, %v1604_v29 }
 0x26c   : > { %v1613_v36 = vadd.f32 %v1606_v32, %v1605_v45  ;;  %v1653_v45 = vpop.permute.xlu0 %1652 }
 0x26e   : > { %v1614_v41 = vadd.f32 %v1613_v36, %v1607_v9  ;;  %v1719_v60 = vpop.permute.xlu1 %1718 }
 0x26f   : > { %3539 = vperm.xlu1 %5898, %v4885_v57  }
 0x270   : > { %v1615_v2 = vadd.f32 %v1614_v41, %v1608_v11 }
 0x272   : > { %v1616_v8 = vadd.f32 %v1615_v2, %v1609_v21 }
 0x273   : > { %3549 = vperm.xlu1 %5898, %v4887_v15  }
 0x274   : > { %v1617_v62 = vadd.f32 %v1616_v8, %v1610_v7 }
 0x276   : > { %v1618_v24 = vadd.f32 %v1617_v62, %v1611_v0  ;;  %v1751_v62 = vld [vmem:[%s9044_s6 + $0x10] sm:$0xff] }
 0x277   : > { %3559 = vperm.xlu1 %5898, %v4889_v5   ;;  %v1752_v5 = vld [vmem:[%s9044_s6 + $0x18] sm:$0xff] }
 0x278   : > { %v1619_v39 = vadd.f32 %v1618_v24, %v1612_v47  ;;  %v1753_v47 = vld [vmem:[%s9044_s6 + $0x20] sm:$0xff]  ;;  %v1754_v24 = vld [vmem:[%s9044_s6 + $0x28] sm:$0xff] }
 0x27a   : > { %v1620_v19 = vrot.slane %v1619_v39, 4 }
 0x27b   : > { %3569 = vperm.xlu1 %5898, %v4891_v52   ;;  %v1756_v52 = vld [vmem:[%s9044_s6 + $0x38] sm:$0xff] }
 0x27c   : > { %v1621_v40 = vadd.f32 %v1620_v19, %v1619_v39  ;;  %v1755_v39 = vld [vmem:[%s9044_s6 + $0x30] sm:$0xff]  ;;  %v1757_v19 = vld [vmem:[%s9044_s6 + $0x40] sm:$0xff] }
 0x27e   : > { %v1622_v53 = vrot.slane %v1621_v40, 2 }
 0x280   : > { %v1623_v10 = vadd.f32 %v1622_v53, %v1621_v40  ;;  %v1758_v40 = vld [vmem:[%s9044_s6 + $0x48] sm:$0xff]  ;;  %v1760_v53 = vld [vmem:[%s9044_s6 + $0x58] sm:$0xff] }
 0x282   : > { %v1624_v54 = vrot.slane %v1623_v10, 1 }
 0x284   : > { %v1625_v44 = vadd.f32 %v1624_v54, %v1623_v10  ;;  %v1762_v10 = vld [vmem:[%s9044_s6 + $0x68] sm:$0xff]  ;;  %v1763_v54 = vld [vmem:[%s9044_s6 + $0x70] sm:$0xff] }
 0x286   : > { %v1626_v26 = vmul.f32 0.015625, %v1625_v44  ;;  %v2134_v44 = vld [vmem:[%s9046_s8] sm:$0xff] }
 0x287   : > { %5411 = vmatprep.mubr.f32.mxu1 %v2134_v44 }
 0x288   : > { %v1627_v28 = vadd.f32 1e-05, %v1626_v26  ;;  %v7580_v26 = vld [vmem:[%s9136_s3 + $0x70] sm:$0xff] }
 0x28a   : > { %5899 = vrsqrt.f32 %v1627_v28  ;;  %v7587_v28 = vld [vmem:[%s9136_s3 + $0x68] sm:$0xff] }
 0x297   : > { %v5900_v33 = vpop.eup %5899 }
 0x298   : > { %v1635_v14 = vmul.f32 %v5900_v33, %v1603_v23  ;;  %v1636_v42 = vmul.f32 %v5900_v33, %v1604_v29  ;;  %v1634_v3 = vmul.f32 %v5900_v33, %v1602_v13  ;;  %v1633_v1 = vmul.f32 %v5900_v33, %v1601_v27  ;;  %v1714_v13 = vpop.permute.xlu1 %1713 }
 0x299   : > { %v1632_v6 = vmul.f32 %v5900_v33, %v1600_v63  ;;  %v1631_v36 = vmul.f32 %v5900_v33, %v7481_v31  ;;  %v1630_v57 = vmul.f32 %v5900_v33, %v7475_v46  ;;  %v1629_v27 = vmul.f32 %v5900_v33, %v7472_v43  ;;  %v1648_v63 = vpop.permute.xlu0 %1647  ;;  %v1750_v43 = vld [vmem:[%s9044_s6 + $0x8] sm:$0xff]  ;;  %v7629_v33 = vld [vmem:[%s9136_s3 + $0x38] sm:$0xff] }
 0x29a   : > { %v1691_v34 = vmul.f32 %v1678_v56, %v1635_v14  ;;  %v1692_v30 = vmul.f32 %v1683_v59, %v1636_v42  ;;  %v1690_v16 = vmul.f32 %v1673_v20, %v1634_v3  ;;  %v1689_v9 = vmul.f32 %v1668_v38, %v1633_v1  ;;  %v1759_v56 = vld [vmem:[%s9044_s6 + $0x50] sm:$0xff]  ;;  %v1761_v59 = vld [vmem:[%s9044_s6 + $0x60] sm:$0xff]  ;;  %v7575_v20 = vld [vmem:[%s9136_s3 + $0x78] sm:$0xff] }
 0x29b   : > { %v1688_v41 = vmul.f32 %v1663_v50, %v1632_v6  ;;  %v1687_v21 = vmul.f32 %v1658_v51, %v1631_v36  ;;  %v1686_v2 = vmul.f32 %v1653_v45, %v1630_v57  ;;  %v1685_v31 = vmul.f32 %v1648_v63, %v1629_v27  ;;  %v7601_v38 = vld [vmem:[%s9136_s3 + $0x58] sm:$0xff]  ;;  %v7615_v50 = vld [vmem:[%s9136_s3 + $0x48] sm:$0xff]  ;;  %v7636_v51 = vld [vmem:[%s9136_s3 + $0x30] sm:$0xff] }
 0x29c   : > { %v1748_v12 = vadd.f32 %v1739_v22, %v1692_v30  ;;  %v1747_v32 = vadd.f32 %v1734_v35, %v1691_v34  ;;  %v1746_v11 = vadd.f32 %v1729_v58, %v1690_v16  ;;  %v1745_v23 = vadd.f32 %v1724_v61, %v1689_v9  ;;  %v1709_v46 = vpop.permute.xlu1 %1708  ;;  %v1764_v22 = vld [vmem:[%s9044_s6 + $0x78] sm:$0xff]  ;;  %v7594_v35 = vld [vmem:[%s9136_s3 + $0x60] sm:$0xff]  ;;  %v7608_v58 = vld [vmem:[%s9136_s3 + $0x50] sm:$0xff] }
 0x29d   : > { %v1744_v15 = vadd.f32 %v1719_v60, %v1688_v41  ;;  %v1743_v29 = vadd.f32 %v1714_v13, %v1687_v21  ;;  %v1742_v7 = vadd.f32 %v1709_v46, %v1686_v2  ;;  %v1704_v8 = vpop.permute.xlu0 %1703  ;;  %v7622_v61 = vld [vmem:[%s9136_s3 + $0x40] sm:$0xff]  ;;  %v7643_v14 = vld [vmem:[%s9136_s3 + $0x28] sm:$0xff] }
 0x29e   : > { %5339 = vmatprep.subr.mxu0 %v1748_v12  ;;  %v1741_v0 = vadd.f32 %v1704_v8, %v1685_v31  ;;  %v7650_v42 = vld [vmem:[%s9136_s3 + $0x20] sm:$0xff] }
 0x29f   : > { %5340 = vmatpush3.msra.mxu0 %v1748_v12 }
 0x2a0   : > { %5341 = vmatprep.subr.mxu0 %v1747_v32  ;;  %v1859_v1 = vpop.permute.xlu1 %1858 }
 0x2a1   : > { %5342 = vmatpush3.msra.mxu0 %v1747_v32  ;;  %v1854_v12 = vpop.permute.xlu0 %1853 }
 0x2a2   : > { %5343 = vmatprep.subr.mxu0 %v1746_v11 }
 0x2a3   : > { %5344 = vmatpush3.msra.mxu0 %v1746_v11 }
 0x2a4   : > { %5345 = vmatprep.subr.mxu0 %v1745_v23  ;;  %v1849_v45 = vpop.permute.xlu1 %1848 }
 0x2a5   : > { %5346 = vmatpush3.msra.mxu0 %v1745_v23  ;;  %v1844_v9 = vpop.permute.xlu0 %1843 }
 0x2a6   : > { %5347 = vmatprep.subr.mxu0 %v1744_v15 }
 0x2a7   : > { %5348 = vmatpush3.msra.mxu0 %v1744_v15 }
 0x2a8   : > { %5349 = vmatprep.subr.mxu0 %v1743_v29  ;;  %v1839_v11 = vpop.permute.xlu1 %1838 }
 0x2a9   : > { %5350 = vmatpush3.msra.mxu0 %v1743_v29  ;;  %v1834_v13 = vpop.permute.xlu0 %1833 }
 0x2aa   : > { %5351 = vmatprep.subr.mxu0 %v1742_v7 }
 0x2ab   : > { %5352 = vmatpush3.msra.mxu0 %v1742_v7 }
 0x2ac   : > { %5353 = vmatprep.subr.mxu0 %v1741_v0  ;;  %v1829_v21 = vpop.permute.xlu1 %1828 }
 0x2ad   : > { %5354 = vmatpush3.msra.mxu0 %v1741_v0  ;;  %v1824_v2 = vpop.permute.xlu0 %1823 }
 0x2ae   : > { %5356 = vmatmul.mubr.msk.f32.vlgmr.msra.gmra.mxu0 %vm1548_vm0, %v1750_v43  ;;  %5423 = vmatprep.subr.mxu0 %v7575_v20 }
 0x2af   : > { %5358 = vmatprep.mubr.msk.f32.mxu0 %vm1548_vm0, %v1751_v62  ;;  %5424 = vmatpush3.msra.mxu0 %v7575_v20 }
 0x2b0   : > { %5425 = vmatprep.subr.mxu0 %v7580_v26  ;;  %v1819_v8 = vpop.permute.xlu1 %1818 }
 0x2b1   : > { %5426 = vmatpush3.msra.mxu0 %v7580_v26 }
 0x2b2   : > { %5359 = vmatmul.mubr.msk.f32.gmra.mxu0 %vm1548_vm0, %v1752_v5  ;;  %5427 = vmatprep.subr.mxu0 %v7587_v28 }
 0x2b3   : > { %5361 = vmatprep.mubr.msk.f32.mxu0 %vm1548_vm0, %v1753_v47  ;;  %5428 = vmatpush3.msra.mxu0 %v7587_v28  ;;  %v1814_v47 = vpop.permute.xlu0 %1813 }
 0x2b4   : > { %5429 = vmatprep.subr.mxu0 %v7594_v35 }
 0x2b5   : > { %5430 = vmatpush3.msra.mxu0 %v7594_v35 }
 0x2b6   : > { %5362 = vmatmul.mubr.msk.f32.gmra.mxu0 %vm1548_vm0, %v1754_v24  ;;  %5431 = vmatprep.subr.mxu0 %v7601_v38 }
 0x2b7   : > { %5364 = vmatprep.mubr.msk.f32.mxu0 %vm1548_vm0, %v1755_v39  ;;  %5432 = vmatpush3.msra.mxu0 %v7601_v38 }
 0x2b8   : > { %5433 = vmatprep.subr.mxu0 %v7608_v58 }
 0x2b9   : > { %5434 = vmatpush3.msra.mxu0 %v7608_v58 }
 0x2ba   : > { %5365 = vmatmul.mubr.msk.f32.gmra.mxu0 %vm1548_vm0, %v1756_v52  ;;  %5435 = vmatprep.subr.mxu0 %v7615_v50 }
 0x2bb   : > { %5367 = vmatprep.mubr.msk.f32.mxu0 %vm1548_vm0, %v1757_v19  ;;  %5436 = vmatpush3.msra.mxu0 %v7615_v50 }
 0x2bc   : > { %5437 = vmatprep.subr.mxu0 %v7622_v61 }
 0x2bd   : > { %5438 = vmatpush3.msra.mxu0 %v7622_v61 }
 0x2be   : > { %5368 = vmatmul.mubr.msk.f32.gmra.mxu0 %vm1548_vm0, %v1758_v40  ;;  %5439 = vmatprep.subr.mxu0 %v7629_v33 }
 0x2bf   : > { %5370 = vmatprep.mubr.msk.f32.mxu0 %vm1548_vm0, %v1759_v56  ;;  %5440 = vmatpush3.msra.mxu0 %v7629_v33 }
 0x2c0   : > { %5441 = vmatprep.subr.mxu0 %v7636_v51 }
 0x2c1   : > { %5442 = vmatpush3.msra.mxu0 %v7636_v51 }
 0x2c2   : > { %5371 = vmatmul.mubr.msk.f32.gmra.mxu0 %vm1548_vm0, %v1760_v53  ;;  %5443 = vmatprep.subr.mxu0 %v7643_v14  ;;  %v1809_v53 = vpop.permute.xlu1 %1808 }
 0x2c3   : > { %5373 = vmatprep.mubr.msk.f32.mxu0 %vm1548_vm0, %v1761_v59  ;;  %5444 = vmatpush3.msra.mxu0 %v7643_v14 }
 0x2c4   : > { %5445 = vmatprep.subr.mxu0 %v7650_v42 }
 0x2c5   : > { %5446 = vmatpush3.msra.mxu0 %v7650_v42 }
 0x2c6   : > { %5374 = vmatmul.mubr.msk.f32.gmra.mxu0 %vm1548_vm0, %v1762_v10 }
 0x2c7   : > { %5376 = vmatprep.mubr.msk.f32.mxu0 %vm1548_vm0, %v1763_v54  ;;  %v1804_v54 = vpop.permute.xlu0 %1803 }
 0x2ca   : > { %5377 = vmatmul.mubr.msk.f32.gmra.mxu0 %vm1548_vm0, %v1764_v22 }
 0x36e   : > { %v7656_v3 = vpop.f32.mrf.mxu0 }
 0x370   : > { %v7658_v34 = vpop.f32.mrf.mxu0 }
 0x372   : > { %v5360_v30 = vpop.f32.mrf.mxu0 }
 0x374   : > { %v1985_v60 = vpop.f32.mrf.mxu0 }
 0x376   : > { %v5363_v16 = vpop.f32.mrf.mxu0 }
 0x378   : > { %v1995_v6 = vpop.f32.mrf.mxu0 }
 0x37a   : > { %v5366_v32 = vpop.f32.mrf.mxu0 }
 0x37b   : > { %v7676_v22 = vadd.f32 %v5366_v32, %v1819_v8 }
 0x37c   : > { %v2005_v36 = vpop.f32.mrf.mxu0 }
 0x37e   : > { %v5369_v57 = vpop.f32.mrf.mxu0 }
 0x37f   : > { %v7670_v19 = vadd.f32 %v5369_v57, %v1829_v21  ;;  %v2077_v57 = vmul.f32 0.70710677, %v7676_v22 }
 0x380   : > { %v2015_v41 = vpop.f32.mrf.mxu0 }
 0x381   : > { %v7673_v59 = vadd.f32 %v2015_v41, %v1824_v2  ;;  %v2079_v44 = vmul.f32 0.70710677, %v7670_v19  ;;  %v7685_v41 = vadd.f32 %v1995_v6, %v1804_v54 }
 0x382   : > { %v5372_v27 = vpop.f32.mrf.mxu0 }
 0x383   : > { %v7665_v0 = vadd.f32 %v5372_v27, %v1839_v11  ;;  %v1794_v11 = vpop.permute.xlu0 %1793  ;;  %v2074_v2 = vmul.f32 0.70710677, %v7685_v41 }
 0x384   : > { %v2025_v23 = vpop.f32.mrf.mxu0  ;;  %v7691_v21 = vadd.f32 %v1985_v60, %v1794_v11 }
 0x385   : > { %v7668_v24 = vadd.f32 %v2025_v23, %v1834_v13  ;;  %v2081_v40 = vmul.f32 0.70710677, %v7665_v0 }
 0x386   : > { %v5375_v63 = vpop.f32.mrf.mxu0 }
 0x387   : > { %v7660_v15 = vadd.f32 %v5375_v63, %v1849_v45  ;;  %v2080_v10 = vmul.f32 0.70710677, %v7668_v24  ;;  %v7682_v45 = vadd.f32 %v5363_v16, %v1809_v53  ;;  %v1784_v8 = vpop.permute.xlu0 %1783 }
 0x388   : > { %v2035_v31 = vpop.f32.mrf.mxu0 }
 0x389   : > { %v7662_v29 = vadd.f32 %v2035_v31, %v1844_v9  ;;  %v2083_v46 = vmul.f32 0.70710677, %v7660_v15  ;;  %v1799_v9 = vpop.permute.xlu1 %1798 }
 0x38a   : > { %v5378_v7 = vpop.f32.mrf.mxu0  ;;  %v7688_v13 = vadd.f32 %v5360_v30, %v1799_v9 }
 0x38b   : > { %v2051_v43 = vadd.f32 %v5378_v7, %v1859_v1  ;;  %v2082_v62 = vmul.f32 0.70710677, %v7662_v29  ;;  %5901 = verf.f32 %v2083_v46  ;;  %v7679_v1 = vadd.f32 %v2005_v36, %v1814_v47 }
 0x38c   : > { %v2045_v5 = vpop.f32.mrf.mxu0  ;;  %v2075_v36 = vmul.f32 0.70710677, %v7682_v45  ;;  %v2073_v30 = vmul.f32 0.70710677, %v7688_v13 }
 0x38d   : > { %v2085_v39 = vmul.f32 0.70710677, %v2051_v43  ;;  %v2046_v52 = vadd.f32 %v2045_v5, %v1854_v12  ;;  %v2078_v12 = vmul.f32 0.70710677, %v7673_v59  ;;  %v2076_v32 = vmul.f32 0.70710677, %v7679_v1  ;;  %v1789_v63 = vpop.permute.xlu1 %1788 }
 0x38e   : > { %v2069_v31 = vmul.f32 0.5, %v2051_v43  ;;  %v7695_v7 = vadd.f32 %v7656_v3, %v1789_v63  ;;  %v2067_v43 = vmul.f32 0.5, %v7660_v15  ;;  %v2065_v15 = vmul.f32 0.5, %v7665_v0 }
 0x38f   : > { %5903 = verf.f32 %v2085_v39  ;;  %v2084_v56 = vmul.f32 0.70710677, %v2046_v52 }
 0x390   : > { %5905 = verf.f32 %v2082_v62  ;;  %v2068_v62 = vmul.f32 0.5, %v2046_v52  ;;  %v2071_v54 = vmul.f32 0.70710677, %v7695_v7  ;;  %v2066_v52 = vmul.f32 0.5, %v7662_v29 }
 0x391   : > { %5907 = verf.f32 %v2084_v56  ;;  %v2072_v56 = vmul.f32 0.70710677, %v7691_v21 }
 0x392   : > { %5909 = verf.f32 %v2081_v40  ;;  %v7699_v40 = vadd.f32 %v7658_v34, %v1784_v8 }
 0x393   : > { %5911 = verf.f32 %v2080_v10 }
 0x394   : > { %5913 = verf.f32 %v2079_v44  ;;  %v2070_v9 = vmul.f32 0.70710677, %v7699_v40 }
 0x395   : > { %5915 = verf.f32 %v2078_v12 }
 0x396   : > { %5917 = verf.f32 %v2077_v57 }
 0x397   : > { %5919 = verf.f32 %v2076_v32 }
 0x398   : > { %v5902_v27 = vpop.eup %5901  ;;  %5921 = verf.f32 %v2075_v36  ;;  %v2064_v36 = vmul.f32 0.5, %v7668_v24  ;;  %v2061_v24 = vmul.f32 0.5, %v7676_v22  ;;  %v2058_v22 = vmul.f32 0.5, %v7685_v41 }
 0x399   : > { %v2115_v60 = vadd.f32 1.0, %v5902_v27  ;;  %5923 = verf.f32 %v2074_v2  ;;  %v2055_v41 = vmul.f32 0.5, %v7695_v7  ;;  %v2136_v7 = vld [vmem:[%s9046_s8 + $0x10] sm:$0xff] }
 0x39a   : > { %5925 = verf.f32 %v2073_v30 }
 0x39b   : > { %v2131_v44 = vmul.f32 %v2115_v60, %v2067_v43  ;;  %5927 = verf.f32 %v2072_v56 }
 0x39c   : > { %v5904_v23 = vpop.eup %5903  ;;  %5929 = verf.f32 %v2071_v54 }
 0x39d   : > { %v5906_v16 = vpop.eup %5905  ;;  %v2117_v6 = vadd.f32 1.0, %v5904_v23  ;;  %5931 = verf.f32 %v2070_v9 }
 0x39e   : > { %v5908_v46 = vpop.eup %5907  ;;  %v2114_v53 = vadd.f32 1.0, %v5906_v16  ;;  %v2063_v16 = vmul.f32 0.5, %v7670_v19  ;;  %v2060_v19 = vmul.f32 0.5, %v7679_v1  ;;  %v2057_v1 = vmul.f32 0.5, %v7688_v13 }
 0x39f   : > { %v2133_v5 = vmul.f32 %v2117_v6, %v2069_v31  ;;  %v2116_v47 = vadd.f32 1.0, %v5908_v46  ;;  %v5910_v39 = vpop.eup %5909  ;;  %v2062_v6 = vmul.f32 0.5, %v7673_v59  ;;  %v2059_v59 = vmul.f32 0.5, %v7682_v45 }
 0x3a0   : > { %v5912_v10 = vpop.eup %5911  ;;  %v2113_v12 = vadd.f32 1.0, %v5910_v39  ;;  %v2130_v57 = vmul.f32 %v2114_v53, %v2066_v52  ;;  %v2056_v45 = vmul.f32 0.5, %v7691_v21  ;;  %v2135_v21 = vld [vmem:[%s9046_s8 + $0x8] sm:$0xff] }
 0x3a1   : > { %5379 = vmatprep.subr.mxu1 %v2133_v5  ;;  %v2132_v3 = vmul.f32 %v2116_v47, %v2068_v62  ;;  %v5914_v34 = vpop.eup %5913  ;;  %v2112_v11 = vadd.f32 1.0, %v5912_v10 }
 0x3a2   : > { %5380 = vmatpush3.msra.mxu1 %v2133_v5  ;;  %v5916_v32 = vpop.eup %5915  ;;  %v2129_v29 = vmul.f32 %v2113_v12, %v2065_v15  ;;  %v2111_v27 = vadd.f32 1.0, %v5914_v34 }
 0x3a3   : > { %5381 = vmatprep.subr.mxu1 %v2132_v3  ;;  %v5918_v23 = vpop.eup %5917  ;;  %v2128_v63 = vmul.f32 %v2112_v11, %v2064_v36  ;;  %v2110_v2 = vadd.f32 1.0, %v5916_v32  ;;  %v2054_v11 = vmul.f32 0.5, %v7699_v40  ;;  %v2137_v40 = vld [vmem:[%s9046_s8 + $0x18] sm:$0xff]  ;;  %v2138_v36 = vld [vmem:[%s9046_s8 + $0x20] sm:$0xff] }
 0x3a4   : > { %5382 = vmatpush3.msra.mxu1 %v2132_v3  ;;  %v5920_v0 = vpop.eup %5919  ;;  %v2127_v46 = vmul.f32 %v2111_v27, %v2063_v16  ;;  %v2109_v30 = vadd.f32 1.0, %v5918_v23 }
 0x3a5   : > { %5383 = vmatprep.subr.mxu1 %v2131_v44  ;;  %v5922_v31 = vpop.eup %5921  ;;  %v2126_v8 = vmul.f32 %v2110_v2, %v2062_v6  ;;  %v2108_v62 = vadd.f32 1.0, %v5920_v0 }
 0x3a6   : > { %5384 = vmatpush3.msra.mxu1 %v2131_v44  ;;  %v5924_v5 = vpop.eup %5923  ;;  %v2125_v47 = vmul.f32 %v2109_v30, %v2061_v24  ;;  %v2107_v60 = vadd.f32 1.0, %v5922_v31 }
 0x3a7   : > { %5385 = vmatprep.subr.mxu1 %v2130_v57  ;;  %v5926_v39 = vpop.eup %5925  ;;  %v2124_v56 = vmul.f32 %v2108_v62, %v2060_v19  ;;  %v2106_v43 = vadd.f32 1.0, %v5924_v5 }
 0x3a8   : > { %5386 = vmatpush3.msra.mxu1 %v2130_v57  ;;  %v5928_v3 = vpop.eup %5927  ;;  %v2123_v53 = vmul.f32 %v2107_v60, %v2059_v59  ;;  %v2105_v10 = vadd.f32 1.0, %v5926_v39 }
 0x3a9   : > { %5387 = vmatprep.subr.mxu1 %v2129_v29  ;;  %v5930_v54 = vpop.eup %5929  ;;  %v2122_v52 = vmul.f32 %v2106_v43, %v2058_v22  ;;  %v2104_v44 = vadd.f32 1.0, %v5928_v3  ;;  %v2602_v22 = vld [vmem:[%s9050_s12 + $0xd8] sm:$0xff] }
 0x3aa   : > { %5388 = vmatpush3.msra.mxu1 %v2129_v29  ;;  %v5932_v12 = vpop.eup %5931  ;;  %v2121_v34 = vmul.f32 %v2105_v10, %v2057_v1  ;;  %v2103_v9 = vadd.f32 1.0, %v5930_v54  ;;  %v2139_v29 = vld [vmem:[%s9046_s8 + $0x28] sm:$0xff] }
 0x3ab   : > { %5389 = vmatprep.subr.mxu1 %v2128_v63  ;;  %v2120_v15 = vmul.f32 %v2104_v44, %v2056_v45  ;;  %v2102_v57 = vadd.f32 1.0, %v5932_v12  ;;  %v2600_v10 = vld [vmem:[%s9050_s12 + $0xc8] sm:$0xff] }
 0x3ac   : > { %5390 = vmatpush3.msra.mxu1 %v2128_v63  ;;  %v2119_v13 = vmul.f32 %v2103_v9, %v2055_v41 }
 0x3ad   : > { %5391 = vmatprep.subr.mxu1 %v2127_v46  ;;  %v2118_v32 = vmul.f32 %v2102_v57, %v2054_v11 }
 0x3ae   : > { %5392 = vmatpush3.msra.mxu1 %v2127_v46 }
 0x3af   : > { %5393 = vmatprep.subr.mxu1 %v2126_v8 }
 0x3b0   : > { %5394 = vmatpush3.msra.mxu1 %v2126_v8 }
 0x3b1   : > { %5395 = vmatprep.subr.mxu1 %v2125_v47 }
 0x3b2   : > { %5396 = vmatpush3.msra.mxu1 %v2125_v47 }
 0x3b3   : > { %5397 = vmatprep.subr.mxu1 %v2124_v56 }
 0x3b4   : > { %5398 = vmatpush3.msra.mxu1 %v2124_v56 }
 0x3b5   : > { %5399 = vmatprep.subr.mxu1 %v2123_v53 }
 0x3b6   : > { %5400 = vmatpush3.msra.mxu1 %v2123_v53  ;;  %v2601_v53 = vld [vmem:[%s9050_s12 + $0xd0] sm:$0xff] }
 0x3b7   : > { %5401 = vmatprep.subr.mxu1 %v2122_v52 }
 0x3b8   : > { %5402 = vmatpush3.msra.mxu1 %v2122_v52 }
 0x3b9   : > { %5403 = vmatprep.subr.mxu1 %v2121_v34 }
 0x3ba   : > { %5404 = vmatpush3.msra.mxu1 %v2121_v34 }
 0x3bb   : > { %5405 = vmatprep.subr.mxu1 %v2120_v15 }
 0x3bc   : > { %5406 = vmatpush3.msra.mxu1 %v2120_v15 }
 0x3bd   : > { %5407 = vmatprep.subr.mxu1 %v2119_v13 }
 0x3be   : > { %5408 = vmatpush3.msra.mxu1 %v2119_v13 }
 0x3bf   : > { %5409 = vmatprep.subr.mxu1 %v2118_v32 }
 0x3c0   : > { %5410 = vmatpush3.msra.mxu1 %v2118_v32 }
 0x3c1   : > { %5412 = vmatmul.mubr.f32.vlgmr.msra.gmra.mxu1 %v2135_v21  ;;  %5467 = vmatprep.subr.mxu1 %v7575_v20 }
 0x3c2   : > { %5414 = vmatprep.mubr.f32.mxu1 %v2136_v7  ;;  %5468 = vmatpush3.msra.mxu1 %v7575_v20  ;;  %v2140_v20 = vld [vmem:[%s9046_s8 + $0x30] sm:$0xff] }
 0x3c3   : > { %5469 = vmatprep.subr.mxu1 %v7580_v26 }
 0x3c4   : > { %5470 = vmatpush3.msra.mxu1 %v7580_v26  ;;  %v2141_v26 = vld [vmem:[%s9046_s8 + $0x38] sm:$0xff] }
 0x3c5   : > { %5415 = vmatmul.mubr.f32.gmra.mxu1 %v2137_v40  ;;  %5471 = vmatprep.subr.mxu1 %v7587_v28 }
 0x3c6   : > { %5417 = vmatprep.mubr.f32.mxu1 %v2138_v36  ;;  %5472 = vmatpush3.msra.mxu1 %v7587_v28  ;;  %v1569_v28 = vld [vmem:[%s9136_s3 + $0x18] sm:$0xff] }
 0x3c7   : > { %5473 = vmatprep.subr.mxu1 %v7594_v35  ;;  %5447 = vmatprep.subr.mxu0 %v1569_v28 }
 0x3c8   : > { %5474 = vmatpush3.msra.mxu1 %v7594_v35  ;;  %5448 = vmatpush3.msra.mxu0 %v1569_v28  ;;  %v1568_v35 = vld [vmem:[%s9136_s3 + $0x10] sm:$0xff] }
 0x3c9   : > { %5418 = vmatmul.mubr.f32.gmra.mxu1 %v2139_v29  ;;  %5475 = vmatprep.subr.mxu1 %v7601_v38 }
 0x3ca   : > { %5420 = vmatprep.mubr.f32.mxu1 %v2140_v20  ;;  %5476 = vmatpush3.msra.mxu1 %v7601_v38  ;;  %v1567_v38 = vld [vmem:[%s9136_s3 + $0x8] sm:$0xff] }
 0x3cb   : > { %5477 = vmatprep.subr.mxu1 %v7608_v58  ;;  %5449 = vmatprep.subr.mxu0 %v1568_v35 }
 0x3cc   : > { %5478 = vmatpush3.msra.mxu1 %v7608_v58  ;;  %5450 = vmatpush3.msra.mxu0 %v1568_v35  ;;  %v1566_v58 = vld [vmem:[%s9136_s3] sm:$0xff] }
 0x3cd   : > { %5421 = vmatmul.mubr.f32.gmra.mxu1 %v2141_v26  ;;  %5479 = vmatprep.subr.mxu1 %v7615_v50 }
 0x3ce   : > { %5480 = vmatpush3.msra.mxu1 %v7615_v50  ;;  %5451 = vmatprep.subr.mxu0 %v1567_v38  ;;  %v2158_v50 = vpop.permute.xlu0 %2157 }
 0x3cf   : > { %5481 = vmatprep.subr.mxu1 %v7622_v61  ;;  %5452 = vmatpush3.msra.mxu0 %v1567_v38 }
 0x3d0   : > { %5482 = vmatpush3.msra.mxu1 %v7622_v61  ;;  %5453 = vmatprep.subr.mxu0 %v1566_v58  ;;  %v2153_v61 = vpop.permute.xlu1 %2152 }
 0x3d1   : > { %5483 = vmatprep.subr.mxu1 %v7629_v33  ;;  %5454 = vmatpush3.msra.mxu0 %v1566_v58 }
 0x3d2   : > { %5484 = vmatpush3.msra.mxu1 %v7629_v33 }
 0x3d3   : > { %5485 = vmatprep.subr.mxu1 %v7636_v51 }
 0x3d4   : > { %5486 = vmatpush3.msra.mxu1 %v7636_v51  ;;  %v2168_v51 = vpop.permute.xlu0 %2167 }
 0x3d5   : > { %5487 = vmatprep.subr.mxu1 %v7643_v14 }
 0x3d6   : > { %5488 = vmatpush3.msra.mxu1 %v7643_v14  ;;  %v2163_v14 = vpop.permute.xlu1 %2162 }
 0x3d7   : > { %5489 = vmatprep.subr.mxu1 %v7650_v42 }
 0x3d8   : > { %5490 = vmatpush3.msra.mxu1 %v7650_v42  ;;  %v2178_v6 = vpop.permute.xlu0 %2177 }
 0x3d9   : > { %5491 = vmatprep.subr.mxu1 %v1569_v28 }
 0x3da   : > { %5492 = vmatpush3.msra.mxu1 %v1569_v28  ;;  %v2173_v30 = vpop.permute.xlu1 %2172 }
 0x3db   : > { %5493 = vmatprep.subr.mxu1 %v1568_v35 }
 0x3dc   : > { %5494 = vmatpush3.msra.mxu1 %v1568_v35  ;;  %v2188_v47 = vpop.permute.xlu0 %2187 }
 0x3dd   : > { %5495 = vmatprep.subr.mxu1 %v1567_v38 }
 0x3de   : > { %5496 = vmatpush3.msra.mxu1 %v1567_v38  ;;  %v2183_v39 = vpop.permute.xlu1 %2182 }
 0x3df   : > { %5497 = vmatprep.subr.mxu1 %v1566_v58 }
 0x3e0   : > { %5498 = vmatpush3.msra.mxu1 %v1566_v58  ;;  %v2599_v58 = vld [vmem:[%s9050_s12 + $0xc0] sm:$0xff] }
 0x481   : > { %v5413_v33 = vpop.f32.mrf.mxu1 }
 0x482   : > { %v2262_v42 = vadd.f32 %v5413_v33, %v2158_v50  ;;  %v2598_v50 = vld [vmem:[%s9050_s12 + $0xb8] sm:$0xff]  ;;  %v2596_v33 = vld [vmem:[%s9050_s12 + $0xa8] sm:$0xff] }
 0x483   : > { %v2256_v27 = vpop.f32.mrf.mxu1 }
 0x484   : > { %v2257_v23 = vadd.f32 %v2256_v27, %v2153_v61  ;;  %v7779_v2 = vadd.f32 %v2262_v42, %v7367_v48  ;;  %v2597_v61 = vld [vmem:[%s9050_s12 + $0xb0] sm:$0xff]  ;;  %v2592_v27 = vld [vmem:[%s9050_s12 + $0x88] sm:$0xff] }
 0x485   : > { %v5416_v16 = vpop.f32.mrf.mxu1  ;;  %v2593_v42 = vld [vmem:[%s9050_s12 + $0x90] sm:$0xff] }
 0x486   : > { %v7776_v63 = vadd.f32 %v2257_v23, %v7380_v25  ;;  %v2272_v0 = vadd.f32 %v5416_v16, %v2168_v51  ;;  %v2595_v51 = vld [vmem:[%s9050_s12 + $0xa0] sm:$0xff]  ;;  %v2590_v16 = vld [vmem:[%s9050_s12 + $0x78] sm:$0xff] }
 0x487   : > { %v2266_v31 = vpop.f32.mrf.mxu1  ;;  %v2591_v23 = vld [vmem:[%s9050_s12 + $0x80] sm:$0xff] }
 0x488   : > { %v2267_v46 = vadd.f32 %v2266_v31, %v2163_v14  ;;  %5455 = vmatprep.mubr.f32.mxu0 %v7776_v63  ;;  %v7787_v62 = vadd.f32 %v2272_v0, %v7408_v18  ;;  %v2594_v14 = vld [vmem:[%s9050_s12 + $0x98] sm:$0xff]  ;;  %v2589_v0 = vld [vmem:[%s9050_s12 + $0x70] sm:$0xff]  ;;  %v2588_v31 = vld [vmem:[%s9050_s12 + $0x68] sm:$0xff] }
 0x489   : > { %v5419_v24 = vpop.f32.mrf.mxu1  ;;  %5456 = vmatmul.mubr.f32.vlgmr.msra.gmra.mxu0 %v7779_v2 }
 0x48a   : > { %v7784_v8 = vadd.f32 %v2267_v46, %v7384_v17  ;;  %v2282_v25 = vadd.f32 %v5419_v24, %v2178_v6  ;;  %v2587_v6 = vld [vmem:[%s9050_s12 + $0x60] sm:$0xff]  ;;  %v2586_v46 = vld [vmem:[%s9050_s12 + $0x58] sm:$0xff]  ;;  %v2584_v24 = vld [vmem:[%s9050_s12 + $0x48] sm:$0xff] }
 0x48b   : > { %v2276_v5 = vpop.f32.mrf.mxu1 }
 0x48c   : > { %v2277_v48 = vadd.f32 %v2276_v5, %v2173_v30  ;;  %5458 = vmatprep.mubr.f32.mxu0 %v7784_v8  ;;  %v7795_v59 = vadd.f32 %v2282_v25, %v7431_v55  ;;  %v2605_v55 = vld [vmem:[%s9050_s12 + $0xf0] sm:$0xff]  ;;  %v2583_v25 = vld [vmem:[%s9050_s12 + $0x40] sm:$0xff]  ;;  %v2582_v5 = vld [vmem:[%s9050_s12 + $0x38] sm:$0xff] }
 0x48d   : > { %v5422_v19 = vpop.f32.mrf.mxu1  ;;  %5459 = vmatmul.mubr.f32.gmra.mxu0 %v7787_v62  ;;  %v2585_v30 = vld [vmem:[%s9050_s12 + $0x50] sm:$0xff] }
 0x48e   : > { %v7792_v60 = vadd.f32 %v2277_v48, %v7411_v49  ;;  %v2292_v17 = vadd.f32 %v5422_v19, %v2188_v47  ;;  %v2606_v49 = vld [vmem:[%s9050_s12 + $0xf8] sm:$0xff]  ;;  %v2581_v48 = vld [vmem:[%s9050_s12 + $0x30] sm:$0xff]  ;;  %v2580_v19 = vld [vmem:[%s9050_s12 + $0x28] sm:$0xff] }
 0x48f   : > { %v2286_v56 = vpop.f32.mrf.mxu1  ;;  %2619 = vmatprep.subr.mxu0 %v2606_v49  ;;  %v2579_v47 = vld [vmem:[%s9050_s12 + $0x20] sm:$0xff] }
 0x490   : > { %v2287_v18 = vadd.f32 %v2286_v56, %v2183_v39  ;;  %5461 = vmatprep.mubr.f32.mxu0 %v7792_v60  ;;  %v7803_v3 = vadd.f32 %v2292_v17, %v7447_v4  ;;  %v2603_v4 = vld [vmem:[%s9050_s12 + $0xe0] sm:$0xff]  ;;  %2620 = vmatpush1.msra.mxu0 %v2605_v55  ;;  %v2578_v39 = vld [vmem:[%s9050_s12 + $0x18] sm:$0xff]  ;;  %v2577_v17 = vld [vmem:[%s9050_s12 + $0x10] sm:$0xff]  ;;  %v6185_v56 = vmov 0.0  }
 0x491   : > { %5462 = vmatmul.mubr.f32.gmra.mxu0 %v7795_v59  ;;  %v2575_v49 = vld [vmem:[%s9050_s12] sm:$0xff]  ;;  %v2843_v55 = vld [vmem:[%s9052_s14 + $0xf8] sm:$0xff] }
 0x492   : > { %v7800_v43 = vadd.f32 %v2287_v18, %v7434_v37  ;;  %v2604_v37 = vld [vmem:[%s9050_s12 + $0xe8] sm:$0xff]  ;;  %5083 = vmatprep.subr.mxu1 %v2843_v55 }
 0x493   : > { %2621 = vmatprep.subr.mxu0 %v2604_v37  ;;  %v2576_v18 = vld [vmem:[%s9050_s12 + $0x8] sm:$0xff]  ;;  %v2827_v37 = vld [vmem:[%s9052_s14 + $0x78] sm:$0xff] }
 0x494   : > { %5464 = vmatprep.mubr.f32.mxu0 %v7800_v43  ;;  %2622 = vmatpush1.msra.mxu0 %v2603_v4  ;;  %v2842_v4 = vld [vmem:[%s9052_s14 + $0xf0] sm:$0xff] }
 0x495   : > { %5465 = vmatmul.mubr.f32.gmra.mxu0 %v7803_v3  ;;  %2623 = vmatprep.subr.mxu0 %v2602_v22  ;;  %v2826_v22 = vld [vmem:[%s9052_s14 + $0x70] sm:$0xff] }
 0x496   : > { %2624 = vmatpush1.msra.mxu0 %v2601_v53  ;;  %2683 = vmatprep.mubr.f32.mxu0 %v6185_v56  ;;  %v2841_v53 = vld [vmem:[%s9052_s14 + $0xe8] sm:$0xff] }
 0x497   : > { %2625 = vmatprep.subr.mxu0 %v2600_v10  ;;  %v2825_v10 = vld [vmem:[%s9052_s14 + $0x68] sm:$0xff] }
 0x498   : > { %2626 = vmatpush1.msra.mxu0 %v2599_v58 }
 0x499   : > { %2627 = vmatprep.subr.mxu0 %v2598_v50 }
 0x49a   : > { %2628 = vmatpush1.msra.mxu0 %v2597_v61 }
 0x49b   : > { %2629 = vmatprep.subr.mxu0 %v2596_v33  ;;  %v4810_v33 = vld [vmem:[%s9048_s10] ss:$0 sm:$0xff] }
 0x49c   : > { %2630 = vmatpush1.msra.mxu0 %v2595_v51 }
 0x49d   : > { %2631 = vmatprep.subr.mxu0 %v2594_v14 }
 0x49e   : > { %2632 = vmatpush1.msra.mxu0 %v2593_v42 }
 0x49f   : > { %2633 = vmatprep.subr.mxu0 %v2592_v27  ;;  %v4811_v27 = vld [vmem:[%s9049_s11] ss:$0 sm:$0xff] }
 0x4a0   : > { %2634 = vmatpush1.msra.mxu0 %v2591_v23 }
 0x4a1   : > { %2635 = vmatprep.subr.mxu0 %v2590_v16 }
 0x4a2   : > { %2636 = vmatpush1.msra.mxu0 %v2589_v0 }
 0x4a3   : > { %2637 = vmatprep.subr.mxu0 %v2588_v31 }
 0x4a4   : > { %2638 = vmatpush1.msra.mxu0 %v2587_v6 }
 0x4a5   : > { %2639 = vmatprep.subr.mxu0 %v2586_v46 }
 0x4a6   : > { %2640 = vmatpush1.msra.mxu0 %v2585_v30 }
 0x4a7   : > { %2641 = vmatprep.subr.mxu0 %v2584_v24 }
 0x4a8   : > { %2642 = vmatpush1.msra.mxu0 %v2583_v25 }
 0x4a9   : > { %2643 = vmatprep.subr.mxu0 %v2582_v5 }
 0x4aa   : > { %2644 = vmatpush1.msra.mxu0 %v2581_v48 }
 0x4ab   : > { %2645 = vmatprep.subr.mxu0 %v2580_v19 }
 0x4ac   : > { %2646 = vmatpush1.msra.mxu0 %v2579_v47 }
 0x4ad   : > { %2647 = vmatprep.subr.mxu0 %v2578_v39 }
 0x4ae   : > { %2648 = vmatpush1.msra.mxu0 %v2577_v17 }
 0x4af   : > { %2649 = vmatprep.subr.mxu0 %v2576_v18 }
 0x4b0   : > { %2650 = vmatpush1.msra.mxu0 %v2575_v49 }
 0x549   : > { %v5457_v54 = vpop.f32.mrf.mxu0 }
 0x54a   : > { %v7829_v1 = vsub.f32 %v7779_v2, %v5457_v54 }
 0x54b   : > { %v2369_v52 = vpop.f32.mrf.mxu0 }
 0x54c   : > { %v7832_v44 = vsub.f32 %v7776_v63, %v2369_v52  ;;  %v2417_v34 = vmul.f32 %v7829_v1, %v7829_v1 }
 0x54d   : > { %v5460_v12 = vpop.f32.mrf.mxu0 }
 0x54e   : > { %v2416_v45 = vmul.f32 %v7832_v44, %v7832_v44  ;;  %v7839_v9 = vsub.f32 %v7787_v62, %v5460_v12 }
 0x54f   : > { %v2379_v41 = vpop.f32.mrf.mxu0 }
 0x550   : > { %v7842_v15 = vsub.f32 %v7784_v8, %v2379_v41  ;;  %5499 = vmatprep.mubr.f32.mxu1 %v2416_v45  ;;  %v2419_v13 = vmul.f32 %v7839_v9, %v7839_v9 }
 0x551   : > { %v5463_v57 = vpop.f32.mrf.mxu0  ;;  %5500 = vmatmul.mubr.f32.vlgmr.msra.gmra.mxu1 %v2417_v34 }
 0x552   : > { %v2418_v11 = vmul.f32 %v7842_v15, %v7842_v15  ;;  %v7849_v32 = vsub.f32 %v7795_v59, %v5463_v57  ;;  %5084 = vmatpush3.msra.mxu1 %v2827_v37 }
 0x553   : > { %v2389_v21 = vpop.f32.mrf.mxu0  ;;  %5085 = vmatprep.subr.mxu1 %v2842_v4 }
 0x554   : > { %v7852_v7 = vsub.f32 %v7792_v60, %v2389_v21  ;;  %5502 = vmatprep.mubr.f32.mxu1 %v2418_v11  ;;  %v2421_v29 = vmul.f32 %v7849_v32, %v7849_v32  ;;  %5086 = vmatpush3.msra.mxu1 %v2826_v22  ;;  %v2824_v22 = vld [vmem:[%s9052_s14 + $0x60] sm:$0xff] }
 0x555   : > { %v5466_v40 = vpop.f32.mrf.mxu0  ;;  %5503 = vmatmul.mubr.f32.gmra.mxu1 %v2419_v13  ;;  %5087 = vmatprep.subr.mxu1 %v2841_v53  ;;  %v2823_v53 = vld [vmem:[%s9052_s14 + $0x58] sm:$0xff] }
 0x556   : > { %v2420_v36 = vmul.f32 %v7852_v7, %v7852_v7  ;;  %v7859_v20 = vsub.f32 %v7803_v3, %v5466_v40  ;;  %5088 = vmatpush3.msra.mxu1 %v2825_v10  ;;  %v2838_v10 = vld [vmem:[%s9052_s14 + $0xd0] sm:$0xff] }
 0x557   : > { %v2399_v26 = vpop.f32.mrf.mxu0 }
 0x558   : > { %v7862_v28 = vsub.f32 %v7800_v43, %v2399_v26  ;;  %5505 = vmatprep.mubr.f32.mxu1 %v2420_v36  ;;  %v2423_v38 = vmul.f32 %v7859_v20, %v7859_v20 }
 0x559   : > { %5506 = vmatmul.mubr.f32.gmra.mxu1 %v2421_v29 }
 0x55a   : > { %v2422_v35 = vmul.f32 %v7862_v28, %v7862_v28 }
 0x55c   : > { %5508 = vmatprep.mubr.f32.mxu1 %v2422_v35 }
 0x55d   : > { %5509 = vmatmul.mubr.f32.gmra.mxu1 %v2423_v38 }
 0x611   : > { %v5501_v54 = vpop.f32.mrf.mxu1 }
 0x612   : > { %v2496_v52 = vadd.f32 1e-05, %v5501_v54  ;;  %v2822_v54 = vld [vmem:[%s9052_s14 + $0x50] sm:$0xff] }
 0x613   : > { %v2490_v12 = vpop.f32.mrf.mxu1 }
 0x614   : > { %5933 = vrsqrt.f32 %v2496_v52  ;;  %v2491_v45 = vadd.f32 1e-05, %v2490_v12  ;;  %v2837_v52 = vld [vmem:[%s9052_s14 + $0xc8] sm:$0xff] }
 0x615   : > { %v5504_v34 = vpop.f32.mrf.mxu1  ;;  %v2821_v12 = vld [vmem:[%s9052_s14 + $0x48] sm:$0xff] }
 0x616   : > { %5935 = vrsqrt.f32 %v2491_v45  ;;  %v2506_v57 = vadd.f32 1e-05, %v5504_v34  ;;  %v2836_v45 = vld [vmem:[%s9052_s14 + $0xc0] sm:$0xff] }
 0x617   : > { %v2500_v41 = vpop.f32.mrf.mxu1  ;;  %v2820_v34 = vld [vmem:[%s9052_s14 + $0x40] sm:$0xff] }
 0x618   : > { %v2501_v11 = vadd.f32 1e-05, %v2500_v41  ;;  %v2835_v41 = vld [vmem:[%s9052_s14 + $0xb8] sm:$0xff] }
 0x619   : > { %v5507_v13 = vpop.f32.mrf.mxu1 }
 0x61a   : > { %5937 = vrsqrt.f32 %v2501_v11  ;;  %v2516_v29 = vadd.f32 1e-05, %v5507_v13  ;;  %v2834_v11 = vld [vmem:[%s9052_s14 + $0xb0] sm:$0xff] }
 0x61b   : > { %v2510_v21 = vpop.f32.mrf.mxu1  ;;  %5939 = vrsqrt.f32 %v2506_v57  ;;  %v2819_v57 = vld [vmem:[%s9052_s14 + $0x38] sm:$0xff]  ;;  %v2818_v13 = vld [vmem:[%s9052_s14 + $0x30] sm:$0xff] }
 0x61c   : > { %v2511_v40 = vadd.f32 1e-05, %v2510_v21  ;;  %v2833_v21 = vld [vmem:[%s9052_s14 + $0xa8] sm:$0xff] }
 0x61d   : > { %v5510_v36 = vpop.f32.mrf.mxu1 }
 0x61e   : > { %5941 = vrsqrt.f32 %v2511_v40  ;;  %v2526_v42 = vadd.f32 1e-05, %v5510_v36  ;;  %v2817_v40 = vld [vmem:[%s9052_s14 + $0x28] sm:$0xff]  ;;  %v2832_v36 = vld [vmem:[%s9052_s14 + $0xa0] sm:$0xff] }
 0x61f   : > { %v2520_v35 = vpop.f32.mrf.mxu1  ;;  %5943 = vrsqrt.f32 %v2516_v29  ;;  %v2816_v29 = vld [vmem:[%s9052_s14 + $0x20] sm:$0xff] }
 0x620   : > { %v2521_v50 = vadd.f32 1e-05, %v2520_v35  ;;  %v2815_v35 = vld [vmem:[%s9052_s14 + $0x18] sm:$0xff] }
 0x621   : > { %v5934_v26 = vpop.eup %5933 }
 0x622   : > { %v2538_v61 = vmul.f32 %v5934_v26, %v7829_v1  ;;  %5945 = vrsqrt.f32 %v2521_v50  ;;  %v2831_v26 = vld [vmem:[%s9052_s14 + $0x98] sm:$0xff]  ;;  %v2829_v50 = vld [vmem:[%s9052_s14 + $0x88] sm:$0xff] }
 0x623   : > { %v5936_v38 = vpop.eup %5935  ;;  %5947 = vrsqrt.f32 %v2526_v42 }
 0x624   : > { %v2537_v58 = vmul.f32 %v5936_v38, %v7832_v44  ;;  %v2553_v16 = vmul.f32 %v4810_v33, %v2538_v61  ;;  %v2830_v38 = vld [vmem:[%s9052_s14 + $0x90] sm:$0xff]  ;;  %v2813_v61 = vld [vmem:[%s9052_s14 + $0x8] sm:$0xff] }
 0x626   : > { %v2552_v51 = vmul.f32 %v4810_v33, %v2537_v58  ;;  %v2568_v1 = vadd.f32 %v4811_v27, %v2553_v16  ;;  %v2814_v58 = vld [vmem:[%s9052_s14 + $0x10] sm:$0xff] }
 0x627   : > { %v5938_v14 = vpop.eup %5937 }
 0x628   : > { %v2567_v23 = vadd.f32 %v4811_v27, %v2552_v51  ;;  %v2539_v44 = vmul.f32 %v5938_v14, %v7842_v15  ;;  %v5940_v0 = vpop.eup %5939  ;;  %v2812_v51 = vld [vmem:[%s9052_s14] sm:$0xff]  ;;  %v2609_v14 = vlaneseq }
 0x629   : > { %v2540_v6 = vmul.f32 %v5940_v0, %v7839_v9 }
 0x62a   : > { %2684 = vmatmul.mubr.f32.vlgmr.msra.gmra.mxu0 %v2567_v23  ;;  %v2554_v31 = vmul.f32 %v4810_v33, %v2539_v44  ;;  %v8061_v42 = vshrl.u32 %v2609_v14, 7  ;;  %v2607_v23 = vld [vmem:[%s9051_s13] sm:$0x3] }
 0x62b   : > { %2689 = vmatprep.mubr.f32.mxu0 %v6185_v56  ;;  %v5942_v46 = vpop.eup %5941  ;;  %v2555_v24 = vmul.f32 %v4810_v33, %v2540_v6 }
 0x62c   : > { %v2569_v30 = vadd.f32 %v4811_v27, %v2554_v31  ;;  %v2541_v25 = vmul.f32 %v5942_v46, %v7852_v7  ;;  %v5944_v5 = vpop.eup %5943  ;;  %v2615_v16 = vsub.s32 1, %v8061_v42 }
 0x62d   : > { %v2570_v15 = vadd.f32 %v4811_v27, %v2555_v24  ;;  %v2542_v19 = vmul.f32 %v5944_v5, %v7849_v32 }
 0x62e   : > { %2690 = vmatmul.mubr.f32.gmra.mxu0 %v2568_v1  ;;  %v2556_v48 = vmul.f32 %v4810_v33, %v2541_v25  ;;  %v8074_v0 = vrot.slane %v2607_v23, %v2615_v16 }
 0x62f   : > { %2695 = vmatprep.mubr.f32.mxu0 %v6185_v56  ;;  %v5946_v47 = vpop.eup %5945  ;;  %v2557_v39 = vmul.f32 %v4810_v33, %v2542_v19 }
 0x630   : > { %v2571_v9 = vadd.f32 %v4811_v27, %v2556_v48  ;;  %v2543_v17 = vmul.f32 %v5946_v47, %v7862_v28  ;;  %v5948_v18 = vpop.eup %5947  ;;  %v2840_v28 = vld [vmem:[%s9052_s14 + $0xe0] sm:$0xff] }
 0x631   : > { %v2572_v7 = vadd.f32 %v4811_v27, %v2557_v39  ;;  %v2544_v55 = vmul.f32 %v5948_v18, %v7859_v20  ;;  %5089 = vmatprep.subr.mxu1 %v2840_v28  ;;  %v2839_v20 = vld [vmem:[%s9052_s14 + $0xd8] sm:$0xff] }
 0x632   : > { %2696 = vmatmul.mubr.f32.gmra.mxu0 %v2569_v30  ;;  %v2558_v49 = vmul.f32 %v4810_v33, %v2543_v17  ;;  %5090 = vmatpush3.msra.mxu1 %v2824_v22 }
 0x633   : > { %2701 = vmatprep.mubr.f32.mxu0 %v6185_v56  ;;  %v2559_v37 = vmul.f32 %v4810_v33, %v2544_v55  ;;  %5091 = vmatprep.subr.mxu1 %v2839_v20  ;;  %v2828_v33 = vld [vmem:[%s9052_s14 + $0x80] sm:$0xff] }
 0x634   : > { %v2573_v32 = vadd.f32 %v4811_v27, %v2558_v49  ;;  %5092 = vmatpush3.msra.mxu1 %v2823_v53 }
 0x635   : > { %v2574_v4 = vadd.f32 %v4811_v27, %v2559_v37  ;;  %5093 = vmatprep.subr.mxu1 %v2838_v10  ;;  %v2611_v27 = vsub.s32 0, %v8061_v42 }
 0x636   : > { %2702 = vmatmul.mubr.f32.gmra.mxu0 %v2570_v15  ;;  %5094 = vmatpush3.msra.mxu1 %v2822_v54 }
 0x637   : > { %2707 = vmatprep.mubr.f32.mxu0 %v6185_v56  ;;  %5095 = vmatprep.subr.mxu1 %v2837_v52  ;;  %v8070_v44 = vrot.slane %v2607_v23, %v2611_v27 }
 0x638   : > { %5096 = vmatpush3.msra.mxu1 %v2821_v12 }
 0x639   : > { %5097 = vmatprep.subr.mxu1 %v2836_v45 }
 0x63a   : > { %2708 = vmatmul.mubr.f32.gmra.mxu0 %v2571_v9  ;;  %5098 = vmatpush3.msra.mxu1 %v2820_v34 }
 0x63b   : > { %2713 = vmatprep.mubr.f32.mxu0 %v6185_v56  ;;  %5099 = vmatprep.subr.mxu1 %v2835_v41 }
 0x63c   : > { %5100 = vmatpush3.msra.mxu1 %v2819_v57 }
 0x63d   : > { %5101 = vmatprep.subr.mxu1 %v2834_v11 }
 0x63e   : > { %2714 = vmatmul.mubr.f32.gmra.mxu0 %v2572_v7  ;;  %5102 = vmatpush3.msra.mxu1 %v2818_v13 }
 0x63f   : > { %2719 = vmatprep.mubr.f32.mxu0 %v6185_v56  ;;  %5103 = vmatprep.subr.mxu1 %v2833_v21 }
 0x640   : > { %5104 = vmatpush3.msra.mxu1 %v2817_v40 }
 0x641   : > { %5105 = vmatprep.subr.mxu1 %v2832_v36 }
 0x642   : > { %2720 = vmatmul.mubr.f32.gmra.mxu0 %v2573_v32  ;;  %5106 = vmatpush3.msra.mxu1 %v2816_v29 }
 0x643   : > { %2725 = vmatprep.mubr.f32.mxu0 %v6185_v56  ;;  %5107 = vmatprep.subr.mxu1 %v2831_v26 }
 0x644   : > { %5108 = vmatpush3.msra.mxu1 %v2815_v35 }
 0x645   : > { %5109 = vmatprep.subr.mxu1 %v2830_v38 }
 0x646   : > { %2726 = vmatmul.mubr.f32.gmra.mxu0 %v2574_v4  ;;  %5110 = vmatpush3.msra.mxu1 %v2814_v58 }
 0x647   : > { %5111 = vmatprep.subr.mxu1 %v2829_v50 }
 0x648   : > { %5112 = vmatpush3.msra.mxu1 %v2813_v61 }
 0x649   : > { %5113 = vmatprep.subr.mxu1 %v2828_v33 }
 0x64a   : > { %5114 = vmatpush3.msra.mxu1 %v2812_v51 }
 0x6ea   : > { %v2685_v1 = vpop.f32.mrf.mxu0 }
 0x6eb   : > { %v2686_v31 = vadd.f32 %v2685_v1, %v8070_v44 }
 0x6ec   : > { %v2687_v6 = vpop.f32.mrf.mxu0 }
 0x6ed   : > { %v2748_v46 = vmul.f32 0.70710677, %v2686_v31  ;;  %v2688_v30 = vadd.f32 %v2687_v6, %v8074_v0  ;;  %v2732_v40 = vmul.f32 0.5, %v2686_v31 }
 0x6ee   : > { %v2691_v24 = vpop.f32.mrf.mxu0 }
 0x6ef   : > { %5949 = verf.f32 %v2748_v46  ;;  %v2749_v25 = vmul.f32 0.70710677, %v2688_v30  ;;  %v2692_v5 = vadd.f32 %v2691_v24, %v8070_v44  ;;  %v2733_v57 = vmul.f32 0.5, %v2688_v30 }
 0x6f0   : > { %v2693_v15 = vpop.f32.mrf.mxu0 }
 0x6f1   : > { %5951 = verf.f32 %v2749_v25  ;;  %v2750_v48 = vmul.f32 0.70710677, %v2692_v5  ;;  %v2694_v19 = vadd.f32 %v2693_v15, %v8074_v0  ;;  %v2734_v46 = vmul.f32 0.5, %v2692_v5 }
 0x6f2   : > { %v2697_v47 = vpop.f32.mrf.mxu0 }
 0x6f3   : > { %5953 = verf.f32 %v2750_v48  ;;  %v2751_v9 = vmul.f32 0.70710677, %v2694_v19  ;;  %v2698_v39 = vadd.f32 %v2697_v47, %v8070_v44  ;;  %v2735_v1 = vmul.f32 0.5, %v2694_v19 }
 0x6f4   : > { %v2699_v17 = vpop.f32.mrf.mxu0 }
 0x6f5   : > { %5955 = verf.f32 %v2751_v9  ;;  %v2752_v18 = vmul.f32 0.70710677, %v2698_v39  ;;  %v2700_v7 = vadd.f32 %v2699_v17, %v8074_v0  ;;  %v2736_v19 = vmul.f32 0.5, %v2698_v39 }
 0x6f6   : > { %v2703_v49 = vpop.f32.mrf.mxu0 }
 0x6f7   : > { %5957 = verf.f32 %v2752_v18  ;;  %v2753_v55 = vmul.f32 0.70710677, %v2700_v7  ;;  %v8083_v32 = vadd.f32 %v2703_v49, %v8070_v44 }
 0x6f8   : > { %v2705_v37 = vpop.f32.mrf.mxu0 }
 0x6f9   : > { %5959 = verf.f32 %v2753_v55  ;;  %v2754_v4 = vmul.f32 0.70710677, %v8083_v32  ;;  %v2706_v28 = vadd.f32 %v2705_v37, %v8074_v0  ;;  %v2737_v55 = vmul.f32 0.5, %v2700_v7 }
 0x6fa   : > { %v2709_v22 = vpop.f32.mrf.mxu0  ;;  %v2738_v39 = vmul.f32 0.5, %v8083_v32 }
 0x6fb   : > { %5961 = verf.f32 %v2754_v4  ;;  %v2755_v20 = vmul.f32 0.70710677, %v2706_v28  ;;  %v8088_v53 = vadd.f32 %v2709_v22, %v8070_v44 }
 0x6fc   : > { %v5950_v10 = vpop.eup %5949  ;;  %v2711_v54 = vpop.f32.mrf.mxu0 }
 0x6fd   : > { %5963 = verf.f32 %v2755_v20  ;;  %v2756_v52 = vmul.f32 0.70710677, %v8088_v53  ;;  %v2780_v45 = vadd.f32 1.0, %v5950_v10  ;;  %v8092_v34 = vadd.f32 %v2711_v54, %v8074_v0 }
 0x6fe   : > { %v5952_v12 = vpop.eup %5951  ;;  %v2715_v41 = vpop.f32.mrf.mxu0  ;;  %v2739_v10 = vmul.f32 0.5, %v2706_v28 }
 0x6ff   : > { %5965 = verf.f32 %v2756_v52  ;;  %v8095_v11 = vadd.f32 %v2715_v41, %v8070_v44  ;;  %v2781_v13 = vadd.f32 1.0, %v5952_v12  ;;  %v2757_v36 = vmul.f32 0.70710677, %v8092_v34 }
 0x700   : > { %v5954_v21 = vpop.eup %5953  ;;  %v2717_v29 = vpop.f32.mrf.mxu0  ;;  %v2796_v50 = vmul.f32 %v2780_v45, %v2732_v40  ;;  %v2741_v28 = vmul.f32 0.5, %v8092_v34 }
 0x701   : > { %v2758_v26 = vmul.f32 0.70710677, %v8095_v11  ;;  %v8100_v35 = vadd.f32 %v2717_v29, %v8074_v0  ;;  %v2797_v38 = vmul.f32 %v2781_v13, %v2733_v57  ;;  %5967 = verf.f32 %v2757_v36 }
 0x702   : > { %v5956_v58 = vpop.eup %5955  ;;  %v2721_v61 = vpop.f32.mrf.mxu0  ;;  %v2782_v14 = vadd.f32 1.0, %v5954_v21  ;;  %v2740_v36 = vmul.f32 0.5, %v8088_v53 }
 0x703   : > { %5969 = verf.f32 %v2758_v26  ;;  %v2759_v33 = vmul.f32 0.70710677, %v8100_v35  ;;  %v8104_v51 = vadd.f32 %v2721_v61, %v8070_v44  ;;  %2915 = vmatprep.mubr.f32.mxu1 %v2797_v38  ;;  %v2783_v6 = vadd.f32 1.0, %v5956_v58 }
 0x704   : > { %v5958_v23 = vpop.eup %5957  ;;  %v2723_v31 = vpop.f32.mrf.mxu0  ;;  %2916 = vmatmul.mubr.f32.vlgmr.msra.gmra.mxu1 %v2796_v50  ;;  %v2798_v18 = vmul.f32 %v2782_v14, %v2734_v46  ;;  %v2743_v38 = vmul.f32 0.5, %v8100_v35 }
 0x705   : > { %5971 = verf.f32 %v2759_v33  ;;  %v2760_v30 = vmul.f32 0.70710677, %v8104_v51  ;;  %v2724_v24 = vadd.f32 %v2723_v31, %v8074_v0  ;;  %v2799_v48 = vmul.f32 %v2783_v6, %v2735_v1 }
 0x706   : > { %v5960_v25 = vpop.eup %5959  ;;  %v2727_v15 = vpop.f32.mrf.mxu0  ;;  %v2784_v47 = vadd.f32 1.0, %v5958_v23  ;;  %v2742_v33 = vmul.f32 0.5, %v8095_v11  ;;  %v2744_v46 = vmul.f32 0.5, %v8104_v51 }
 0x707   : > { %5973 = verf.f32 %v2760_v30  ;;  %v2761_v9 = vmul.f32 0.70710677, %v2724_v24  ;;  %v2728_v17 = vadd.f32 %v2727_v15, %v8070_v44  ;;  %2920 = vmatprep.mubr.f32.mxu1 %v2799_v48  ;;  %v2785_v5 = vadd.f32 1.0, %v5960_v25 }
 0x708   : > { %v5962_v49 = vpop.eup %5961  ;;  %v2729_v37 = vpop.f32.mrf.mxu0  ;;  %2921 = vmatmul.mubr.f32.gmra.mxu1 %v2798_v18  ;;  %v2800_v52 = vmul.f32 %v2784_v47, %v2736_v19  ;;  %v2745_v1 = vmul.f32 0.5, %v2724_v24  ;;  %v4829_v18 = vld [vmem:[%s9044_s6 + $0x80] sm:$0xff] }
 0x709   : > { %5975 = verf.f32 %v2761_v9  ;;  %v2762_v4 = vmul.f32 0.70710677, %v2728_v17  ;;  %v2730_v22 = vadd.f32 %v2729_v37, %v8074_v0  ;;  %v2801_v54 = vmul.f32 %v2785_v5, %v2737_v55  ;;  %5527 = vmatprep.mubr.msk.f32.mxu0 %vm1548_vm0, %v4829_v18 }
 0x70a   : > { %v5964_v20 = vpop.eup %5963  ;;  %v2786_v44 = vadd.f32 1.0, %v5962_v49  ;;  %v2746_v11 = vmul.f32 0.5, %v2728_v17 }
 0x70b   : > { %5977 = verf.f32 %v2762_v4  ;;  %v2763_v12 = vmul.f32 0.70710677, %v2730_v22  ;;  %v2787_v45 = vadd.f32 1.0, %v5964_v20  ;;  %2925 = vmatprep.mubr.f32.mxu1 %v2801_v54  ;;  %v2747_v25 = vmul.f32 0.5, %v2730_v22  ;;  %v4812_v54 = vld [vmem:[%s9053_s15] ss:$0 sm:$0xff] }
 0x70c   : > { %v5966_v41 = vpop.eup %5965  ;;  %2926 = vmatmul.mubr.f32.gmra.mxu1 %v2800_v52  ;;  %v2802_v13 = vmul.f32 %v2786_v44, %v2738_v39 }
 0x70d   : > { %5979 = verf.f32 %v2763_v12  ;;  %v2803_v7 = vmul.f32 %v2787_v45, %v2739_v10  ;;  %v2788_v0 = vadd.f32 1.0, %v5966_v41 }
 0x70e   : > { %v5968_v57 = vpop.eup %5967 }
 0x70f   : > { %2930 = vmatprep.mubr.f32.mxu1 %v2803_v7  ;;  %v2789_v40 = vadd.f32 1.0, %v5968_v57  ;;  %v2804_v58 = vmul.f32 %v2788_v0, %v2740_v36 }
 0x710   : > { %v5970_v21 = vpop.eup %5969  ;;  %2931 = vmatmul.mubr.f32.gmra.mxu1 %v2802_v13 }
 0x711   : > { %v2805_v26 = vmul.f32 %v2789_v40, %v2741_v28  ;;  %v2790_v50 = vadd.f32 1.0, %v5970_v21 }
 0x712   : > { %v5972_v29 = vpop.eup %5971 }
 0x713   : > { %v2791_v32 = vadd.f32 1.0, %v5972_v29  ;;  %2935 = vmatprep.mubr.f32.mxu1 %v2805_v26  ;;  %v2806_v34 = vmul.f32 %v2790_v50, %v2742_v33 }
 0x714   : > { %v5974_v61 = vpop.eup %5973  ;;  %2936 = vmatmul.mubr.f32.gmra.mxu1 %v2804_v58 }
 0x715   : > { %v2807_v14 = vmul.f32 %v2791_v32, %v2743_v38  ;;  %v2792_v53 = vadd.f32 1.0, %v5974_v61 }
 0x716   : > { %v5976_v23 = vpop.eup %5975 }
 0x717   : > { %2940 = vmatprep.mubr.f32.mxu1 %v2807_v14  ;;  %v2793_v31 = vadd.f32 1.0, %v5976_v23  ;;  %v2808_v15 = vmul.f32 %v2792_v53, %v2744_v46 }
 0x718   : > { %v5978_v6 = vpop.eup %5977  ;;  %2941 = vmatmul.mubr.f32.gmra.mxu1 %v2806_v34 }
 0x719   : > { %v2809_v35 = vmul.f32 %v2793_v31, %v2745_v1  ;;  %v2794_v47 = vadd.f32 1.0, %v5978_v6 }
 0x71a   : > { %v5980_v30 = vpop.eup %5979 }
 0x71b   : > { %2945 = vmatprep.mubr.f32.mxu1 %v2809_v35  ;;  %v2795_v48 = vadd.f32 1.0, %v5980_v30  ;;  %v2810_v24 = vmul.f32 %v2794_v47, %v2746_v11 }
 0x71c   : > { %2946 = vmatmul.mubr.f32.gmra.mxu1 %v2808_v15 }
 0x71d   : > { %v2811_v9 = vmul.f32 %v2795_v48, %v2747_v25 }
 0x71f   : > { %2950 = vmatprep.mubr.f32.mxu1 %v2811_v9 }
 0x720   : > { %2951 = vmatmul.mubr.f32.gmra.mxu1 %v2810_v24 }
 0x7c4   : > { %v5115_v51 = vpop.f32.mrf.mxu1 }
 0x7c6   : > { %v5116_v49 = vpop.f32.mrf.mxu1 }
 0x7c7   : > { %v5117_v20 = vadd.f32 %v5116_v49, %v5115_v51 }
 0x7c8   : > { %v5118_v19 = vpop.f32.mrf.mxu1 }
 0x7c9   : > { %v2918_v41 = vadd.f32 %v5117_v20, %v4812_v54 }
 0x7ca   : > { %v5119_v55 = vpop.f32.mrf.mxu1 }
 0x7cb   : > { %v5120_v22 = vadd.f32 %v5119_v55, %v5118_v19  ;;  %v8127_v28 = vadd.f32 %v2918_v41, %v7776_v63 }
 0x7cc   : > { %v5121_v37 = vpop.f32.mrf.mxu1 }
 0x7cd   : > { %v2923_v12 = vadd.f32 %v5120_v22, %v4812_v54 }
 0x7ce   : > { %v5122_v5 = vpop.f32.mrf.mxu1 }
 0x7cf   : > { %v5123_v10 = vadd.f32 %v5122_v5, %v5121_v37  ;;  %v8124_v13 = vadd.f32 %v2923_v12, %v7779_v2 }
 0x7d0   : > { %v5124_v4 = vpop.f32.mrf.mxu1 }
 0x7d1   : > { %v2928_v39 = vadd.f32 %v5123_v10, %v4812_v54  ;;  %v2964_v38 = vadd.f32 %v8124_v13, %v8127_v28 }
 0x7d2   : > { %v5125_v17 = vpop.f32.mrf.mxu1 }
 0x7d3   : > { %v5126_v45 = vadd.f32 %v5125_v17, %v5124_v4  ;;  %v8130_v40 = vadd.f32 %v2928_v39, %v7784_v8 }
 0x7d4   : > { %v5127_v52 = vpop.f32.mrf.mxu1 }
 0x7d5   : > { %v2933_v0 = vadd.f32 %v5126_v45, %v4812_v54  ;;  %v2965_v50 = vadd.f32 %v2964_v38, %v8130_v40 }
 0x7d6   : > { %v5128_v44 = vpop.f32.mrf.mxu1 }
 0x7d7   : > { %v5129_v7 = vadd.f32 %v5128_v44, %v5127_v52  ;;  %v8135_v58 = vadd.f32 %v2933_v0, %v7787_v62  ;;  %v3065_v0 = vpop.permute.xlu1 %3064 }
 0x7d8   : > { %v5130_v57 = vpop.f32.mrf.mxu1 }
 0x7d9   : > { %v2938_v36 = vadd.f32 %v5129_v7, %v4812_v54  ;;  %v2966_v8 = vadd.f32 %v2965_v50, %v8135_v58 }
 0x7da   : > { %v5131_v21 = vpop.f32.mrf.mxu1 }
 0x7db   : > { %v5132_v29 = vadd.f32 %v5131_v21, %v5130_v57  ;;  %v8139_v61 = vadd.f32 %v2938_v36, %v7792_v60  ;;  %v3060_v36 = vpop.permute.xlu0 %3059  ;;  %v3122_v38 = vpop.permute.xlu1 %3121 }
 0x7dc   : > { %v5133_v26 = vpop.f32.mrf.mxu1 }
 0x7dd   : > { %v2943_v32 = vadd.f32 %v5132_v29, %v4812_v54  ;;  %v2967_v34 = vadd.f32 %v2966_v8, %v8139_v61 }
 0x7de   : > { %v5134_v2 = vpop.f32.mrf.mxu1 }
 0x7df   : > { %v5135_v63 = vadd.f32 %v5134_v2, %v5133_v26  ;;  %v8143_v14 = vadd.f32 %v2943_v32, %v7795_v59  ;;  %v3055_v2 = vpop.permute.xlu0 %3054 }
 0x7e0   : > { %v5136_v33 = vpop.f32.mrf.mxu1 }
 0x7e1   : > { %v2948_v23 = vadd.f32 %v5135_v63, %v4812_v54  ;;  %v2968_v53 = vadd.f32 %v2967_v34, %v8143_v14 }
 0x7e2   : > { %v5137_v1 = vpop.f32.mrf.mxu1 }
 0x7e3   : > { %v8147_v62 = vadd.f32 %v2948_v23, %v7800_v43  ;;  %v5138_v31 = vadd.f32 %v5137_v1, %v5136_v33  ;;  %v3117_v33 = vpop.permute.xlu1 %3116  ;;  %v3050_v8 = vpop.permute.xlu0 %3049 }
 0x7e5   : > { %v2953_v6 = vadd.f32 %v5138_v31, %v4812_v54  ;;  %v2969_v60 = vadd.f32 %v2968_v53, %v8147_v62 }
 0x7e7   : > { %v8152_v46 = vadd.f32 %v2953_v6, %v7803_v3  ;;  %v3112_v23 = vpop.permute.xlu1 %3111  ;;  %v3045_v1 = vpop.permute.xlu0 %3044 }
 0x7e9   : > { %v2970_v35 = vadd.f32 %v2969_v60, %v8152_v46 }
 0x7eb   : > { %v2971_v59 = vrot.slane %v2970_v35, 4  ;;  %v3107_v34 = vpop.permute.xlu1 %3106  ;;  %v3040_v53 = vpop.permute.xlu0 %3039 }
 0x7ed   : > { %v2972_v30 = vadd.f32 %v2971_v59, %v2970_v35 }
 0x7ef   : > { %v2973_v25 = vrot.slane %v2972_v30, 2 }
 0x7f1   : > { %v2974_v15 = vadd.f32 %v2973_v25, %v2972_v30 }
 0x7f3   : > { %v2975_v48 = vrot.slane %v2974_v15, 1 }
 0x7f5   : > { %v2976_v47 = vadd.f32 %v2975_v48, %v2974_v15  ;;  %v3102_v15 = vpop.permute.xlu1 %3101 }
 0x7f7   : > { %v2977_v11 = vmul.f32 0.015625, %v2976_v47 }
 0x7f9   : > { %v8156_v43 = vsub.f32 %v8127_v28, %v2977_v11  ;;  %v2979_v9 = vsub.f32 %v8124_v13, %v2977_v11  ;;  %v2980_v24 = vsub.f32 %v8130_v40, %v2977_v11  ;;  %v2981_v18 = vsub.f32 %v8135_v58, %v2977_v11 }
 0x7fa   : > { %v2982_v49 = vsub.f32 %v8139_v61, %v2977_v11  ;;  %v2983_v37 = vsub.f32 %v8143_v14, %v2977_v11  ;;  %v2984_v22 = vsub.f32 %v8147_v62, %v2977_v11  ;;  %v2985_v10 = vsub.f32 %v8152_v46, %v2977_v11 }
 0x7fb   : > { %v2986_v3 = vmul.f32 %v8156_v43, %v8156_v43  ;;  %v2987_v51 = vmul.f32 %v2979_v9, %v2979_v9  ;;  %v2988_v19 = vmul.f32 %v2980_v24, %v2980_v24  ;;  %v2989_v5 = vmul.f32 %v2981_v18, %v2981_v18 }
 0x7fc   : > { %v2990_v17 = vmul.f32 %v2982_v49, %v2982_v49  ;;  %v2991_v54 = vmul.f32 %v2983_v37, %v2983_v37  ;;  %v2992_v12 = vmul.f32 %v2984_v22, %v2984_v22  ;;  %v2993_v44 = vmul.f32 %v2985_v10, %v2985_v10 }
 0x7fd   : > { %v2994_v55 = vadd.f32 %v2987_v51, %v2986_v3  ;;  %v3035_v3 = vpop.permute.xlu0 %3034 }
 0x7ff   : > { %v2995_v4 = vadd.f32 %v2994_v55, %v2988_v19 }
 0x801   : > { %v2996_v20 = vadd.f32 %v2995_v4, %v2989_v5 }
 0x803   : > { %v2997_v52 = vadd.f32 %v2996_v20, %v2990_v17  ;;  %v3097_v20 = vpop.permute.xlu1 %3096 }
 0x805   : > { %v2998_v45 = vadd.f32 %v2997_v52, %v2991_v54 }
 0x807   : > { %v2999_v41 = vadd.f32 %v2998_v45, %v2992_v12  ;;  %v3092_v12 = vpop.permute.xlu1 %3091 }
 0x809   : > { %v3000_v39 = vadd.f32 %v2999_v41, %v2993_v44  ;;  %v4831_v41 = vld [vmem:[%s9044_s6 + $0x90] sm:$0xff] }
 0x80b   : > { %v3001_v7 = vrot.slane %v3000_v39, 4 }
 0x80d   : > { %v3002_v57 = vadd.f32 %v3001_v7, %v3000_v39  ;;  %v8178_v39 = vld [vmem:[%s9136_s3 + $0x78] sm:$0xff] }
 0x80e   : > { %v4832_v7 = vld [vmem:[%s9044_s6 + $0x98] sm:$0xff] }
 0x80f   : > { %v3003_v21 = vrot.slane %v3002_v57, 2 }
 0x811   : > { %v3004_v29 = vadd.f32 %v3003_v21, %v3002_v57  ;;  %v4833_v57 = vld [vmem:[%s9044_s6 + $0xa0] sm:$0xff]  ;;  %v8200_v21 = vld [vmem:[%s9136_s3 + $0x68] sm:$0xff] }
 0x813   : > { %v3005_v26 = vrot.slane %v3004_v29, 1 }
 0x815   : > { %v3006_v32 = vadd.f32 %v3005_v26, %v3004_v29  ;;  %v4835_v29 = vld [vmem:[%s9044_s6 + $0xb0] sm:$0xff]  ;;  %v8214_v26 = vld [vmem:[%s9136_s3 + $0x60] sm:$0xff] }
 0x817   : > { %v3007_v50 = vmul.f32 0.015625, %v3006_v32  ;;  %v4836_v32 = vld [vmem:[%s9044_s6 + $0xb8] sm:$0xff] }
 0x819   : > { %v3008_v63 = vadd.f32 1e-05, %v3007_v50  ;;  %v8236_v50 = vld [vmem:[%s9136_s3 + $0x50] sm:$0xff] }
 0x81b   : > { %5981 = vrsqrt.f32 %v3008_v63  ;;  %v8244_v63 = vld [vmem:[%s9136_s3 + $0x48] sm:$0xff] }
 0x828   : > { %v5982_v31 = vpop.eup %5981 }
 0x829   : > { %v3017_v6 = vmul.f32 %v5982_v31, %v2985_v10  ;;  %v3016_v60 = vmul.f32 %v5982_v31, %v2984_v22  ;;  %v3015_v35 = vmul.f32 %v5982_v31, %v2983_v37  ;;  %v3014_v25 = vmul.f32 %v5982_v31, %v2982_v49  ;;  %v3030_v10 = vpop.permute.xlu0 %3029 }
 0x82a   : > { %v3013_v11 = vmul.f32 %v5982_v31, %v2981_v18  ;;  %v3012_v55 = vmul.f32 %v5982_v31, %v2980_v24  ;;  %v3011_v17 = vmul.f32 %v5982_v31, %v2979_v9  ;;  %v3010_v49 = vmul.f32 %v5982_v31, %v8156_v43  ;;  %v4830_v43 = vld [vmem:[%s9044_s6 + $0x88] sm:$0xff]  ;;  %v4841_v31 = vld [vmem:[%s9044_s6 + $0xe0] sm:$0xff] }
 0x82b   : > { %v3074_v59 = vmul.f32 %v3065_v0, %v3017_v6  ;;  %v3073_v30 = vmul.f32 %v3060_v36, %v3016_v60  ;;  %v3072_v47 = vmul.f32 %v3055_v2, %v3015_v35  ;;  %v3071_v19 = vmul.f32 %v3050_v8, %v3014_v25  ;;  %v8192_v0 = vld [vmem:[%s9136_s3 + $0x70] sm:$0xff]  ;;  %v4834_v36 = vld [vmem:[%s9044_s6 + $0xa8] sm:$0xff]  ;;  %v4837_v2 = vld [vmem:[%s9044_s6 + $0xc0] sm:$0xff] }
 0x82c   : > { %v3070_v4 = vmul.f32 %v3045_v1, %v3013_v11  ;;  %v3069_v22 = vmul.f32 %v3040_v53, %v3012_v55  ;;  %v3068_v54 = vmul.f32 %v3035_v3, %v3011_v17  ;;  %v3067_v52 = vmul.f32 %v3030_v10, %v3010_v49  ;;  %v4839_v8 = vld [vmem:[%s9044_s6 + $0xd0] sm:$0xff]  ;;  %v8266_v1 = vld [vmem:[%s9136_s3 + $0x38] sm:$0xff]  ;;  %v8288_v6 = vld [vmem:[%s9136_s3 + $0x28] sm:$0xff]  ;;  %v3244_v55 = vpop.permute.xlu1 %3243 }
 0x82d   : > { %v3131_v48 = vadd.f32 %v3122_v38, %v3074_v59  ;;  %v3130_v51 = vadd.f32 %v3117_v33, %v3073_v30  ;;  %v3129_v5 = vadd.f32 %v3112_v23, %v3072_v47  ;;  %v3128_v37 = vadd.f32 %v3107_v34, %v3071_v19  ;;  %v3087_v45 = vpop.permute.xlu0 %3086  ;;  %v8222_v38 = vld [vmem:[%s9136_s3 + $0x58] sm:$0xff]  ;;  %v4838_v33 = vld [vmem:[%s9044_s6 + $0xc8] sm:$0xff]  ;;  %v8258_v23 = vld [vmem:[%s9136_s3 + $0x40] sm:$0xff] }
 0x82e   : > { %v3127_v18 = vadd.f32 %v3102_v15, %v3070_v4  ;;  %v3126_v24 = vadd.f32 %v3097_v20, %v3069_v22  ;;  %v3125_v9 = vadd.f32 %v3092_v12, %v3068_v54  ;;  %v3124_v44 = vadd.f32 %v3087_v45, %v3067_v52  ;;  %v4840_v34 = vld [vmem:[%s9044_s6 + $0xd8] sm:$0xff]  ;;  %v8280_v53 = vld [vmem:[%s9136_s3 + $0x30] sm:$0xff]  ;;  %v4842_v60 = vld [vmem:[%s9044_s6 + $0xe8] sm:$0xff] }
 0x82f   : > { %5511 = vmatprep.subr.mxu0 %v3131_v48  ;;  %v4843_v35 = vld [vmem:[%s9044_s6 + $0xf0] sm:$0xff]  ;;  %v8302_v59 = vld [vmem:[%s9136_s3 + $0x20] sm:$0xff]  ;;  %v8310_v30 = vld [vmem:[%s9136_s3 + $0x18] sm:$0xff] }
 0x830   : > { %5512 = vmatpush3.msra.mxu0 %v3131_v48  ;;  %v4844_v25 = vld [vmem:[%s9044_s6 + $0xf8] sm:$0xff]  ;;  %v8321_v15 = vld [vmem:[%s9136_s3 + $0x10] sm:$0xff]  ;;  %v8329_v48 = vld [vmem:[%s9136_s3 + $0x8] sm:$0xff] }
 0x831   : > { %5513 = vmatprep.subr.mxu0 %v3130_v51  ;;  %v8336_v47 = vld [vmem:[%s9136_s3] sm:$0xff]  ;;  %v3239_v4 = vpop.permute.xlu0 %3238 }
 0x832   : > { %5514 = vmatpush3.msra.mxu0 %v3130_v51  ;;  %v4877_v11 = vld [vmem:[%s9046_s8 + $0x40] sm:$0xff] }
 0x833   : > { %5515 = vmatprep.subr.mxu0 %v3129_v5  ;;  %5583 = vmatprep.mubr.f32.mxu1 %v4877_v11 }
 0x834   : > { %5516 = vmatpush3.msra.mxu0 %v3129_v5 }
 0x835   : > { %5517 = vmatprep.subr.mxu0 %v3128_v37  ;;  %v3229_v49 = vpop.permute.xlu0 %3228 }
 0x836   : > { %5518 = vmatpush3.msra.mxu0 %v3128_v37  ;;  %v3234_v37 = vpop.permute.xlu1 %3233 }
 0x837   : > { %5519 = vmatprep.subr.mxu0 %v3127_v18 }
 0x838   : > { %5520 = vmatpush3.msra.mxu0 %v3127_v18 }
 0x839   : > { %5521 = vmatprep.subr.mxu0 %v3126_v24  ;;  %v3219_v52 = vpop.permute.xlu0 %3218 }
 0x83a   : > { %5522 = vmatpush3.msra.mxu0 %v3126_v24  ;;  %v3224_v54 = vpop.permute.xlu1 %3223 }
 0x83b   : > { %5523 = vmatprep.subr.mxu0 %v3125_v9 }
 0x83c   : > { %5524 = vmatpush3.msra.mxu0 %v3125_v9 }
 0x83d   : > { %5525 = vmatprep.subr.mxu0 %v3124_v44 }
 0x83e   : > { %5526 = vmatpush3.msra.mxu0 %v3124_v44  ;;  %v3214_v45 = vpop.permute.xlu1 %3213 }
 0x83f   : > { %5528 = vmatmul.mubr.msk.f32.vlgmr.msra.gmra.mxu0 %vm1548_vm0, %v4830_v43  ;;  %5595 = vmatprep.subr.mxu0 %v8178_v39  ;;  %v3209_v43 = vpop.permute.xlu0 %3208 }
 0x840   : > { %5530 = vmatprep.mubr.msk.f32.mxu0 %vm1548_vm0, %v4831_v41  ;;  %5596 = vmatpush3.msra.mxu0 %v8178_v39 }
 0x841   : > { %5597 = vmatprep.subr.mxu0 %v8192_v0 }
 0x842   : > { %5598 = vmatpush3.msra.mxu0 %v8192_v0 }
 0x843   : > { %5531 = vmatmul.mubr.msk.f32.gmra.mxu0 %vm1548_vm0, %v4832_v7  ;;  %5599 = vmatprep.subr.mxu0 %v8200_v21 }
 0x844   : > { %5533 = vmatprep.mubr.msk.f32.mxu0 %vm1548_vm0, %v4833_v57  ;;  %5600 = vmatpush3.msra.mxu0 %v8200_v21 }
 0x845   : > { %5601 = vmatprep.subr.mxu0 %v8214_v26 }
 0x846   : > { %5602 = vmatpush3.msra.mxu0 %v8214_v26 }
 0x847   : > { %5534 = vmatmul.mubr.msk.f32.gmra.mxu0 %vm1548_vm0, %v4834_v36  ;;  %5603 = vmatprep.subr.mxu0 %v8222_v38 }
 0x848   : > { %5536 = vmatprep.mubr.msk.f32.mxu0 %vm1548_vm0, %v4835_v29  ;;  %5604 = vmatpush3.msra.mxu0 %v8222_v38 }
 0x849   : > { %5605 = vmatprep.subr.mxu0 %v8236_v50 }
 0x84a   : > { %5606 = vmatpush3.msra.mxu0 %v8236_v50 }
 0x84b   : > { %5537 = vmatmul.mubr.msk.f32.gmra.mxu0 %vm1548_vm0, %v4836_v32  ;;  %5607 = vmatprep.subr.mxu0 %v8244_v63  ;;  %v3204_v32 = vpop.permute.xlu1 %3203 }
 0x84c   : > { %5539 = vmatprep.mubr.msk.f32.mxu0 %vm1548_vm0, %v4837_v2  ;;  %5608 = vmatpush3.msra.mxu0 %v8244_v63 }
 0x84d   : > { %5609 = vmatprep.subr.mxu0 %v8258_v23 }
 0x84e   : > { %5610 = vmatpush3.msra.mxu0 %v8258_v23 }
 0x84f   : > { %5540 = vmatmul.mubr.msk.f32.gmra.mxu0 %vm1548_vm0, %v4838_v33  ;;  %5611 = vmatprep.subr.mxu0 %v8266_v1 }
 0x850   : > { %5542 = vmatprep.mubr.msk.f32.mxu0 %vm1548_vm0, %v4839_v8  ;;  %5612 = vmatpush3.msra.mxu0 %v8266_v1 }
 0x851   : > { %5613 = vmatprep.subr.mxu0 %v8280_v53 }
 0x852   : > { %5614 = vmatpush3.msra.mxu0 %v8280_v53 }
 0x853   : > { %5543 = vmatmul.mubr.msk.f32.gmra.mxu0 %vm1548_vm0, %v4840_v34  ;;  %5615 = vmatprep.subr.mxu0 %v8288_v6 }
 0x854   : > { %5545 = vmatprep.mubr.msk.f32.mxu0 %vm1548_vm0, %v4841_v31  ;;  %5616 = vmatpush3.msra.mxu0 %v8288_v6  ;;  %v3199_v31 = vpop.permute.xlu0 %3198 }
 0x855   : > { %5617 = vmatprep.subr.mxu0 %v8302_v59 }
 0x856   : > { %5618 = vmatpush3.msra.mxu0 %v8302_v59 }
 0x857   : > { %5546 = vmatmul.mubr.msk.f32.gmra.mxu0 %vm1548_vm0, %v4842_v60  ;;  %5619 = vmatprep.subr.mxu0 %v8310_v30 }
 0x858   : > { %5548 = vmatprep.mubr.msk.f32.mxu0 %vm1548_vm0, %v4843_v35  ;;  %5620 = vmatpush3.msra.mxu0 %v8310_v30 }
 0x859   : > { %5621 = vmatprep.subr.mxu0 %v8321_v15 }
 0x85a   : > { %5622 = vmatpush3.msra.mxu0 %v8321_v15 }
 0x85b   : > { %5549 = vmatmul.mubr.msk.f32.gmra.mxu0 %vm1548_vm0, %v4844_v25  ;;  %5623 = vmatprep.subr.mxu0 %v8329_v48 }
 0x85c   : > { %5624 = vmatpush3.msra.mxu0 %v8329_v48 }
 0x85d   : > { %5625 = vmatprep.subr.mxu0 %v8336_v47 }
 0x85e   : > { %5626 = vmatpush3.msra.mxu0 %v8336_v47 }
 0x8ff   : > { %v8343_v3 = vpop.f32.mrf.mxu0 }
 0x901   : > { %v8345_v51 = vpop.f32.mrf.mxu0 }
 0x903   : > { %v5532_v19 = vpop.f32.mrf.mxu0 }
 0x905   : > { %v3370_v5 = vpop.f32.mrf.mxu0 }
 0x907   : > { %v5535_v17 = vpop.f32.mrf.mxu0 }
 0x909   : > { %v3380_v20 = vpop.f32.mrf.mxu0 }
 0x90b   : > { %v5538_v22 = vpop.f32.mrf.mxu0 }
 0x90d   : > { %v3390_v10 = vpop.f32.mrf.mxu0 }
 0x90f   : > { %v5541_v18 = vpop.f32.mrf.mxu0 }
 0x910   : > { %v8357_v11 = vadd.f32 %v5541_v18, %v3214_v45 }
 0x911   : > { %v3400_v24 = vpop.f32.mrf.mxu0 }
 0x913   : > { %v5544_v12 = vpop.f32.mrf.mxu0 }
 0x914   : > { %v8352_v2 = vadd.f32 %v5544_v12, %v3224_v54  ;;  %v8360_v54 = vadd.f32 %v3400_v24, %v3209_v43  ;;  %v3189_v12 = vpop.permute.xlu0 %3188 }
 0x915   : > { %v3410_v9 = vpop.f32.mrf.mxu0 }
 0x916   : > { %v8355_v60 = vadd.f32 %v3410_v9, %v3219_v52  ;;  %v3464_v52 = vmul.f32 0.70710677, %v8357_v11  ;;  %v3463_v18 = vmul.f32 0.70710677, %v8360_v54 }
 0x917   : > { %v5547_v44 = vpop.f32.mrf.mxu0 }
 0x918   : > { %v8347_v41 = vadd.f32 %v5547_v44, %v3234_v37  ;;  %v3466_v37 = vmul.f32 0.70710677, %v8352_v2  ;;  %v3194_v44 = vpop.permute.xlu1 %3193  ;;  %v3179_v43 = vpop.permute.xlu0 %3178 }
 0x919   : > { %v3420_v7 = vpop.f32.mrf.mxu0  ;;  %v8369_v9 = vadd.f32 %v5535_v17, %v3194_v44 }
 0x91a   : > { %v8349_v57 = vadd.f32 %v3420_v7, %v3229_v49  ;;  %v3468_v36 = vmul.f32 0.70710677, %v8347_v41  ;;  %v8363_v7 = vadd.f32 %v5538_v22, %v3204_v32 }
 0x91b   : > { %v5550_v29 = vpop.f32.mrf.mxu0 }
 0x91c   : > { %v3436_v33 = vadd.f32 %v5550_v29, %v3244_v55  ;;  %v3467_v8 = vmul.f32 0.70710677, %v8349_v57  ;;  %5983 = verf.f32 %v3468_v36  ;;  %v3465_v55 = vmul.f32 0.70710677, %v8355_v60  ;;  %v3184_v45 = vpop.permute.xlu1 %3183 }
 0x91d   : > { %v3430_v34 = vpop.f32.mrf.mxu0  ;;  %v3462_v24 = vmul.f32 0.70710677, %v8363_v7  ;;  %v8372_v36 = vadd.f32 %v3380_v20, %v3189_v12  ;;  %v8375_v29 = vadd.f32 %v5532_v19, %v3184_v45 }
 0x91e   : > { %v3470_v35 = vmul.f32 0.70710677, %v3436_v33  ;;  %v3431_v25 = vadd.f32 %v3430_v34, %v3239_v4  ;;  %v8366_v4 = vadd.f32 %v3390_v10, %v3199_v31  ;;  %v3460_v10 = vmul.f32 0.70710677, %v8369_v9 }
 0x91f   : > { %v8378_v34 = vadd.f32 %v3370_v5, %v3179_v43  ;;  %v3458_v19 = vmul.f32 0.70710677, %v8375_v29 }
 0x920   : > { %5985 = verf.f32 %v3470_v35  ;;  %v3469_v49 = vmul.f32 0.70710677, %v3431_v25  ;;  %v3461_v22 = vmul.f32 0.70710677, %v8366_v4  ;;  %v3174_v31 = vpop.permute.xlu1 %3173  ;;  %v3459_v35 = vmul.f32 0.70710677, %v8372_v36 }
 0x921   : > { %5987 = verf.f32 %v3467_v8  ;;  %v8382_v44 = vadd.f32 %v8343_v3, %v3174_v31  ;;  %v3453_v12 = vmul.f32 0.5, %v3431_v25  ;;  %v3457_v43 = vmul.f32 0.70710677, %v8378_v34 }
 0x922   : > { %5989 = verf.f32 %v3469_v49  ;;  %v3451_v25 = vmul.f32 0.5, %v8349_v57 }
 0x923   : > { %5991 = verf.f32 %v3466_v37  ;;  %v3454_v37 = vmul.f32 0.5, %v3436_v33  ;;  %v3452_v33 = vmul.f32 0.5, %v8347_v41  ;;  %v3450_v41 = vmul.f32 0.5, %v8352_v2 }
 0x924   : > { %5993 = verf.f32 %v3465_v55  ;;  %v3169_v55 = vpop.permute.xlu0 %3168 }
 0x925   : > { %5995 = verf.f32 %v3464_v52 }
 0x926   : > { %5997 = verf.f32 %v3463_v18 }
 0x927   : > { %5999 = verf.f32 %v3462_v24  ;;  %v8386_v24 = vadd.f32 %v8345_v51, %v3169_v55 }
 0x928   : > { %6001 = verf.f32 %v3461_v22 }
 0x929   : > { %v5984_v32 = vpop.eup %5983  ;;  %6003 = verf.f32 %v3460_v10  ;;  %v3456_v10 = vmul.f32 0.70710677, %v8382_v44 }
 0x92a   : > { %v3500_v5 = vadd.f32 1.0, %v5984_v32  ;;  %6005 = verf.f32 %v3459_v35 }
 0x92b   : > { %6007 = verf.f32 %v3458_v19 }
 0x92c   : > { %v3516_v32 = vmul.f32 %v3500_v5, %v3452_v33  ;;  %6009 = verf.f32 %v3457_v43 }
 0x92d   : > { %v5986_v8 = vpop.eup %5985  ;;  %6011 = verf.f32 %v3456_v10 }
 0x92e   : > { %v5988_v17 = vpop.eup %5987  ;;  %v3502_v20 = vadd.f32 1.0, %v5986_v8 }
 0x92f   : > { %v5990_v49 = vpop.eup %5989  ;;  %v3499_v22 = vadd.f32 1.0, %v5988_v17 }
 0x930   : > { %v3518_v52 = vmul.f32 %v3502_v20, %v3454_v37  ;;  %v3501_v18 = vadd.f32 1.0, %v5990_v49  ;;  %v5992_v45 = vpop.eup %5991  ;;  %v3455_v37 = vmul.f32 0.70710677, %v8386_v24  ;;  %v3449_v49 = vmul.f32 0.5, %v8355_v60 }
 0x931   : > { %v5994_v8 = vpop.eup %5993  ;;  %v3498_v31 = vadd.f32 1.0, %v5992_v45  ;;  %v3515_v35 = vmul.f32 %v3499_v22, %v3451_v25  ;;  %v3447_v45 = vmul.f32 0.5, %v8360_v54  ;;  %v3446_v60 = vmul.f32 0.5, %v8363_v7 }
 0x932   : > { %5551 = vmatprep.subr.mxu1 %v3518_v52  ;;  %v3517_v3 = vmul.f32 %v3501_v18, %v3453_v12  ;;  %v5996_v51 = vpop.eup %5995  ;;  %v3497_v17 = vadd.f32 1.0, %v5994_v8  ;;  %6013 = verf.f32 %v3455_v37  ;;  %v3448_v12 = vmul.f32 0.5, %v8357_v11 }
 0x933   : > { %5552 = vmatpush3.msra.mxu1 %v3518_v52  ;;  %v5998_v20 = vpop.eup %5997  ;;  %v3514_v57 = vmul.f32 %v3498_v31, %v3450_v41  ;;  %v3496_v19 = vadd.f32 1.0, %v5996_v51  ;;  %v3445_v11 = vmul.f32 0.5, %v8366_v4  ;;  %v3444_v54 = vmul.f32 0.5, %v8369_v9 }
 0x934   : > { %5553 = vmatprep.subr.mxu1 %v3517_v3  ;;  %v6000_v55 = vpop.eup %5999  ;;  %v3513_v52 = vmul.f32 %v3497_v17, %v3449_v49  ;;  %v3495_v18 = vadd.f32 1.0, %v5998_v20  ;;  %v3443_v7 = vmul.f32 0.5, %v8372_v36  ;;  %v3442_v4 = vmul.f32 0.5, %v8375_v29 }
 0x935   : > { %5554 = vmatpush3.msra.mxu1 %v3517_v3  ;;  %v6002_v2 = vpop.eup %6001  ;;  %v3512_v43 = vmul.f32 %v3496_v19, %v3448_v12  ;;  %v3494_v33 = vadd.f32 1.0, %v6000_v55  ;;  %v3441_v9 = vmul.f32 0.5, %v8378_v34  ;;  %v3440_v36 = vmul.f32 0.5, %v8382_v44  ;;  %v4878_v34 = vld [vmem:[%s9046_s8 + $0x48] sm:$0xff]  ;;  %v4879_v44 = vld [vmem:[%s9046_s8 + $0x50] sm:$0xff] }
 0x936   : > { %5555 = vmatprep.subr.mxu1 %v3516_v32  ;;  %v6004_v5 = vpop.eup %6003  ;;  %v3511_v3 = vmul.f32 %v3495_v18, %v3447_v45  ;;  %v3493_v22 = vadd.f32 1.0, %v6002_v2  ;;  %v3439_v18 = vmul.f32 0.5, %v8386_v24  ;;  %v4880_v24 = vld [vmem:[%s9046_s8 + $0x58] sm:$0xff]  ;;  %v4882_v45 = vld [vmem:[%s9046_s8 + $0x68] sm:$0xff] }
 0x937   : > { %5556 = vmatpush3.msra.mxu1 %v3516_v32  ;;  %v6006_v8 = vpop.eup %6005  ;;  %v3510_v10 = vmul.f32 %v3494_v33, %v3446_v60  ;;  %v3492_v25 = vadd.f32 1.0, %v6004_v5  ;;  %v4881_v5 = vld [vmem:[%s9046_s8 + $0x60] sm:$0xff]  ;;  %v4884_v33 = vld [vmem:[%s9046_s8 + $0x78] sm:$0xff]  ;;  %v3545_v60 = vpop.permute.xlu0 %3544 }
 0x938   : > { %5557 = vmatprep.subr.mxu1 %v3515_v35  ;;  %v6008_v32 = vpop.eup %6007  ;;  %v3509_v31 = vmul.f32 %v3493_v22, %v3445_v11  ;;  %v3491_v51 = vadd.f32 1.0, %v6006_v8 }
 0x939   : > { %5558 = vmatpush3.msra.mxu1 %v3515_v35  ;;  %v6010_v37 = vpop.eup %6009  ;;  %v3508_v41 = vmul.f32 %v3492_v25, %v3444_v54  ;;  %v3490_v35 = vadd.f32 1.0, %v6008_v32 }
 0x93a   : > { %5559 = vmatprep.subr.mxu1 %v3514_v57  ;;  %v6012_v17 = vpop.eup %6011  ;;  %v3507_v20 = vmul.f32 %v3491_v51, %v3443_v7  ;;  %v3489_v49 = vadd.f32 1.0, %v6010_v37 }
 0x93b   : > { %5560 = vmatpush3.msra.mxu1 %v3514_v57  ;;  %v3506_v19 = vmul.f32 %v3490_v35, %v3442_v4  ;;  %v3488_v55 = vadd.f32 1.0, %v6012_v17  ;;  %v3555_v8 = vpop.permute.xlu0 %3554 }
 0x93c   : > { %5561 = vmatprep.subr.mxu1 %v3513_v52  ;;  %v3505_v12 = vmul.f32 %v3489_v49, %v3441_v9 }
 0x93d   : > { %5562 = vmatpush3.msra.mxu1 %v3513_v52  ;;  %v3504_v29 = vmul.f32 %v3488_v55, %v3440_v36 }
 0x93e   : > { %5563 = vmatprep.subr.mxu1 %v3512_v43 }
 0x93f   : > { %5564 = vmatpush3.msra.mxu1 %v3512_v43  ;;  %v6014_v57 = vpop.eup %6013  ;;  %v4883_v43 = vld [vmem:[%s9046_s8 + $0x70] sm:$0xff] }
 0x940   : > { %5565 = vmatprep.subr.mxu1 %v3511_v3  ;;  %v3487_v52 = vadd.f32 1.0, %v6014_v57 }
 0x941   : > { %5566 = vmatpush3.msra.mxu1 %v3511_v3  ;;  %v3540_v3 = vpop.permute.xlu1 %3539 }
 0x942   : > { %5567 = vmatprep.subr.mxu1 %v3510_v10  ;;  %v3503_v2 = vmul.f32 %v3487_v52, %v3439_v18 }
 0x943   : > { %5568 = vmatpush3.msra.mxu1 %v3510_v10 }
 0x944   : > { %5569 = vmatprep.subr.mxu1 %v3509_v31 }
 0x945   : > { %5570 = vmatpush3.msra.mxu1 %v3509_v31  ;;  %v3550_v11 = vpop.permute.xlu1 %3549 }
 0x946   : > { %5571 = vmatprep.subr.mxu1 %v3508_v41 }
 0x947   : > { %5572 = vmatpush3.msra.mxu1 %v3508_v41  ;;  %v3565_v41 = vpop.permute.xlu0 %3564 }
 0x948   : > { %5573 = vmatprep.subr.mxu1 %v3507_v20 }
 0x949   : > { %5574 = vmatpush3.msra.mxu1 %v3507_v20  ;;  %v3560_v17 = vpop.permute.xlu1 %3559 }
 0x94a   : > { %5575 = vmatprep.subr.mxu1 %v3506_v19 }
 0x94b   : > { %5576 = vmatpush3.msra.mxu1 %v3506_v19  ;;  %v3575_v19 = vpop.permute.xlu0 %3574 }
 0x94c   : > { %5577 = vmatprep.subr.mxu1 %v3505_v12 }
 0x94d   : > { %5578 = vmatpush3.msra.mxu1 %v3505_v12  ;;  %v3570_v36 = vpop.permute.xlu1 %3569 }
 0x94e   : > { %5579 = vmatprep.subr.mxu1 %v3504_v29 }
 0x94f   : > { %5580 = vmatpush3.msra.mxu1 %v3504_v29 }
 0x950   : > { %5581 = vmatprep.subr.mxu1 %v3503_v2 }
 0x951   : > { %5582 = vmatpush3.msra.mxu1 %v3503_v2  ;;  %v4924_v2 = vld [vmem:[%s9050_s12 + $0x1d8] sm:$0xff] }
 0x952   : > { %5584 = vmatmul.mubr.f32.vlgmr.msra.gmra.mxu1 %v4878_v34  ;;  %5639 = vmatprep.subr.mxu1 %v8178_v39  ;;  %v4923_v34 = vld [vmem:[%s9050_s12 + $0x1d0] sm:$0xff] }
 0x953   : > { %5586 = vmatprep.mubr.f32.mxu1 %v4879_v44  ;;  %5640 = vmatpush3.msra.mxu1 %v8178_v39  ;;  %v4922_v44 = vld [vmem:[%s9050_s12 + $0x1c8] sm:$0xff] }
 0x954   : > { %5641 = vmatprep.subr.mxu1 %v8192_v0 }
 0x955   : > { %5642 = vmatpush3.msra.mxu1 %v8192_v0 }
 0x956   : > { %5587 = vmatmul.mubr.f32.gmra.mxu1 %v4880_v24  ;;  %5643 = vmatprep.subr.mxu1 %v8200_v21 }
 0x957   : > { %5589 = vmatprep.mubr.f32.mxu1 %v4881_v5  ;;  %5644 = vmatpush3.msra.mxu1 %v8200_v21 }
 0x958   : > { %5645 = vmatprep.subr.mxu1 %v8214_v26 }
 0x959   : > { %5646 = vmatpush3.msra.mxu1 %v8214_v26 }
 0x95a   : > { %5590 = vmatmul.mubr.f32.gmra.mxu1 %v4882_v45  ;;  %5647 = vmatprep.subr.mxu1 %v8222_v38 }
 0x95b   : > { %5592 = vmatprep.mubr.f32.mxu1 %v4883_v43  ;;  %5648 = vmatpush3.msra.mxu1 %v8222_v38 }
 0x95c   : > { %5649 = vmatprep.subr.mxu1 %v8236_v50 }
 0x95d   : > { %5650 = vmatpush3.msra.mxu1 %v8236_v50 }
 0x95e   : > { %5593 = vmatmul.mubr.f32.gmra.mxu1 %v4884_v33  ;;  %5651 = vmatprep.subr.mxu1 %v8244_v63 }
 0x95f   : > { %5652 = vmatpush3.msra.mxu1 %v8244_v63 }
 0x960   : > { %5653 = vmatprep.subr.mxu1 %v8258_v23 }
 0x961   : > { %5654 = vmatpush3.msra.mxu1 %v8258_v23 }
 0x962   : > { %5655 = vmatprep.subr.mxu1 %v8266_v1 }
 0x963   : > { %5656 = vmatpush3.msra.mxu1 %v8266_v1 }
 0x964   : > { %5657 = vmatprep.subr.mxu1 %v8280_v53 }
 0x965   : > { %5658 = vmatpush3.msra.mxu1 %v8280_v53 }
 0x966   : > { %5659 = vmatprep.subr.mxu1 %v8288_v6 }
 0x967   : > { %5660 = vmatpush3.msra.mxu1 %v8288_v6 }
 0x968   : > { %5661 = vmatprep.subr.mxu1 %v8302_v59 }
 0x969   : > { %5662 = vmatpush3.msra.mxu1 %v8302_v59 }
 0x96a   : > { %5663 = vmatprep.subr.mxu1 %v8310_v30 }
 0x96b   : > { %5664 = vmatpush3.msra.mxu1 %v8310_v30 }
 0x96c   : > { %5665 = vmatprep.subr.mxu1 %v8321_v15 }
 0x96d   : > { %5666 = vmatpush3.msra.mxu1 %v8321_v15 }
 0x96e   : > { %5667 = vmatprep.subr.mxu1 %v8329_v48 }
 0x96f   : > { %5668 = vmatpush3.msra.mxu1 %v8329_v48 }
 0x970   : > { %5669 = vmatprep.subr.mxu1 %v8336_v47 }
 0x971   : > { %5670 = vmatpush3.msra.mxu1 %v8336_v47 }
 0xa12   : > { %v5585_v22 = vpop.f32.mrf.mxu1 }
 0xa13   : > { %v3649_v10 = vadd.f32 %v5585_v22, %v3545_v60 }
 0xa14   : > { %v3643_v25 = vpop.f32.mrf.mxu1 }
 0xa15   : > { %v3644_v32 = vadd.f32 %v3643_v25, %v3540_v3  ;;  %v8462_v51 = vadd.f32 %v3649_v10, %v8124_v13 }
 0xa16   : > { %v5588_v54 = vpop.f32.mrf.mxu1 }
 0xa17   : > { %v8459_v31 = vadd.f32 %v3644_v32, %v8127_v28  ;;  %v3659_v37 = vadd.f32 %v5588_v54, %v3555_v8 }
 0xa18   : > { %v3653_v7 = vpop.f32.mrf.mxu1 }
 0xa19   : > { %v3654_v35 = vadd.f32 %v3653_v7, %v3550_v11  ;;  %5627 = vmatprep.mubr.f32.mxu0 %v8459_v31  ;;  %v8470_v49 = vadd.f32 %v3659_v37, %v8135_v58 }
 0xa1a   : > { %v5591_v4 = vpop.f32.mrf.mxu1  ;;  %5628 = vmatmul.mubr.f32.vlgmr.msra.gmra.mxu0 %v8462_v51 }
 0xa1b   : > { %v8467_v20 = vadd.f32 %v3654_v35, %v8130_v40  ;;  %v3669_v28 = vadd.f32 %v5591_v4, %v3565_v41 }
 0xa1c   : > { %v3663_v57 = vpop.f32.mrf.mxu1 }
 0xa1d   : > { %v3664_v13 = vadd.f32 %v3663_v57, %v3560_v17  ;;  %5630 = vmatprep.mubr.f32.mxu0 %v8467_v20  ;;  %v8478_v12 = vadd.f32 %v3669_v28, %v8143_v14  ;;  %v4927_v14 = vld [vmem:[%s9050_s12 + $0x1f0] sm:$0xff] }
 0xa1e   : > { %v5594_v9 = vpop.f32.mrf.mxu1  ;;  %5631 = vmatmul.mubr.f32.gmra.mxu0 %v8470_v49 }
 0xa1f   : > { %v8475_v55 = vadd.f32 %v3664_v13, %v8139_v61  ;;  %v3679_v40 = vadd.f32 %v5594_v9, %v3575_v19  ;;  %v4928_v61 = vld [vmem:[%s9050_s12 + $0x1f8] sm:$0xff]  ;;  %v4921_v19 = vld [vmem:[%s9050_s12 + $0x1c0] sm:$0xff] }
 0xa20   : > { %v3673_v52 = vpop.f32.mrf.mxu1  ;;  %4010 = vmatprep.subr.mxu0 %v4928_v61  ;;  %v4916_v61 = vld [vmem:[%s9050_s12 + $0x198] sm:$0xff] }
 0xa21   : > { %v3674_v58 = vadd.f32 %v3673_v52, %v3570_v36  ;;  %5633 = vmatprep.mubr.f32.mxu0 %v8475_v55  ;;  %v8486_v29 = vadd.f32 %v3679_v40, %v8152_v46  ;;  %v4925_v46 = vld [vmem:[%s9050_s12 + $0x1e0] sm:$0xff]  ;;  %4011 = vmatpush1.msra.mxu0 %v4927_v14  ;;  %v4920_v36 = vld [vmem:[%s9050_s12 + $0x1b8] sm:$0xff]  ;;  %v4919_v40 = vld [vmem:[%s9050_s12 + $0x1b0] sm:$0xff] }
 0xa22   : > { %5634 = vmatmul.mubr.f32.gmra.mxu0 %v8478_v12  ;;  %v4918_v52 = vld [vmem:[%s9050_s12 + $0x1a8] sm:$0xff]  ;;  %v4915_v14 = vld [vmem:[%s9050_s12 + $0x190] sm:$0xff] }
 0xa23   : > { %v8483_v18 = vadd.f32 %v3674_v58, %v8147_v62  ;;  %v4926_v62 = vld [vmem:[%s9050_s12 + $0x1e8] sm:$0xff]  ;;  %v4917_v58 = vld [vmem:[%s9050_s12 + $0x1a0] sm:$0xff] }
 0xa24   : > { %4012 = vmatprep.subr.mxu0 %v4926_v62  ;;  %v4914_v62 = vld [vmem:[%s9050_s12 + $0x188] sm:$0xff] }
 0xa25   : > { %5636 = vmatprep.mubr.f32.mxu0 %v8483_v18  ;;  %4013 = vmatpush1.msra.mxu0 %v4925_v46  ;;  %v4913_v46 = vld [vmem:[%s9050_s12 + $0x180] sm:$0xff] }
 0xa26   : > { %5637 = vmatmul.mubr.f32.gmra.mxu0 %v8486_v29  ;;  %4014 = vmatprep.subr.mxu0 %v4924_v2  ;;  %v4912_v2 = vld [vmem:[%s9050_s12 + $0x178] sm:$0xff] }
 0xa27   : > { %4074 = vmatprep.mubr.f32.mxu0 %v6185_v56  ;;  %4015 = vmatpush1.msra.mxu0 %v4923_v34  ;;  %v4911_v34 = vld [vmem:[%s9050_s12 + $0x170] sm:$0xff] }
 0xa28   : > { %4016 = vmatprep.subr.mxu0 %v4922_v44  ;;  %v4910_v44 = vld [vmem:[%s9050_s12 + $0x168] sm:$0xff] }
 0xa29   : > { %4017 = vmatpush1.msra.mxu0 %v4921_v19  ;;  %v4944_v19 = vld [vmem:[%s9052_s14 + $0x170] sm:$0xff] }
 0xa2a   : > { %4018 = vmatprep.subr.mxu0 %v4920_v36  ;;  %v4959_v36 = vld [vmem:[%s9052_s14 + $0x1e8] sm:$0xff] }
 0xa2b   : > { %4019 = vmatpush1.msra.mxu0 %v4919_v40  ;;  %v4943_v40 = vld [vmem:[%s9052_s14 + $0x168] sm:$0xff] }
 0xa2c   : > { %4020 = vmatprep.subr.mxu0 %v4918_v52 }
 0xa2d   : > { %4021 = vmatpush1.msra.mxu0 %v4917_v58 }
 0xa2e   : > { %4022 = vmatprep.subr.mxu0 %v4916_v61 }
 0xa2f   : > { %4023 = vmatpush1.msra.mxu0 %v4915_v14 }
 0xa30   : > { %4024 = vmatprep.subr.mxu0 %v4914_v62 }
 0xa31   : > { %4025 = vmatpush1.msra.mxu0 %v4913_v46 }
 0xa32   : > { %4026 = vmatprep.subr.mxu0 %v4912_v2 }
 0xa33   : > { %4027 = vmatpush1.msra.mxu0 %v4911_v34 }
 0xa34   : > { %4028 = vmatprep.subr.mxu0 %v4910_v44 }
 0xada   : > { %v5629_v24 = vpop.f32.mrf.mxu0 }
 0xadb   : > { %v8513_v5 = vsub.f32 %v8462_v51, %v5629_v24  ;;  %v4909_v24 = vld [vmem:[%s9050_s12 + $0x160] sm:$0xff] }
 0xadc   : > { %v3756_v45 = vpop.f32.mrf.mxu0  ;;  %4029 = vmatpush1.msra.mxu0 %v4909_v24 }
 0xadd   : > { %v8516_v43 = vsub.f32 %v8459_v31, %v3756_v45  ;;  %v3804_v3 = vmul.f32 %v8513_v5, %v8513_v5  ;;  %v4908_v45 = vld [vmem:[%s9050_s12 + $0x158] sm:$0xff] }
 0xade   : > { %v5632_v33 = vpop.f32.mrf.mxu0  ;;  %4030 = vmatprep.subr.mxu0 %v4908_v45 }
 0xadf   : > { %v3803_v60 = vmul.f32 %v8516_v43, %v8516_v43  ;;  %v8523_v22 = vsub.f32 %v8470_v49, %v5632_v33  ;;  %v4907_v33 = vld [vmem:[%s9050_s12 + $0x150] sm:$0xff] }
 0xae0   : > { %v3766_v8 = vpop.f32.mrf.mxu0  ;;  %4031 = vmatpush1.msra.mxu0 %v4907_v33 }
 0xae1   : > { %v8526_v11 = vsub.f32 %v8467_v20, %v3766_v8  ;;  %5671 = vmatprep.mubr.f32.mxu1 %v3803_v60  ;;  %v3806_v32 = vmul.f32 %v8523_v22, %v8523_v22  ;;  %v4906_v60 = vld [vmem:[%s9050_s12 + $0x148] sm:$0xff]  ;;  %v4904_v8 = vld [vmem:[%s9050_s12 + $0x138] sm:$0xff] }
 0xae2   : > { %v5635_v10 = vpop.f32.mrf.mxu0  ;;  %5672 = vmatmul.mubr.f32.vlgmr.msra.gmra.mxu1 %v3804_v3  ;;  %4032 = vmatprep.subr.mxu0 %v4906_v60  ;;  %v4905_v3 = vld [vmem:[%s9050_s12 + $0x140] sm:$0xff] }
 0xae3   : > { %v3805_v25 = vmul.f32 %v8526_v11, %v8526_v11  ;;  %v8533_v54 = vsub.f32 %v8478_v12, %v5635_v10  ;;  %4033 = vmatpush1.msra.mxu0 %v4905_v3  ;;  %v4903_v10 = vld [vmem:[%s9050_s12 + $0x130] sm:$0xff] }
 0xae4   : > { %v3776_v37 = vpop.f32.mrf.mxu0  ;;  %4034 = vmatprep.subr.mxu0 %v4904_v8 }
 0xae5   : > { %v8536_v7 = vsub.f32 %v8475_v55, %v3776_v37  ;;  %5674 = vmatprep.mubr.f32.mxu1 %v3805_v25  ;;  %v3808_v17 = vmul.f32 %v8533_v54, %v8533_v54  ;;  %4035 = vmatpush1.msra.mxu0 %v4903_v10  ;;  %v4902_v25 = vld [vmem:[%s9050_s12 + $0x128] sm:$0xff]  ;;  %v4900_v37 = vld [vmem:[%s9050_s12 + $0x118] sm:$0xff] }
 0xae6   : > { %v5638_v41 = vpop.f32.mrf.mxu0  ;;  %5675 = vmatmul.mubr.f32.gmra.mxu1 %v3806_v32  ;;  %v4901_v32 = vld [vmem:[%s9050_s12 + $0x120] sm:$0xff]  ;;  %4036 = vmatprep.subr.mxu0 %v4902_v25 }
 0xae7   : > { %v3807_v35 = vmul.f32 %v8536_v7, %v8536_v7  ;;  %v8543_v4 = vsub.f32 %v8486_v29, %v5638_v41  ;;  %v4899_v41 = vld [vmem:[%s9050_s12 + $0x110] sm:$0xff]  ;;  %4037 = vmatpush1.msra.mxu0 %v4901_v32 }
 0xae8   : > { %v3786_v28 = vpop.f32.mrf.mxu0  ;;  %4038 = vmatprep.subr.mxu0 %v4900_v37 }
 0xae9   : > { %v8546_v57 = vsub.f32 %v8483_v18, %v3786_v28  ;;  %5677 = vmatprep.mubr.f32.mxu1 %v3807_v35  ;;  %v3810_v9 = vmul.f32 %v8543_v4, %v8543_v4  ;;  %v4898_v35 = vld [vmem:[%s9050_s12 + $0x108] sm:$0xff]  ;;  %4039 = vmatpush1.msra.mxu0 %v4899_v41  ;;  %v4961_v28 = vld [vmem:[%s9052_s14 + $0x1f8] sm:$0xff]  ;;  %v8651_v41 = vld [vmem:[%s9048_s10 + $0x1] ss:$0 sm:$0xff] }
 0xaea   : > { %5678 = vmatmul.mubr.f32.gmra.mxu1 %v3808_v17  ;;  %v4897_v17 = vld [vmem:[%s9050_s12 + $0x100] sm:$0xff]  ;;  %4040 = vmatprep.subr.mxu0 %v4898_v35 }
 0xaeb   : > { %v3809_v13 = vmul.f32 %v8546_v57, %v8546_v57  ;;  %4041 = vmatpush1.msra.mxu0 %v4897_v17  ;;  %5235 = vmatprep.subr.mxu1 %v4961_v28 }
 0xaec   : > { %5683 = vmatprep.subr.mxu0 %v8178_v39 }
 0xaed   : > { %5680 = vmatprep.mubr.f32.mxu1 %v3809_v13  ;;  %v4945_v13 = vld [vmem:[%s9052_s14 + $0x178] sm:$0xff] }
 0xaee   : > { %5681 = vmatmul.mubr.f32.gmra.mxu1 %v3810_v9  ;;  %v4960_v9 = vld [vmem:[%s9052_s14 + $0x1f0] sm:$0xff] }
 0xaef   : > { %5236 = vmatpush3.msra.mxu1 %v4945_v13  ;;  %v8657_v13 = vld [vmem:[%s9049_s11 + $0x1] ss:$0 sm:$0xff] }
 0xaf0   : > { %5237 = vmatprep.subr.mxu1 %v4960_v9 }
 0xaf1   : > { %5238 = vmatpush3.msra.mxu1 %v4944_v19 }
 0xaf2   : > { %5239 = vmatprep.subr.mxu1 %v4959_v36 }
 0xaf3   : > { %5240 = vmatpush3.msra.mxu1 %v4943_v40 }
 0xba2   : > { %v5673_v52 = vpop.f32.mrf.mxu1 }
 0xba3   : > { %v3883_v58 = vadd.f32 1e-05, %v5673_v52 }
 0xba4   : > { %v3877_v61 = vpop.f32.mrf.mxu1 }
 0xba5   : > { %6015 = vrsqrt.f32 %v3883_v58  ;;  %v3878_v14 = vadd.f32 1e-05, %v3877_v61 }
 0xba6   : > { %v5676_v62 = vpop.f32.mrf.mxu1 }
 0xba7   : > { %6017 = vrsqrt.f32 %v3878_v14  ;;  %v3893_v2 = vadd.f32 1e-05, %v5676_v62 }
 0xba8   : > { %v3887_v46 = vpop.f32.mrf.mxu1 }
 0xba9   : > { %v3888_v34 = vadd.f32 1e-05, %v3887_v46 }
 0xbaa   : > { %v5679_v44 = vpop.f32.mrf.mxu1 }
 0xbab   : > { %6019 = vrsqrt.f32 %v3888_v34  ;;  %v3903_v60 = vadd.f32 1e-05, %v5679_v44  ;;  %v4953_v34 = vld [vmem:[%s9052_s14 + $0x1b8] sm:$0xff] }
 0xbac   : > { %v3897_v24 = vpop.f32.mrf.mxu1  ;;  %6021 = vrsqrt.f32 %v3893_v2  ;;  %v4938_v2 = vld [vmem:[%s9052_s14 + $0x140] sm:$0xff]  ;;  %v4937_v44 = vld [vmem:[%s9052_s14 + $0x138] sm:$0xff] }
 0xbad   : > { %v3898_v45 = vadd.f32 1e-05, %v3897_v24  ;;  %v4952_v24 = vld [vmem:[%s9052_s14 + $0x1b0] sm:$0xff] }
 0xbae   : > { %v5682_v33 = vpop.f32.mrf.mxu1 }
 0xbaf   : > { %6023 = vrsqrt.f32 %v3898_v45  ;;  %v3913_v28 = vadd.f32 1e-05, %v5682_v33  ;;  %v4936_v45 = vld [vmem:[%s9052_s14 + $0x130] sm:$0xff]  ;;  %v4951_v33 = vld [vmem:[%s9052_s14 + $0x1a8] sm:$0xff] }
 0xbb0   : > { %v3907_v8 = vpop.f32.mrf.mxu1  ;;  %6025 = vrsqrt.f32 %v3903_v60  ;;  %v4935_v60 = vld [vmem:[%s9052_s14 + $0x128] sm:$0xff] }
 0xbb1   : > { %v3908_v32 = vadd.f32 1e-05, %v3907_v8  ;;  %v4934_v8 = vld [vmem:[%s9052_s14 + $0x120] sm:$0xff] }
 0xbb2   : > { %v6016_v3 = vpop.eup %6015 }
 0xbb3   : > { %v3925_v37 = vmul.f32 %v6016_v3, %v8513_v5  ;;  %6027 = vrsqrt.f32 %v3908_v32  ;;  %v4950_v3 = vld [vmem:[%s9052_s14 + $0x1a0] sm:$0xff]  ;;  %v4948_v32 = vld [vmem:[%s9052_s14 + $0x190] sm:$0xff] }
 0xbb4   : > { %v6018_v10 = vpop.eup %6017  ;;  %6029 = vrsqrt.f32 %v3913_v28  ;;  %v4930_v28 = vld [vmem:[%s9052_s14 + $0x100] sm:$0xff] }
 0xbb5   : > { %v3924_v25 = vmul.f32 %v6018_v10, %v8516_v43  ;;  %v3941_v9 = vmul.f32 %v8651_v41, %v3925_v37  ;;  %v4949_v10 = vld [vmem:[%s9052_s14 + $0x198] sm:$0xff]  ;;  %v4932_v37 = vld [vmem:[%s9052_s14 + $0x110] sm:$0xff] }
 0xbb7   : > { %v3940_v35 = vmul.f32 %v8651_v41, %v3924_v25  ;;  %v3957_v36 = vadd.f32 %v8657_v13, %v3941_v9  ;;  %v4933_v25 = vld [vmem:[%s9052_s14 + $0x118] sm:$0xff] }
 0xbb8   : > { %v6020_v17 = vpop.eup %6019 }
 0xbb9   : > { %v3956_v43 = vadd.f32 %v8657_v13, %v3940_v35  ;;  %v3926_v5 = vmul.f32 %v6020_v17, %v8526_v11  ;;  %v6022_v19 = vpop.eup %6021  ;;  %v4931_v35 = vld [vmem:[%s9052_s14 + $0x108] sm:$0xff]  ;;  %v4946_v17 = vld [vmem:[%s9052_s14 + $0x180] sm:$0xff] }
 0xbba   : > { %v3927_v52 = vmul.f32 %v6022_v19, %v8523_v22 }
 0xbbb   : > { %4075 = vmatmul.mubr.f32.vlgmr.msra.gmra.mxu0 %v3956_v43  ;;  %v3942_v40 = vmul.f32 %v8651_v41, %v3926_v5  ;;  %v4929_v43 = vld [vmem:[%s9051_s13 + $0x2] sm:$0x3] }
 0xbbc   : > { %4080 = vmatprep.mubr.f32.mxu0 %v6185_v56  ;;  %5684 = vmatpush3.msra.mxu0 %v8178_v39  ;;  %v6024_v58 = vpop.eup %6023  ;;  %v3943_v11 = vmul.f32 %v8651_v41, %v3927_v52  ;;  %v8807_v9 = vrot.slane %v4929_v43, %v2611_v27  ;;  %v8811_v5 = vrot.slane %v4929_v43, %v2615_v16 }
 0xbbd   : > { %5685 = vmatprep.subr.mxu0 %v8192_v0  ;;  %v3958_v39 = vadd.f32 %v8657_v13, %v3942_v40  ;;  %v3928_v61 = vmul.f32 %v6024_v58, %v8536_v7  ;;  %v6026_v22 = vpop.eup %6025 }
 0xbbe   : > { %5686 = vmatpush3.msra.mxu0 %v8192_v0  ;;  %v3959_v0 = vadd.f32 %v8657_v13, %v3943_v11  ;;  %v3929_v14 = vmul.f32 %v6026_v22, %v8533_v54 }
 0xbbf   : > { %4081 = vmatmul.mubr.f32.gmra.mxu0 %v3957_v36  ;;  %5687 = vmatprep.subr.mxu0 %v8200_v21 }
 0xbc0   : > { %4086 = vmatprep.mubr.f32.mxu0 %v6185_v56  ;;  %5688 = vmatpush3.msra.mxu0 %v8200_v21  ;;  %v3944_v21 = vmul.f32 %v8651_v41, %v3928_v61  ;;  %v6028_v7 = vpop.eup %6027 }
 0xbc1   : > { %5689 = vmatprep.subr.mxu0 %v8214_v26  ;;  %v3930_v62 = vmul.f32 %v6028_v7, %v8546_v57  ;;  %v6030_v54 = vpop.eup %6029  ;;  %v4954_v57 = vld [vmem:[%s9052_s14 + $0x1c0] sm:$0xff] }
 0xbc2   : > { %5690 = vmatpush3.msra.mxu0 %v8214_v26  ;;  %v3960_v26 = vadd.f32 %v8657_v13, %v3944_v21  ;;  %v3931_v46 = vmul.f32 %v6030_v54, %v8543_v4  ;;  %v4939_v4 = vld [vmem:[%s9052_s14 + $0x148] sm:$0xff] }
 0xbc3   : > { %4087 = vmatmul.mubr.f32.gmra.mxu0 %v3958_v39  ;;  %5691 = vmatprep.subr.mxu0 %v8222_v38 }
 0xbc4   : > { %4092 = vmatprep.mubr.f32.mxu0 %v6185_v56  ;;  %5692 = vmatpush3.msra.mxu0 %v8222_v38  ;;  %v3945_v38 = vmul.f32 %v8651_v41, %v3929_v14 }
 0xbc5   : > { %5693 = vmatprep.subr.mxu0 %v8236_v50 }
 0xbc6   : > { %5694 = vmatpush3.msra.mxu0 %v8236_v50  ;;  %v3961_v50 = vadd.f32 %v8657_v13, %v3945_v38 }
 0xbc7   : > { %4093 = vmatmul.mubr.f32.gmra.mxu0 %v3959_v0  ;;  %5695 = vmatprep.subr.mxu0 %v8244_v63 }
 0xbc8   : > { %4098 = vmatprep.mubr.f32.mxu0 %v6185_v56  ;;  %5696 = vmatpush3.msra.mxu0 %v8244_v63  ;;  %v3946_v63 = vmul.f32 %v8651_v41, %v3930_v62 }
 0xbc9   : > { %5697 = vmatprep.subr.mxu0 %v8258_v23 }
 0xbca   : > { %5698 = vmatpush3.msra.mxu0 %v8258_v23  ;;  %v3962_v23 = vadd.f32 %v8657_v13, %v3946_v63 }
 0xbcb   : > { %4099 = vmatmul.mubr.f32.gmra.mxu0 %v3960_v26  ;;  %5699 = vmatprep.subr.mxu0 %v8266_v1 }
 0xbcc   : > { %4104 = vmatprep.mubr.f32.mxu0 %v6185_v56  ;;  %5700 = vmatpush3.msra.mxu0 %v8266_v1  ;;  %v3947_v1 = vmul.f32 %v8651_v41, %v3931_v46  ;;  %v4947_v41 = vld [vmem:[%s9052_s14 + $0x188] sm:$0xff] }
 0xbcd   : > { %5701 = vmatprep.subr.mxu0 %v8280_v53 }
 0xbce   : > { %5702 = vmatpush3.msra.mxu0 %v8280_v53  ;;  %v3963_v53 = vadd.f32 %v8657_v13, %v3947_v1  ;;  %v8799_v13 = vld [vmem:[%s9136_s3 + $0x78] sm:$0xff] }
 0xbcf   : > { %4105 = vmatmul.mubr.f32.gmra.mxu0 %v3961_v50  ;;  %5703 = vmatprep.subr.mxu0 %v8288_v6 }
 0xbd0   : > { %4110 = vmatprep.mubr.f32.mxu0 %v6185_v56  ;;  %5704 = vmatpush3.msra.mxu0 %v8288_v6  ;;  %v4942_v6 = vld [vmem:[%s9052_s14 + $0x160] sm:$0xff] }
 0xbd1   : > { %5705 = vmatprep.subr.mxu0 %v8302_v59 }
 0xbd2   : > { %5706 = vmatpush3.msra.mxu0 %v8302_v59  ;;  %v4957_v59 = vld [vmem:[%s9052_s14 + $0x1d8] sm:$0xff] }
 0xbd3   : > { %4111 = vmatmul.mubr.f32.gmra.mxu0 %v3962_v23  ;;  %5707 = vmatprep.subr.mxu0 %v8310_v30 }
 0xbd4   : > { %4116 = vmatprep.mubr.f32.mxu0 %v6185_v56  ;;  %5708 = vmatpush3.msra.mxu0 %v8310_v30  ;;  %v4958_v56 = vld [vmem:[%s9052_s14 + $0x1e0] sm:$0xff]  ;;  %v4941_v30 = vld [vmem:[%s9052_s14 + $0x158] sm:$0xff] }
 0xbd5   : > { %5709 = vmatprep.subr.mxu0 %v8321_v15  ;;  %5241 = vmatprep.subr.mxu1 %v4958_v56 }
 0xbd6   : > { %5710 = vmatpush3.msra.mxu0 %v8321_v15  ;;  %5242 = vmatpush3.msra.mxu1 %v4942_v6  ;;  %v4956_v15 = vld [vmem:[%s9052_s14 + $0x1d0] sm:$0xff] }
 0xbd7   : > { %4117 = vmatmul.mubr.f32.gmra.mxu0 %v3963_v53  ;;  %5711 = vmatprep.subr.mxu0 %v8329_v48 }
 0xbd8   : > { %5712 = vmatpush3.msra.mxu0 %v8329_v48  ;;  %5243 = vmatprep.subr.mxu1 %v4957_v59  ;;  %v4940_v48 = vld [vmem:[%s9052_s14 + $0x150] sm:$0xff] }
 0xbd9   : > { %5713 = vmatprep.subr.mxu0 %v8336_v47  ;;  %5244 = vmatpush3.msra.mxu1 %v4941_v30 }
 0xbda   : > { %5714 = vmatpush3.msra.mxu0 %v8336_v47  ;;  %5245 = vmatprep.subr.mxu1 %v4956_v15  ;;  %v4955_v47 = vld [vmem:[%s9052_s14 + $0x1c8] sm:$0xff] }
 0xbdb   : > { %5246 = vmatpush3.msra.mxu1 %v4940_v48 }
 0xbdc   : > { %5247 = vmatprep.subr.mxu1 %v4955_v47 }
 0xbdd   : > { %5248 = vmatpush3.msra.mxu1 %v4939_v4 }
 0xbde   : > { %5249 = vmatprep.subr.mxu1 %v4954_v57 }
 0xbdf   : > { %5250 = vmatpush3.msra.mxu1 %v4938_v2 }
 0xbe0   : > { %5251 = vmatprep.subr.mxu1 %v4953_v34 }
 0xbe1   : > { %5252 = vmatpush3.msra.mxu1 %v4937_v44 }
 0xbe2   : > { %5253 = vmatprep.subr.mxu1 %v4952_v24 }
 0xbe3   : > { %5254 = vmatpush3.msra.mxu1 %v4936_v45 }
 0xbe4   : > { %5255 = vmatprep.subr.mxu1 %v4951_v33 }
 0xbe5   : > { %5256 = vmatpush3.msra.mxu1 %v4935_v60 }
 0xbe6   : > { %5257 = vmatprep.subr.mxu1 %v4950_v3 }
 0xbe7   : > { %5258 = vmatpush3.msra.mxu1 %v4934_v8 }
 0xbe8   : > { %5259 = vmatprep.subr.mxu1 %v4949_v10 }
 0xbe9   : > { %5260 = vmatpush3.msra.mxu1 %v4933_v25 }
 0xbea   : > { %5261 = vmatprep.subr.mxu1 %v4948_v32 }
 0xbeb   : > { %5262 = vmatpush3.msra.mxu1 %v4932_v37 }
 0xbec   : > { %5263 = vmatprep.subr.mxu1 %v4947_v41 }
 0xbed   : > { %5264 = vmatpush3.msra.mxu1 %v4931_v35 }
 0xbee   : > { %5265 = vmatprep.subr.mxu1 %v4946_v17 }
 0xbef   : > { %5266 = vmatpush3.msra.mxu1 %v4930_v28 }
 0xbf0   : > { %5727 = vmatprep.subr.mxu1 %v8799_v13 }
 0xc7b   : > { %v4076_v19 = vpop.f32.mrf.mxu0 }
 0xc7c   : > { %v4077_v36 = vadd.f32 %v4076_v19, %v8807_v9 }
 0xc7d   : > { %v4078_v40 = vpop.f32.mrf.mxu0 }
 0xc7e   : > { %v4139_v52 = vmul.f32 0.70710677, %v4077_v36  ;;  %v4079_v58 = vadd.f32 %v4078_v40, %v8811_v5  ;;  %v4123_v44 = vmul.f32 0.5, %v4077_v36 }
 0xc7f   : > { %v4082_v39 = vpop.f32.mrf.mxu0 }
 0xc80   : > { %6031 = verf.f32 %v4139_v52  ;;  %v4140_v11 = vmul.f32 0.70710677, %v4079_v58  ;;  %v4083_v61 = vadd.f32 %v4082_v39, %v8807_v9  ;;  %v4124_v4 = vmul.f32 0.5, %v4079_v58 }
 0xc81   : > { %v4084_v22 = vpop.f32.mrf.mxu0 }
 0xc82   : > { %6033 = verf.f32 %v4140_v11  ;;  %v4141_v27 = vmul.f32 0.70710677, %v4083_v61  ;;  %v4085_v0 = vadd.f32 %v4084_v22, %v8811_v5  ;;  %v4125_v19 = vmul.f32 0.5, %v4083_v61  ;;  %v6101_v22 = vld [vmem:[%s9136_s3 + $0x70] sm:$0xff] }
 0xc83   : > { %v4088_v42 = vpop.f32.mrf.mxu0 }
 0xc84   : > { %6035 = verf.f32 %v4141_v27  ;;  %v4142_v16 = vmul.f32 0.70710677, %v4085_v0  ;;  %v8818_v21 = vadd.f32 %v4088_v42, %v8807_v9  ;;  %v4126_v17 = vmul.f32 0.5, %v4085_v0 }
 0xc85   : > { %v4090_v14 = vpop.f32.mrf.mxu0 }
 0xc86   : > { %6037 = verf.f32 %v4142_v16  ;;  %v4143_v7 = vmul.f32 0.70710677, %v8818_v21  ;;  %v8822_v26 = vadd.f32 %v4090_v14, %v8811_v5 }
 0xc87   : > { %v4094_v38 = vpop.f32.mrf.mxu0 }
 0xc88   : > { %6039 = verf.f32 %v4143_v7  ;;  %v4144_v62 = vmul.f32 0.70710677, %v8822_v26  ;;  %v8826_v54 = vadd.f32 %v4094_v38, %v8807_v9  ;;  %v4128_v16 = vmul.f32 0.5, %v8822_v26  ;;  %v6102_v38 = vld [vmem:[%s9136_s3 + $0x68] sm:$0xff] }
 0xc89   : > { %v4096_v50 = vpop.f32.mrf.mxu0 }
 0xc8a   : > { %6041 = verf.f32 %v4144_v62  ;;  %v4145_v63 = vmul.f32 0.70710677, %v8826_v54  ;;  %v8830_v46 = vadd.f32 %v4096_v50, %v8811_v5 }
 0xc8b   : > { %v4100_v23 = vpop.f32.mrf.mxu0 }
 0xc8c   : > { %6043 = verf.f32 %v4145_v63  ;;  %v4146_v1 = vmul.f32 0.70710677, %v8830_v46  ;;  %v8834_v53 = vadd.f32 %v4100_v23, %v8807_v9 }
 0xc8d   : > { %v6032_v56 = vpop.eup %6031  ;;  %v4102_v6 = vpop.f32.mrf.mxu0 }
 0xc8e   : > { %6045 = verf.f32 %v4146_v1  ;;  %v4147_v59 = vmul.f32 0.70710677, %v8834_v53  ;;  %v4171_v15 = vadd.f32 1.0, %v6032_v56  ;;  %v8838_v48 = vadd.f32 %v4102_v6, %v8811_v5  ;;  %v6103_v6 = vld [vmem:[%s9136_s3 + $0x60] sm:$0xff] }
 0xc8f   : > { %v6034_v30 = vpop.eup %6033  ;;  %v4106_v47 = vpop.f32.mrf.mxu0 }
 0xc90   : > { %6047 = verf.f32 %v4147_v59  ;;  %v8841_v57 = vadd.f32 %v4106_v47, %v8807_v9  ;;  %v4172_v2 = vadd.f32 1.0, %v6034_v30  ;;  %v4148_v24 = vmul.f32 0.70710677, %v8838_v48  ;;  %v6104_v30 = vld [vmem:[%s9136_s3 + $0x58] sm:$0xff] }
 0xc91   : > { %v6036_v34 = vpop.eup %6035  ;;  %v4108_v45 = vpop.f32.mrf.mxu0  ;;  %v4187_v10 = vmul.f32 %v4171_v15, %v4123_v44 }
 0xc92   : > { %v4149_v33 = vmul.f32 0.70710677, %v8841_v57  ;;  %v8846_v60 = vadd.f32 %v4108_v45, %v8811_v5  ;;  %v4188_v3 = vmul.f32 %v4172_v2, %v4124_v4  ;;  %6049 = verf.f32 %v4148_v24  ;;  %v6105_v2 = vld [vmem:[%s9136_s3 + $0x50] sm:$0xff]  ;;  %v6106_v45 = vld [vmem:[%s9136_s3 + $0x48] sm:$0xff] }
 0xc93   : > { %v6038_v8 = vpop.eup %6037  ;;  %v4112_v25 = vpop.f32.mrf.mxu0  ;;  %v4173_v41 = vadd.f32 1.0, %v6036_v34  ;;  %v4131_v24 = vmul.f32 0.5, %v8834_v53 }
 0xc94   : > { %6051 = verf.f32 %v4149_v33  ;;  %v4150_v32 = vmul.f32 0.70710677, %v8846_v60  ;;  %v8850_v37 = vadd.f32 %v4112_v25, %v8807_v9  ;;  %4308 = vmatprep.mubr.f32.mxu1 %v4188_v3  ;;  %v4174_v43 = vadd.f32 1.0, %v6038_v8 }
 0xc95   : > { %v6040_v35 = vpop.eup %6039  ;;  %v4114_v28 = vpop.f32.mrf.mxu0  ;;  %4309 = vmatmul.mubr.f32.vlgmr.msra.gmra.mxu1 %v4187_v10  ;;  %v4189_v0 = vmul.f32 %v4173_v41, %v4125_v19  ;;  %v4134_v8 = vmul.f32 0.5, %v8846_v60  ;;  %v4133_v41 = vmul.f32 0.5, %v8841_v57 }
 0xc96   : > { %6053 = verf.f32 %v4150_v32  ;;  %v4151_v36 = vmul.f32 0.70710677, %v8850_v37  ;;  %v8854_v40 = vadd.f32 %v4114_v28, %v8811_v5  ;;  %5728 = vmatpush3.msra.mxu1 %v8799_v13  ;;  %v4190_v39 = vmul.f32 %v4174_v43, %v4126_v17  ;;  %v6108_v17 = vld [vmem:[%s9136_s3 + $0x38] sm:$0xff] }
 0xc97   : > { %v6042_v52 = vpop.eup %6041  ;;  %v4118_v58 = vpop.f32.mrf.mxu0  ;;  %v4175_v11 = vadd.f32 1.0, %v6040_v35  ;;  %5729 = vmatprep.subr.mxu1 %v6101_v22  ;;  %v4127_v13 = vmul.f32 0.5, %v8818_v21  ;;  %v4130_v21 = vmul.f32 0.5, %v8830_v46 }
 0xc98   : > { %6055 = verf.f32 %v4151_v36  ;;  %v4152_v61 = vmul.f32 0.70710677, %v8854_v40  ;;  %v8862_v27 = vadd.f32 %v4118_v58, %v8807_v9  ;;  %5730 = vmatpush3.msra.mxu1 %v6101_v22  ;;  %4313 = vmatprep.mubr.f32.mxu1 %v4190_v39  ;;  %v4176_v7 = vadd.f32 1.0, %v6042_v52  ;;  %v6109_v52 = vld [vmem:[%s9136_s3 + $0x30] sm:$0xff] }
 0xc99   : > { %v6044_v42 = vpop.eup %6043  ;;  %v4120_v14 = vpop.f32.mrf.mxu0  ;;  %5731 = vmatprep.subr.mxu1 %v6102_v38  ;;  %4314 = vmatmul.mubr.f32.gmra.mxu1 %v4189_v0  ;;  %v4191_v26 = vmul.f32 %v4175_v11, %v4127_v13  ;;  %v4136_v28 = vmul.f32 0.5, %v8854_v40  ;;  %v4135_v58 = vmul.f32 0.5, %v8850_v37  ;;  %v6110_v11 = vld [vmem:[%s9136_s3 + $0x28] sm:$0xff]  ;;  %v6111_v13 = vld [vmem:[%s9136_s3 + $0x20] sm:$0xff] }
 0xc9a   : > { %6057 = verf.f32 %v4152_v61  ;;  %v4153_v62 = vmul.f32 0.70710677, %v8862_v27  ;;  %v8871_v9 = vadd.f32 %v4120_v14, %v8811_v5  ;;  %v4192_v63 = vmul.f32 %v4176_v7, %v4128_v16  ;;  %5732 = vmatpush3.msra.mxu1 %v6102_v38  ;;  %v6112_v14 = vld [vmem:[%s9136_s3 + $0x18] sm:$0xff]  ;;  %v6113_v38 = vld [vmem:[%s9136_s3 + $0x10] sm:$0xff] }
 0xc9b   : > { %v6046_v50 = vpop.eup %6045  ;;  %v4177_v56 = vadd.f32 1.0, %v6044_v42  ;;  %5733 = vmatprep.subr.mxu1 %v6103_v6  ;;  %v4129_v5 = vmul.f32 0.5, %v8826_v54  ;;  %v4132_v54 = vmul.f32 0.5, %v8838_v48  ;;  %v6107_v48 = vld [vmem:[%s9136_s3 + $0x40] sm:$0xff]  ;;  %v4137_v37 = vmul.f32 0.5, %v8862_v27  ;;  %v6114_v27 = vld [vmem:[%s9136_s3 + $0x8] sm:$0xff] }
 0xc9c   : > { %6059 = verf.f32 %v4153_v62  ;;  %v4154_v23 = vmul.f32 0.70710677, %v8871_v9  ;;  %v4178_v1 = vadd.f32 1.0, %v6046_v50  ;;  %4318 = vmatprep.mubr.f32.mxu1 %v4192_v63  ;;  %5734 = vmatpush3.msra.mxu1 %v6103_v6  ;;  %v4138_v22 = vmul.f32 0.5, %v8871_v9  ;;  %v6115_v62 = vld [vmem:[%s9136_s3] sm:$0xff] }
 0xc9d   : > { %v6048_v59 = vpop.eup %6047  ;;  %4319 = vmatmul.mubr.f32.gmra.mxu1 %v4191_v26  ;;  %5735 = vmatprep.subr.mxu1 %v6104_v30  ;;  %v4193_v47 = vmul.f32 %v4177_v56, %v4129_v5  ;;  %v4963_v50 = vld [vmem:[%s9053_s15 + $0x1] ss:$0 sm:$0xff] }
 0xc9e   : > { %6061 = verf.f32 %v4154_v23  ;;  %v4194_v46 = vmul.f32 %v4178_v1, %v4130_v21  ;;  %5736 = vmatpush3.msra.mxu1 %v6104_v30  ;;  %v4179_v4 = vadd.f32 1.0, %v6048_v59 }
 0xc9f   : > { %v6050_v15 = vpop.eup %6049  ;;  %5737 = vmatprep.subr.mxu1 %v6105_v2 }
 0xca0   : > { %4323 = vmatprep.mubr.f32.mxu1 %v4194_v46  ;;  %v4180_v44 = vadd.f32 1.0, %v6050_v15  ;;  %5738 = vmatpush3.msra.mxu1 %v6105_v2  ;;  %v4195_v10 = vmul.f32 %v4179_v4, %v4131_v24 }
 0xca1   : > { %v6052_v34 = vpop.eup %6051  ;;  %4324 = vmatmul.mubr.f32.gmra.mxu1 %v4193_v47  ;;  %5739 = vmatprep.subr.mxu1 %v6106_v45 }
 0xca2   : > { %v4196_v3 = vmul.f32 %v4180_v44, %v4132_v54  ;;  %5740 = vmatpush3.msra.mxu1 %v6106_v45  ;;  %v4181_v32 = vadd.f32 1.0, %v6052_v34 }
 0xca3   : > { %v6054_v33 = vpop.eup %6053  ;;  %5741 = vmatprep.subr.mxu1 %v6107_v48 }
 0xca4   : > { %v4182_v25 = vadd.f32 1.0, %v6054_v33  ;;  %4328 = vmatprep.mubr.f32.mxu1 %v4196_v3  ;;  %5742 = vmatpush3.msra.mxu1 %v6107_v48  ;;  %v4197_v43 = vmul.f32 %v4181_v32, %v4133_v41 }
 0xca5   : > { %v6056_v53 = vpop.eup %6055  ;;  %4329 = vmatmul.mubr.f32.gmra.mxu1 %v4195_v10  ;;  %5743 = vmatprep.subr.mxu1 %v6108_v17 }
 0xca6   : > { %v4198_v35 = vmul.f32 %v4182_v25, %v4134_v8  ;;  %5744 = vmatpush3.msra.mxu1 %v6108_v17  ;;  %v4183_v36 = vadd.f32 1.0, %v6056_v53 }
 0xca7   : > { %v6058_v60 = vpop.eup %6057  ;;  %5745 = vmatprep.subr.mxu1 %v6109_v52 }
 0xca8   : > { %4333 = vmatprep.mubr.f32.mxu1 %v4198_v35  ;;  %v4184_v19 = vadd.f32 1.0, %v6058_v60  ;;  %5746 = vmatpush3.msra.mxu1 %v6109_v52  ;;  %v4199_v61 = vmul.f32 %v4183_v36, %v4135_v58 }
 0xca9   : > { %v6060_v57 = vpop.eup %6059  ;;  %4334 = vmatmul.mubr.f32.gmra.mxu1 %v4197_v43  ;;  %5747 = vmatprep.subr.mxu1 %v6110_v11 }
 0xcaa   : > { %v4200_v39 = vmul.f32 %v4184_v19, %v4136_v28  ;;  %5748 = vmatpush3.msra.mxu1 %v6110_v11  ;;  %v4185_v42 = vadd.f32 1.0, %v6060_v57 }
 0xcab   : > { %v6062_v40 = vpop.eup %6061  ;;  %5749 = vmatprep.subr.mxu1 %v6111_v13 }
 0xcac   : > { %4338 = vmatprep.mubr.f32.mxu1 %v4200_v39  ;;  %v4186_v0 = vadd.f32 1.0, %v6062_v40  ;;  %5750 = vmatpush3.msra.mxu1 %v6111_v13  ;;  %v4201_v7 = vmul.f32 %v4185_v42, %v4137_v37 }
 0xcad   : > { %4339 = vmatmul.mubr.f32.gmra.mxu1 %v4199_v61  ;;  %5751 = vmatprep.subr.mxu1 %v6112_v14 }
 0xcae   : > { %v4202_v16 = vmul.f32 %v4186_v0, %v4138_v22  ;;  %5752 = vmatpush3.msra.mxu1 %v6112_v14 }
 0xcaf   : > { %5753 = vmatprep.subr.mxu1 %v6113_v38 }
 0xcb0   : > { %4343 = vmatprep.mubr.f32.mxu1 %v4202_v16  ;;  %5754 = vmatpush3.msra.mxu1 %v6113_v38 }
 0xcb1   : > { %4344 = vmatmul.mubr.f32.gmra.mxu1 %v4201_v7  ;;  %5755 = vmatprep.subr.mxu1 %v6114_v27 }
 0xcb2   : > { %5756 = vmatpush3.msra.mxu1 %v6114_v27 }
 0xcb3   : > { %5757 = vmatprep.subr.mxu1 %v6115_v62 }
 0xcb4   : > { %5758 = vmatpush3.msra.mxu1 %v6115_v62 }
 0xd55   : > { %v5267_v9 = vpop.f32.mrf.mxu1 }
 0xd57   : > { %v5268_v21 = vpop.f32.mrf.mxu1 }
 0xd58   : > { %v5269_v63 = vadd.f32 %v5268_v21, %v5267_v9 }
 0xd59   : > { %v5270_v23 = vpop.f32.mrf.mxu1 }
 0xd5a   : > { %v4311_v26 = vadd.f32 %v5269_v63, %v4963_v50 }
 0xd5b   : > { %v5271_v1 = vpop.f32.mrf.mxu1 }
 0xd5c   : > { %v4349_v56 = vadd.f32 %v4311_v26, %v8459_v31  ;;  %v5272_v6 = vadd.f32 %v5271_v1, %v5270_v23 }
 0xd5d   : > { %v5273_v59 = vpop.f32.mrf.mxu1 }
 0xd5e   : > { %5715 = vmatprep.mubr.f32.mxu0 %v4349_v56  ;;  %v4316_v5 = vadd.f32 %v5272_v6, %v4963_v50 }
 0xd5f   : > { %v5274_v46 = vpop.f32.mrf.mxu1 }
 0xd60   : > { %v4350_v30 = vadd.f32 %v4316_v5, %v8462_v51  ;;  %v5275_v15 = vadd.f32 %v5274_v46, %v5273_v59 }
 0xd61   : > { %v5276_v47 = vpop.f32.mrf.mxu1 }
 0xd62   : > { %v4321_v4 = vadd.f32 %v5275_v15, %v4963_v50  ;;  %5716 = vmatmul.mubr.f32.vlgmr.msra.gmra.mxu0 %v4350_v30 }
 0xd63   : > { %v5277_v2 = vpop.f32.mrf.mxu1 }
 0xd64   : > { %v5278_v34 = vadd.f32 %v5277_v2, %v5276_v47  ;;  %v4351_v54 = vadd.f32 %v4321_v4, %v8467_v20 }
 0xd65   : > { %v5279_v44 = vpop.f32.mrf.mxu1 }
 0xd66   : > { %v4326_v24 = vadd.f32 %v5278_v34, %v4963_v50  ;;  %5718 = vmatprep.mubr.f32.mxu0 %v4351_v54  ;;  %v4964_v34 = vld [vmem:[%s9054_s16] ss:$0 sm:$0xff] }
 0xd67   : > { %v5280_v45 = vpop.f32.mrf.mxu1 }
 0xd68   : > { %v5281_v31 = vadd.f32 %v5280_v45, %v5279_v44  ;;  %v4352_v33 = vadd.f32 %v4326_v24, %v8470_v49  ;;  %v4965_v44 = vld [vmem:[%s9055_s17] ss:$0 sm:$0xff] }
 0xd69   : > { %v5282_v3 = vpop.f32.mrf.mxu1 }
 0xd6a   : > { %v4331_v8 = vadd.f32 %v5281_v31, %v4963_v50  ;;  %5719 = vmatmul.mubr.f32.gmra.mxu0 %v4352_v33 }
 0xd6b   : > { %v5283_v10 = vpop.f32.mrf.mxu1 }
 0xd6c   : > { %v5284_v51 = vadd.f32 %v5283_v10, %v5282_v3  ;;  %v4353_v25 = vadd.f32 %v4331_v8, %v8475_v55 }
 0xd6d   : > { %v5285_v32 = vpop.f32.mrf.mxu1 }
 0xd6e   : > { %v4336_v48 = vadd.f32 %v5284_v51, %v4963_v50  ;;  %5721 = vmatprep.mubr.f32.mxu0 %v4353_v25 }
 0xd6f   : > { %v5286_v53 = vpop.f32.mrf.mxu1 }
 0xd70   : > { %v5287_v41 = vadd.f32 %v5286_v53, %v5285_v32  ;;  %v4354_v20 = vadd.f32 %v4336_v48, %v8478_v12 }
 0xd71   : > { %v5288_v35 = vpop.f32.mrf.mxu1 }
 0xd72   : > { %v4341_v17 = vadd.f32 %v5287_v41, %v4963_v50  ;;  %5722 = vmatmul.mubr.f32.gmra.mxu0 %v4354_v20 }
 0xd73   : > { %v5289_v60 = vpop.f32.mrf.mxu1 }
 0xd74   : > { %v5290_v28 = vadd.f32 %v5289_v60, %v5288_v35  ;;  %v4355_v49 = vadd.f32 %v4341_v17, %v8483_v18 }
 0xd76   : > { %v4346_v43 = vadd.f32 %v5290_v28, %v4963_v50  ;;  %5724 = vmatprep.mubr.f32.mxu0 %v4355_v49 }
 0xd78   : > { %v4356_v19 = vadd.f32 %v4346_v43, %v8486_v29 }
 0xd7a   : > { %5725 = vmatmul.mubr.f32.gmra.mxu0 %v4356_v19 }
 0xe22   : > { %v5717_v55 = vpop.f32.mrf.mxu0 }
 0xe23   : > { %v4463_v36 = vsub.f32 %v4350_v30, %v5717_v55 }
 0xe24   : > { %v4423_v52 = vpop.f32.mrf.mxu0 }
 0xe25   : > { %v4462_v57 = vsub.f32 %v4349_v56, %v4423_v52  ;;  %v4471_v39 = vmul.f32 %v4463_v36, %v4463_v36 }
 0xe27   : > { %v4470_v58 = vmul.f32 %v4462_v57, %v4462_v57 }
 0xe29   : > { %5759 = vmatprep.mubr.f32.mxu1 %v4470_v58 }
 0xe2a   : > { %v5720_v12 = vpop.f32.mrf.mxu0  ;;  %5760 = vmatmul.mubr.f32.vlgmr.msra.gmra.mxu1 %v4471_v39 }
 0xe2b   : > { %v4465_v11 = vsub.f32 %v4352_v33, %v5720_v12 }
 0xe2c   : > { %v4433_v40 = vpop.f32.mrf.mxu0 }
 0xe2d   : > { %v4464_v22 = vsub.f32 %v4351_v54, %v4433_v40  ;;  %v4473_v0 = vmul.f32 %v4465_v11, %v4465_v11 }
 0xe2f   : > { %v4472_v61 = vmul.f32 %v4464_v22, %v4464_v22 }
 0xe31   : > { %5762 = vmatprep.mubr.f32.mxu1 %v4472_v61 }
 0xe32   : > { %v5723_v18 = vpop.f32.mrf.mxu0  ;;  %5763 = vmatmul.mubr.f32.gmra.mxu1 %v4473_v0 }
 0xe33   : > { %v8934_v42 = vsub.f32 %v4354_v20, %v5723_v18 }
 0xe34   : > { %v4443_v29 = vpop.f32.mrf.mxu0 }
 0xe35   : > { %v4466_v13 = vsub.f32 %v4353_v25, %v4443_v29  ;;  %v4475_v16 = vmul.f32 %v8934_v42, %v8934_v42 }
 0xe37   : > { %v4474_v37 = vmul.f32 %v4466_v13, %v4466_v13 }
 0xe39   : > { %5765 = vmatprep.mubr.f32.mxu1 %v4474_v37 }
 0xe3a   : > { %v5726_v14 = vpop.f32.mrf.mxu0  ;;  %5766 = vmatmul.mubr.f32.gmra.mxu1 %v4475_v16 }
 0xe3b   : > { %v8938_v7 = vsub.f32 %v4356_v19, %v5726_v14 }
 0xe3c   : > { %v4453_v38 = vpop.f32.mrf.mxu0 }
 0xe3d   : > { %v4468_v27 = vsub.f32 %v4355_v49, %v4453_v38  ;;  %v4477_v9 = vmul.f32 %v8938_v7, %v8938_v7 }
 0xe3f   : > { %v4476_v62 = vmul.f32 %v4468_v27, %v4468_v27 }
 0xe41   : > { %5768 = vmatprep.mubr.f32.mxu1 %v4476_v62 }
 0xe42   : > { %5769 = vmatmul.mubr.f32.gmra.mxu1 %v4477_v9 }
 0xeea   : > { %v5761_v50 = vpop.f32.mrf.mxu1 }
 0xeeb   : > { %v4550_v21 = vadd.f32 1e-05, %v5761_v50 }
 0xeec   : > { %v4544_v63 = vpop.f32.mrf.mxu1 }
 0xeed   : > { %6063 = vrsqrt.f32 %v4550_v21  ;;  %v4545_v26 = vadd.f32 1e-05, %v4544_v63 }
 0xeef   : > { %6065 = vrsqrt.f32 %v4545_v26 }
 0xef2   : > { %v5764_v23 = vpop.f32.mrf.mxu1 }
 0xef3   : > { %v4560_v1 = vadd.f32 1e-05, %v5764_v23 }
 0xef4   : > { %v4554_v56 = vpop.f32.mrf.mxu1 }
 0xef5   : > { %6067 = vrsqrt.f32 %v4560_v1  ;;  %v4555_v6 = vadd.f32 1e-05, %v4554_v56 }
 0xef7   : > { %6069 = vrsqrt.f32 %v4555_v6 }
 0xefa   : > { %v6064_v59 = vpop.eup %6063  ;;  %v5767_v5 = vpop.f32.mrf.mxu1 }
 0xefb   : > { %v4570_v46 = vadd.f32 1e-05, %v5767_v5  ;;  %v4592_v47 = vmul.f32 %v6064_v59, %v4463_v36 }
 0xefc   : > { %v6066_v30 = vpop.eup %6065  ;;  %v4564_v15 = vpop.f32.mrf.mxu1 }
 0xefd   : > { %6071 = vrsqrt.f32 %v4570_v46  ;;  %v4565_v4 = vadd.f32 1e-05, %v4564_v15  ;;  %v4591_v2 = vmul.f32 %v6066_v30, %v4462_v57  ;;  %v4607_v24 = vmul.f32 %v4964_v34, %v4592_v47 }
 0xeff   : > { %6073 = vrsqrt.f32 %v4565_v4  ;;  %v4606_v54 = vmul.f32 %v4964_v34, %v4591_v2  ;;  %v4622_v51 = vadd.f32 %v4965_v44, %v4607_v24 }
 0xf01   : > { %v4621_v45 = vadd.f32 %v4965_v44, %v4606_v54 }
 0xf02   : > { %v6068_v31 = vpop.eup %6067  ;;  %v5770_v33 = vpop.f32.mrf.mxu1 }
 0xf03   : > { %v4580_v3 = vadd.f32 1e-05, %v5770_v33  ;;  %4629 = vxpose.xlu1.b32.start [1/8] (short) %v4621_v45, 128  ;;  %v4594_v48 = vmul.f32 %v6068_v31, %v4465_v11 }
 0xf04   : > { %v6070_v8 = vpop.eup %6069  ;;  %v4574_v10 = vpop.f32.mrf.mxu1 }
 0xf05   : > { %6075 = vrsqrt.f32 %v4580_v3  ;;  %v4575_v25 = vadd.f32 1e-05, %v4574_v10  ;;  %v4593_v32 = vmul.f32 %v6070_v8, %v4464_v22  ;;  %v4609_v20 = vmul.f32 %v4964_v34, %v4594_v48 }
 0xf07   : > { %6077 = vrsqrt.f32 %v4575_v25  ;;  %4630 = vxpose.xlu1.b32.cont [2/8] (short) %v4622_v51, 128  ;;  %v4608_v53 = vmul.f32 %v4964_v34, %v4593_v32  ;;  %v4624_v60 = vadd.f32 %v4965_v44, %v4609_v20 }
 0xf09   : > { %v4623_v41 = vadd.f32 %v4965_v44, %v4608_v53 }
 0xf0a   : > { %v6072_v35 = vpop.eup %6071 }
 0xf0b   : > { %4631 = vxpose.xlu1.b32.cont [3/8] (short) %v4623_v41, 128  ;;  %v4596_v49 = vmul.f32 %v6072_v35, %v8934_v42 }
 0xf0c   : > { %v6074_v17 = vpop.eup %6073 }
 0xf0d   : > { %v4595_v28 = vmul.f32 %v6074_v17, %v4466_v13  ;;  %v4611_v55 = vmul.f32 %v4964_v34, %v4596_v49 }
 0xf0f   : > { %4632 = vxpose.xlu1.b32.cont [4/8] (short) %v4624_v60, 128  ;;  %v4610_v43 = vmul.f32 %v4964_v34, %v4595_v28  ;;  %v4626_v57 = vadd.f32 %v4965_v44, %v4611_v55 }
 0xf11   : > { %v4625_v19 = vadd.f32 %v4965_v44, %v4610_v43 }
 0xf12   : > { %v6076_v36 = vpop.eup %6075 }
 0xf13   : > { %4633 = vxpose.xlu1.b32.cont [5/8] (short) %v4625_v19, 128  ;;  %v4598_v39 = vmul.f32 %v6076_v36, %v8938_v7 }
 0xf14   : > { %v6078_v52 = vpop.eup %6077 }
 0xf15   : > { %v4597_v58 = vmul.f32 %v6078_v52, %v4468_v27  ;;  %v4613_v40 = vmul.f32 %v4964_v34, %v4598_v39 }
 0xf17   : > { %4634 = vxpose.xlu1.b32.cont [6/8] (short) %v4626_v57, 128  ;;  %v4612_v12 = vmul.f32 %v4964_v34, %v4597_v58  ;;  %v4628_v22 = vadd.f32 %v4965_v44, %v4613_v40 }
 0xf19   : > { %v4627_v11 = vadd.f32 %v4965_v44, %v4612_v12 }
 0xf1b   : > { %4635 = vxpose.xlu1.b32.cont [7/8] (short) %v4627_v11, 128 }
 0xf1f   : > { %4636 = vxpose.xlu1.b32.end [8/8] (short) %v4628_v22, 128 }
 0xf7f   : > { %v4645_v61 = vpop.trf.xlu1 }
 0xf80   : > { %4661 = vst.msk [vmem:[%s8953_s23] sm:$0xff] %vm1548_vm0, %v4645_v61 }
 0xf83   : > { %v4646_v0 = vpop.trf.xlu1 }
 0xf84   : > { %4662 = vst.msk [vmem:[%s8953_s23 + $0x8] sm:$0xff] %vm1548_vm0, %v4646_v0 }
 0xf87   : > { %v4647_v18 = vpop.trf.xlu1 }
 0xf88   : > { %4663 = vst.msk [vmem:[%s8953_s23 + $0x10] sm:$0xff] %vm1548_vm0, %v4647_v18 }
 0xf8b   : > { %v4648_v42 = vpop.trf.xlu1 }
 0xf8c   : > { %4664 = vst.msk [vmem:[%s8953_s23 + $0x18] sm:$0xff] %vm1548_vm0, %v4648_v42 }
 0xf8f   : > { %v4649_v29 = vpop.trf.xlu1 }
 0xf90   : > { %4966 = vst.msk [vmem:[%s8953_s23 + $0x20] sm:$0xff] %vm1548_vm0, %v4649_v29 }
 0xf93   : > { %v4650_v13 = vpop.trf.xlu1 }
 0xf94   : > { %4967 = vst.msk [vmem:[%s8953_s23 + $0x28] sm:$0xff] %vm1548_vm0, %v4650_v13 }
 0xf97   : > { %v4651_v37 = vpop.trf.xlu1 }
 0xf98   : > { %4968 = vst.msk [vmem:[%s8953_s23 + $0x30] sm:$0xff] %vm1548_vm0, %v4651_v37 }
 0xf9b   : > { %v4652_v16 = vpop.trf.xlu1 }
 0xf9c   : > { %4969 = vst.msk [vmem:[%s8953_s23 + $0x38] sm:$0xff] %vm1548_vm0, %v4652_v16 }
 0xf9f   : > { %v4653_v14 = vpop.trf.xlu1 }
 0xfa0   : > { %4970 = vst.msk [vmem:[%s8953_s23 + $0x40] sm:$0xff] %vm1548_vm0, %v4653_v14 }
 0xfa3   : > { %v4654_v7 = vpop.trf.xlu1 }
 0xfa4   : > { %4971 = vst.msk [vmem:[%s8953_s23 + $0x48] sm:$0xff] %vm1548_vm0, %v4654_v7 }
 0xfa7   : > { %v4655_v38 = vpop.trf.xlu1 }
 0xfa8   : > { %4972 = vst.msk [vmem:[%s8953_s23 + $0x50] sm:$0xff] %vm1548_vm0, %v4655_v38 }
 0xfab   : > { %v4656_v27 = vpop.trf.xlu1 }
 0xfac   : > { %4973 = vst.msk [vmem:[%s8953_s23 + $0x58] sm:$0xff] %vm1548_vm0, %v4656_v27 }
 0xfaf   : > { %v4657_v62 = vpop.trf.xlu1 }
 0xfb0   : > { %4974 = vst.msk [vmem:[%s8953_s23 + $0x60] sm:$0xff] %vm1548_vm0, %v4657_v62 }
 0xfb3   : > { %v4658_v9 = vpop.trf.xlu1 }
 0xfb4   : > { %4975 = vst.msk [vmem:[%s8953_s23 + $0x68] sm:$0xff] %vm1548_vm0, %v4658_v9 }
 0xfb7   : > { %v4659_v50 = vpop.trf.xlu1 }
 0xfb8   : > { %4976 = vst.msk [vmem:[%s8953_s23 + $0x70] sm:$0xff] %vm1548_vm0, %v4659_v50 }
 0xfbb   : > { %v4660_v21 = vpop.trf.xlu1 }
 0xfbc   : > { %4977 = vst.msk [vmem:[%s8953_s23 + $0x78] sm:$0xff] %vm1548_vm0, %v4660_v21 }
 0xfbd   : > { %6129 = shalt.err (!%p6126_p3)
}
 0xfbe   : > { %s6130_s24 = scalar_lea.hbm %s8990_s1, 2048  ;;  %s6134_s4 = scalar_lea.hbm %s9056_s18, 4096 }
 0xfbf   : > { %p6131_p4 = scmp.ne.s32.totalorder %s8990_s1, %s6130_s24  ;;  %p6135_p9 = scmp.lt.s32.totalorder %s8990_s1, %s9056_s18 }
 0xfc0   : > { %p6136_p10 = scmp.lt.s32.totalorder %s6134_s4, %s6130_s24 }
 0xfc1   : > { %p6132_p7 = pnand %p6131_p4, %p6322_p5 }
 0xfc2   : > { %p6137_p11 = por %p6136_p10, %p6135_p9 }
 0xfc3   : > { %p6133_p8 = pneg %p6132_p7 }
 0xfc5   : > { %p6138_p12 = pnand %p6137_p11, %p6133_p8 }
 0xfc7   : > { %6141 = shalt.err (!%p6138_p12)
}
 0xfc8   : > { %s6187_s0 = smov 128   ;;  %s6188_s27 = smov 8  }
 0xfc9   : > { %5771 = dma.vmem_to_hbm [thread:$0]  (%p6322_p5), %s8992_s19, 2048, %s8990_s1, %s8998_s20, %s6187_s0, %s6187_s0, %s6188_s27  }
 0xfca PF: > { %s9137_s29 = sld [smem:[#allocation5_spill]]  ;;  %p5777_p13 = scmp.ge.s32.totalorder %s6176_s30, 2 }
 0xfcc   : > { %p5774_p0 = pnand %p5777_p13, %p6326_p6 }
 0xfce   : > { %p5775_p1 = pneg %p5774_p0 }
 0xfd0   : > { %s4710_s25 = sand.u32 1, %s9137_s29  }
 0xfd1   : > { %s4711_s3 = scalar_lea.sflag [#allocation3], %s4710_s25 }
 0xfd2   : > { %6159 = dma.done.wait (%p5775_p1), %s4711_s3, 2048  }
 0xfd3   : > { %6161 = vsyncadd (%p5775_p1), %s4711_s3, 4294965248  ;;  %s9139_s30 = sld [smem:[#allocation7_spill]]  ;;  %s9142_s27 = smov %s6168_s28 }
 0xfd4   : > { %s9140_s24 = sld [smem:[#allocation6_spill]] }
 0xfd5   : > { %s9141_s29 = sld [smem:[#allocation8_spill]] }
 0xfd9   : > { %p28_p2 = scmp.ge.s32.totalorder %s9139_s30, 4  }
 0xfda   : > { %s9143_s28 = smov %s9140_s24 }
 0xfdb   :  { %30 = sbr.rel (!%p28_p2) target bundleno = 9 (0x9), region = 145 }
 0xfe0   :  { %4716 = vsyncpa [#allocation3], 1 }
 0xfe1   :  { %4718 = vsyncpa [#allocation3 + $0x1], 1 }

</bundles_post_ra>
